<compile_context>
chip_gen: v6e
topology: v6e:2x2x1
jax: 0.10.0
libtpu: 0.0.40
codegen_flags: <defaults>
</compile_context>

<pallas_src>
import functools

import jax
import jax.numpy as jnp
from jax.experimental import pallas as pl
from jax.experimental.pallas import tpu as pltpu

D_IN = 28 * 28        # 784
ENC_DIM = 3
ENC_PAD = 128         # narrowest storable lane width for the encoded output

ENC_DIMS = [D_IN, 128, 64, 12, ENC_DIM]   # encoder: Linear x4, Tanh between
DEC_DIMS = [ENC_DIM, 12, 64, 128, D_IN]   # decoder: Linear x4, Tanh between, Sigmoid last


def autoencoder_kernel(x_ref, *refs):
    # refs = 16 param refs (w1,b1,...,w8,b8) followed by (enc_ref, dec_ref)
    param_refs = refs[:16]
    enc_ref, dec_ref = refs[16], refs[17]

    # Input arrives f32 straight from the user array (no wrapper pad/cast pass);
    # cast to bf16 once in VMEM for the MXU.
    h = x_ref[...].astype(jnp.bfloat16)            # (tile_b, 784)

    # ----- encoder: (Linear + Tanh) x3, then Linear (N padded 3->128 lanes) -----
    for li in range(4):
        w = param_refs[2 * li][...]                # bf16 (K, N)
        b = param_refs[2 * li + 1][...]            # f32  (1, N)
        acc = jnp.dot(h, w, preferred_element_type=jnp.float32) + b
        if li < 3:
            acc = jnp.tanh(acc)                    # f32 transcendental (v5e-safe)
        else:
            enc_ref[...] = acc.astype(jnp.bfloat16)   # 128-lane bf16 store (cols 3.. are 0)
        h = acc.astype(jnp.bfloat16)

    # ----- decoder: (Linear + Tanh) x3, then Linear + Sigmoid (native 784 width) -----
    for li in range(4):
        w = param_refs[8 + 2 * li][...]
        b = param_refs[8 + 2 * li + 1][...]
        acc = jnp.dot(h, w, preferred_element_type=jnp.float32) + b
        if li < 3:
            h = jnp.tanh(acc).astype(jnp.bfloat16)
        else:
            dec_ref[...] = jax.nn.sigmoid(acc).astype(jnp.bfloat16)


def init_params(key):
    """PyTorch-default Linear init: U(-1/sqrt(fan_in), 1/sqrt(fan_in)) for W and b."""
    params = []
    dims = list(zip(ENC_DIMS[:-1], ENC_DIMS[1:])) + list(zip(DEC_DIMS[:-1], DEC_DIMS[1:]))
    for fan_in, fan_out in dims:
        key, kw, kb = jax.random.split(key, 3)
        bound = 1.0 / (fan_in ** 0.5)
        w = jax.random.uniform(kw, (fan_in, fan_out), jnp.float32, -bound, bound)
        b = jax.random.uniform(kb, (1, fan_out), jnp.float32, -bound, bound)
        params.append((w, b))
    return params


def _prepare_params(params):
    """bf16 weights / f32 biases; zero-pad only the 3-wide bottleneck dims to 128 lanes.
    Zero padding is mathematically inert (adds/multiplies zeros)."""
    prepared = []
    for li, (w, b) in enumerate(params):
        if li == 3:                                   # last encoder layer: pad N 3 -> 128
            w = jnp.pad(w, ((0, 0), (0, ENC_PAD - ENC_DIM)))
            b = jnp.pad(b, ((0, 0), (0, ENC_PAD - ENC_DIM)))
        if li == 4:                                   # first decoder layer: pad K 3 -> 128
            w = jnp.pad(w, ((0, ENC_PAD - ENC_DIM), (0, 0)))
        prepared.append((w.astype(jnp.bfloat16), b.astype(jnp.float32)))
    return prepared


@functools.partial(jax.jit, static_argnames=("tile_b",))
def autoencoder_forward(x, params, tile_b=256):
    B, D = x.shape
    assert D == D_IN
    B_pad = ((B + tile_b - 1) // tile_b) * tile_b
    grid = (B_pad // tile_b,)

    # Only the batch dim may need padding; when B % tile_b == 0 this is removed by XLA.
    x_p = jnp.pad(x, ((0, B_pad - B), (0, 0))) if B_pad != B else x
    p_params = _prepare_params(params)

    in_specs = [pl.BlockSpec((tile_b, D_IN), lambda i: (i, 0))]
    flat_params = []
    for (w, b) in p_params:
        in_specs.append(pl.BlockSpec(w.shape, lambda i: (0, 0)))   # constant block -> VMEM resident
        in_specs.append(pl.BlockSpec(b.shape, lambda i: (0, 0)))
        flat_params.extend([w, b])

    out_specs = [
        pl.BlockSpec((tile_b, ENC_PAD), lambda i: (i, 0)),   # encoded (128-lane padded, bf16)
        pl.BlockSpec((tile_b, D_IN), lambda i: (i, 0)),      # decoded (native 784, bf16)
    ]
    out_shape = [
        jax.ShapeDtypeStruct((B_pad, ENC_PAD), jnp.bfloat16),
        jax.ShapeDtypeStruct((B_pad, D_IN), jnp.bfloat16),
    ]

    enc_p, dec_p = pl.pallas_call(
        autoencoder_kernel,
        grid=grid,
        in_specs=in_specs,
        out_specs=out_specs,
        out_shape=out_shape,
        compiler_params=pltpu.CompilerParams(
            dimension_semantics=("parallel",),        # even grid shards across v7x's 2 TCs
            vmem_limit_bytes=32 * 1024 * 1024,        # > v5e 16 MiB scoped default, < v7x 64 MiB
        ),
    )(x_p, *flat_params)

    # Only the tiny encoded lane-pad (and optional batch pad) is sliced off.
    return enc_p[:B, :ENC_DIM], dec_p[:B, :]


def reference_forward(x, params):
    """Pure-JAX reference with the same bf16-weight / f32-accumulate numerics."""
    h = x.astype(jnp.bfloat16)
    enc = None
    for li, (w, b) in enumerate(params):
        acc = jnp.dot(h, w.astype(jnp.bfloat16), preferred_element_type=jnp.float32) + b
        if li == 3:                      # encoder output, no activation
            enc = acc
            h = acc.astype(jnp.bfloat16)
        elif li == 7:                    # decoder output
            return enc, jax.nn.sigmoid(acc)
        else:
            h = jnp.tanh(acc).astype(jnp.bfloat16)


if __name__ == "__main__":
    key = jax.random.PRNGKey(0)
    key, kx = jax.random.split(key)

    B = 512            # 2 grid steps of 256 rows -> even grid for v7x megacore
    x = jax.random.uniform(kx, (B, D_IN), jnp.float32)   # MNIST-like input in [0, 1)
    params = init_params(key)

    encoded, decoded = autoencoder_forward(x, params, tile_b=256)
    encoded, decoded = jax.block_until_ready((encoded, decoded))

    enc_ref, dec_ref = reference_forward(x, params)
    assert encoded.shape == (B, ENC_DIM) and decoded.shape == (B, D_IN)

    # Kernel outputs are bf16; round the f32 reference to bf16 before comparing.
    enc_ref_b = enc_ref.astype(jnp.bfloat16).astype(jnp.float32)
    dec_ref_b = dec_ref.astype(jnp.bfloat16).astype(jnp.float32)
    assert jnp.allclose(encoded.astype(jnp.float32), enc_ref_b, atol=2e-2, rtol=2e-2)
    assert jnp.allclose(decoded.astype(jnp.float32), dec_ref_b, atol=1e-2, rtol=1e-2)

    print("KERNEL_OK")
</pallas_src>

<mosaic_0001>
module attributes {stable_mosaic.version = 11 : i64} {
  func.func @autoencoder_kernel(%arg0: i32, %arg1: memref<256x784xf32, #tpu.memory_space<vmem>>, %arg2: memref<784x128xbf16, #tpu.memory_space<vmem>>, %arg3: memref<1x128xf32, #tpu.memory_space<vmem>>, %arg4: memref<128x64xbf16, #tpu.memory_space<vmem>>, %arg5: memref<1x64xf32, #tpu.memory_space<vmem>>, %arg6: memref<64x12xbf16, #tpu.memory_space<vmem>>, %arg7: memref<1x12xf32, #tpu.memory_space<vmem>>, %arg8: memref<12x128xbf16, #tpu.memory_space<vmem>>, %arg9: memref<1x128xf32, #tpu.memory_space<vmem>>, %arg10: memref<128x12xbf16, #tpu.memory_space<vmem>>, %arg11: memref<1x12xf32, #tpu.memory_space<vmem>>, %arg12: memref<12x64xbf16, #tpu.memory_space<vmem>>, %arg13: memref<1x64xf32, #tpu.memory_space<vmem>>, %arg14: memref<64x128xbf16, #tpu.memory_space<vmem>>, %arg15: memref<1x128xf32, #tpu.memory_space<vmem>>, %arg16: memref<128x784xbf16, #tpu.memory_space<vmem>>, %arg17: memref<1x784xf32, #tpu.memory_space<vmem>>, %arg18: memref<256x128xbf16, #tpu.memory_space<vmem>>, %arg19: memref<256x784xbf16, #tpu.memory_space<vmem>>) attributes {dimension_semantics = [#tpu.dimension_semantics<parallel>], iteration_bounds = array<i64: 2>, scalar_prefetch = 0 : i64, scratch_operands = 0 : i64, tpu.core_type = #tpu.core_type<tc>, window_params = [{transform_indices = @transform_0, window_bounds = array<i64: 256, 784>}, {pipeline_mode = #tpu.pipeline_mode<synchronous>, transform_indices = @transform_1, window_bounds = array<i64: 784, 128>}, {pipeline_mode = #tpu.pipeline_mode<synchronous>, transform_indices = @transform_2, window_bounds = array<i64: 1, 128>}, {pipeline_mode = #tpu.pipeline_mode<synchronous>, transform_indices = @transform_3, window_bounds = array<i64: 128, 64>}, {pipeline_mode = #tpu.pipeline_mode<synchronous>, transform_indices = @transform_4, window_bounds = array<i64: 1, 64>}, {pipeline_mode = #tpu.pipeline_mode<synchronous>, transform_indices = @transform_5, window_bounds = array<i64: 64, 12>}, {pipeline_mode = #tpu.pipeline_mode<synchronous>, transform_indices = @transform_6, window_bounds = array<i64: 1, 12>}, {pipeline_mode = #tpu.pipeline_mode<synchronous>, transform_indices = @transform_7, window_bounds = array<i64: 12, 128>}, {pipeline_mode = #tpu.pipeline_mode<synchronous>, transform_indices = @transform_8, window_bounds = array<i64: 1, 128>}, {pipeline_mode = #tpu.pipeline_mode<synchronous>, transform_indices = @transform_9, window_bounds = array<i64: 128, 12>}, {pipeline_mode = #tpu.pipeline_mode<synchronous>, transform_indices = @transform_10, window_bounds = array<i64: 1, 12>}, {pipeline_mode = #tpu.pipeline_mode<synchronous>, transform_indices = @transform_11, window_bounds = array<i64: 12, 64>}, {pipeline_mode = #tpu.pipeline_mode<synchronous>, transform_indices = @transform_12, window_bounds = array<i64: 1, 64>}, {pipeline_mode = #tpu.pipeline_mode<synchronous>, transform_indices = @transform_13, window_bounds = array<i64: 64, 128>}, {pipeline_mode = #tpu.pipeline_mode<synchronous>, transform_indices = @transform_14, window_bounds = array<i64: 1, 128>}, {pipeline_mode = #tpu.pipeline_mode<synchronous>, transform_indices = @transform_15, window_bounds = array<i64: 128, 784>}, {pipeline_mode = #tpu.pipeline_mode<synchronous>, transform_indices = @transform_16, window_bounds = array<i64: 1, 784>}, {transform_indices = @transform_17, window_bounds = array<i64: 256, 128>}, {transform_indices = @transform_18, window_bounds = array<i64: 256, 784>}]} {
    %c0 = arith.constant 0 : index
    %c0_0 = arith.constant 0 : index
    %0 = vector.load %arg1[%c0, %c0_0] : memref<256x784xf32, #tpu.memory_space<vmem>>, vector<256x784xf32>
    %1 = arith.truncf %0 : vector<256x784xf32> to vector<256x784xbf16>
    %c0_1 = arith.constant 0 : index
    %c0_2 = arith.constant 0 : index
    %2 = vector.load %arg2[%c0_1, %c0_2] : memref<784x128xbf16, #tpu.memory_space<vmem>>, vector<784x128xbf16>
    %c0_3 = arith.constant 0 : index
    %c0_4 = arith.constant 0 : index
    %3 = vector.load %arg3[%c0_3, %c0_4] : memref<1x128xf32, #tpu.memory_space<vmem>>, vector<1x128xf32>
    %cst = arith.constant dense<0.000000e+00> : vector<256x128xf32>
    %4 = tpu.matmul %1, %2, %cst {dimension_numbers = #tpu.dot_dimension_numbers<[1], [0], [0], [1], [0, 0, 1, 1], [], []>} : vector<256x784xbf16>, vector<784x128xbf16>, vector<256x128xf32> -> vector<256x128xf32>
    %5 = vector.broadcast %3 : vector<1x128xf32> to vector<256x128xf32>
    %6 = arith.addf %4, %5 : vector<256x128xf32>
    %7 = math.tanh %6 : vector<256x128xf32>
    %8 = arith.truncf %7 : vector<256x128xf32> to vector<256x128xbf16>
    %c0_5 = arith.constant 0 : index
    %c0_6 = arith.constant 0 : index
    %9 = vector.load %arg4[%c0_5, %c0_6] : memref<128x64xbf16, #tpu.memory_space<vmem>>, vector<128x64xbf16>
    %c0_7 = arith.constant 0 : index
    %c0_8 = arith.constant 0 : index
    %10 = vector.load %arg5[%c0_7, %c0_8] : memref<1x64xf32, #tpu.memory_space<vmem>>, vector<1x64xf32>
    %cst_9 = arith.constant dense<0.000000e+00> : vector<256x64xf32>
    %11 = tpu.matmul %8, %9, %cst_9 {dimension_numbers = #tpu.dot_dimension_numbers<[1], [0], [0], [1], [0, 0, 1, 1], [], []>} : vector<256x128xbf16>, vector<128x64xbf16>, vector<256x64xf32> -> vector<256x64xf32>
    %12 = vector.broadcast %10 : vector<1x64xf32> to vector<256x64xf32>
    %13 = arith.addf %11, %12 : vector<256x64xf32>
    %14 = math.tanh %13 : vector<256x64xf32>
    %15 = arith.truncf %14 : vector<256x64xf32> to vector<256x64xbf16>
    %c0_10 = arith.constant 0 : index
    %c0_11 = arith.constant 0 : index
    %16 = vector.load %arg6[%c0_10, %c0_11] : memref<64x12xbf16, #tpu.memory_space<vmem>>, vector<64x12xbf16>
    %c0_12 = arith.constant 0 : index
    %c0_13 = arith.constant 0 : index
    %17 = vector.load %arg7[%c0_12, %c0_13] : memref<1x12xf32, #tpu.memory_space<vmem>>, vector<1x12xf32>
    %cst_14 = arith.constant dense<0.000000e+00> : vector<256x12xf32>
    %18 = tpu.matmul %15, %16, %cst_14 {dimension_numbers = #tpu.dot_dimension_numbers<[1], [0], [0], [1], [0, 0, 1, 1], [], []>} : vector<256x64xbf16>, vector<64x12xbf16>, vector<256x12xf32> -> vector<256x12xf32>
    %19 = vector.broadcast %17 : vector<1x12xf32> to vector<256x12xf32>
    %20 = arith.addf %18, %19 : vector<256x12xf32>
    %21 = math.tanh %20 : vector<256x12xf32>
    %22 = arith.truncf %21 : vector<256x12xf32> to vector<256x12xbf16>
    %c0_15 = arith.constant 0 : index
    %c0_16 = arith.constant 0 : index
    %23 = vector.load %arg8[%c0_15, %c0_16] : memref<12x128xbf16, #tpu.memory_space<vmem>>, vector<12x128xbf16>
    %c0_17 = arith.constant 0 : index
    %c0_18 = arith.constant 0 : index
    %24 = vector.load %arg9[%c0_17, %c0_18] : memref<1x128xf32, #tpu.memory_space<vmem>>, vector<1x128xf32>
    %cst_19 = arith.constant dense<0.000000e+00> : vector<256x128xf32>
    %25 = tpu.matmul %22, %23, %cst_19 {dimension_numbers = #tpu.dot_dimension_numbers<[1], [0], [0], [1], [0, 0, 1, 1], [], []>} : vector<256x12xbf16>, vector<12x128xbf16>, vector<256x128xf32> -> vector<256x128xf32>
    %26 = vector.broadcast %24 : vector<1x128xf32> to vector<256x128xf32>
    %27 = arith.addf %25, %26 : vector<256x128xf32>
    %28 = arith.truncf %27 : vector<256x128xf32> to vector<256x128xbf16>
    %c0_20 = arith.constant 0 : index
    %c0_21 = arith.constant 0 : index
    %29 = vector.load %arg18[%c0_20, %c0_21] : memref<256x128xbf16, #tpu.memory_space<vmem>>, vector<256x128xbf16>
    tpu.vector_store %arg18[%c0_20, %c0_21], %28 {strides = array<i32>} : memref<256x128xbf16, #tpu.memory_space<vmem>>, vector<256x128xbf16>,
    %30 = arith.truncf %27 : vector<256x128xf32> to vector<256x128xbf16>
    %c0_22 = arith.constant 0 : index
    %c0_23 = arith.constant 0 : index
    %31 = vector.load %arg10[%c0_22, %c0_23] : memref<128x12xbf16, #tpu.memory_space<vmem>>, vector<128x12xbf16>
    %c0_24 = arith.constant 0 : index
    %c0_25 = arith.constant 0 : index
    %32 = vector.load %arg11[%c0_24, %c0_25] : memref<1x12xf32, #tpu.memory_space<vmem>>, vector<1x12xf32>
    %cst_26 = arith.constant dense<0.000000e+00> : vector<256x12xf32>
    %33 = tpu.matmul %30, %31, %cst_26 {dimension_numbers = #tpu.dot_dimension_numbers<[1], [0], [0], [1], [0, 0, 1, 1], [], []>} : vector<256x128xbf16>, vector<128x12xbf16>, vector<256x12xf32> -> vector<256x12xf32>
    %34 = vector.broadcast %32 : vector<1x12xf32> to vector<256x12xf32>
    %35 = arith.addf %33, %34 : vector<256x12xf32>
    %36 = math.tanh %35 : vector<256x12xf32>
    %37 = arith.truncf %36 : vector<256x12xf32> to vector<256x12xbf16>
    %c0_27 = arith.constant 0 : index
    %c0_28 = arith.constant 0 : index
    %38 = vector.load %arg12[%c0_27, %c0_28] : memref<12x64xbf16, #tpu.memory_space<vmem>>, vector<12x64xbf16>
    %c0_29 = arith.constant 0 : index
    %c0_30 = arith.constant 0 : index
    %39 = vector.load %arg13[%c0_29, %c0_30] : memref<1x64xf32, #tpu.memory_space<vmem>>, vector<1x64xf32>
    %cst_31 = arith.constant dense<0.000000e+00> : vector<256x64xf32>
    %40 = tpu.matmul %37, %38, %cst_31 {dimension_numbers = #tpu.dot_dimension_numbers<[1], [0], [0], [1], [0, 0, 1, 1], [], []>} : vector<256x12xbf16>, vector<12x64xbf16>, vector<256x64xf32> -> vector<256x64xf32>
    %41 = vector.broadcast %39 : vector<1x64xf32> to vector<256x64xf32>
    %42 = arith.addf %40, %41 : vector<256x64xf32>
    %43 = math.tanh %42 : vector<256x64xf32>
    %44 = arith.truncf %43 : vector<256x64xf32> to vector<256x64xbf16>
    %c0_32 = arith.constant 0 : index
    %c0_33 = arith.constant 0 : index
    %45 = vector.load %arg14[%c0_32, %c0_33] : memref<64x128xbf16, #tpu.memory_space<vmem>>, vector<64x128xbf16>
    %c0_34 = arith.constant 0 : index
    %c0_35 = arith.constant 0 : index
    %46 = vector.load %arg15[%c0_34, %c0_35] : memref<1x128xf32, #tpu.memory_space<vmem>>, vector<1x128xf32>
    %cst_36 = arith.constant dense<0.000000e+00> : vector<256x128xf32>
    %47 = tpu.matmul %44, %45, %cst_36 {dimension_numbers = #tpu.dot_dimension_numbers<[1], [0], [0], [1], [0, 0, 1, 1], [], []>} : vector<256x64xbf16>, vector<64x128xbf16>, vector<256x128xf32> -> vector<256x128xf32>
    %48 = vector.broadcast %46 : vector<1x128xf32> to vector<256x128xf32>
    %49 = arith.addf %47, %48 : vector<256x128xf32>
    %50 = math.tanh %49 : vector<256x128xf32>
    %51 = arith.truncf %50 : vector<256x128xf32> to vector<256x128xbf16>
    %c0_37 = arith.constant 0 : index
    %c0_38 = arith.constant 0 : index
    %52 = vector.load %arg16[%c0_37, %c0_38] : memref<128x784xbf16, #tpu.memory_space<vmem>>, vector<128x784xbf16>
    %c0_39 = arith.constant 0 : index
    %c0_40 = arith.constant 0 : index
    %53 = vector.load %arg17[%c0_39, %c0_40] : memref<1x784xf32, #tpu.memory_space<vmem>>, vector<1x784xf32>
    %cst_41 = arith.constant dense<0.000000e+00> : vector<256x784xf32>
    %54 = tpu.matmul %51, %52, %cst_41 {dimension_numbers = #tpu.dot_dimension_numbers<[1], [0], [0], [1], [0, 0, 1, 1], [], []>} : vector<256x128xbf16>, vector<128x784xbf16>, vector<256x784xf32> -> vector<256x784xf32>
    %55 = vector.broadcast %53 : vector<1x784xf32> to vector<256x784xf32>
    %56 = arith.addf %54, %55 : vector<256x784xf32>
    %57 = arith.negf %56 : vector<256x784xf32>
    %58 = math.exp %57 : vector<256x784xf32>
    %cst_42 = arith.constant 1.000000e+00 : f32
    %59 = vector.broadcast %cst_42 : f32 to vector<256x784xf32>
    %60 = arith.addf %59, %58 : vector<256x784xf32>
    %61 = arith.divf %59, %60 : vector<256x784xf32>
    %62 = arith.truncf %61 : vector<256x784xf32> to vector<256x784xbf16>
    %c0_43 = arith.constant 0 : index
    %c0_44 = arith.constant 0 : index
    %63 = vector.load %arg19[%c0_43, %c0_44] : memref<256x784xbf16, #tpu.memory_space<vmem>>, vector<256x784xbf16>
    tpu.vector_store %arg19[%c0_43, %c0_44], %62 {strides = array<i32>} : memref<256x784xbf16, #tpu.memory_space<vmem>>, vector<256x784xbf16>,
    return
  }
  func.func @transform_0(%arg0: i32) -> (i32, i32) {
    %c0_i32 = arith.constant 0 : i32
    %c0_i32_0 = arith.constant 0 : i32
    return %arg0, %c0_i32 : i32, i32
  }
  func.func @transform_1(%arg0: i32) -> (i32, i32) {
    %c0_i32 = arith.constant 0 : i32
    %c0_i32_0 = arith.constant 0 : i32
    %c0_i32_1 = arith.constant 0 : i32
    return %c0_i32, %c0_i32_0 : i32, i32
  }
  func.func @transform_2(%arg0: i32) -> (i32, i32) {
    %c0_i32 = arith.constant 0 : i32
    %c0_i32_0 = arith.constant 0 : i32
    %c0_i32_1 = arith.constant 0 : i32
    return %c0_i32, %c0_i32_0 : i32, i32
  }
  func.func @transform_3(%arg0: i32) -> (i32, i32) {
    %c0_i32 = arith.constant 0 : i32
    %c0_i32_0 = arith.constant 0 : i32
    %c0_i32_1 = arith.constant 0 : i32
    return %c0_i32, %c0_i32_0 : i32, i32
  }
  func.func @transform_4(%arg0: i32) -> (i32, i32) {
    %c0_i32 = arith.constant 0 : i32
    %c0_i32_0 = arith.constant 0 : i32
    %c0_i32_1 = arith.constant 0 : i32
    return %c0_i32, %c0_i32_0 : i32, i32
  }
  func.func @transform_5(%arg0: i32) -> (i32, i32) {
    %c0_i32 = arith.constant 0 : i32
    %c0_i32_0 = arith.constant 0 : i32
    %c0_i32_1 = arith.constant 0 : i32
    return %c0_i32, %c0_i32_0 : i32, i32
  }
  func.func @transform_6(%arg0: i32) -> (i32, i32) {
    %c0_i32 = arith.constant 0 : i32
    %c0_i32_0 = arith.constant 0 : i32
    %c0_i32_1 = arith.constant 0 : i32
    return %c0_i32, %c0_i32_0 : i32, i32
  }
  func.func @transform_7(%arg0: i32) -> (i32, i32) {
    %c0_i32 = arith.constant 0 : i32
    %c0_i32_0 = arith.constant 0 : i32
    %c0_i32_1 = arith.constant 0 : i32
    return %c0_i32, %c0_i32_0 : i32, i32
  }
  func.func @transform_8(%arg0: i32) -> (i32, i32) {
    %c0_i32 = arith.constant 0 : i32
    %c0_i32_0 = arith.constant 0 : i32
    %c0_i32_1 = arith.constant 0 : i32
    return %c0_i32, %c0_i32_0 : i32, i32
  }
  func.func @transform_9(%arg0: i32) -> (i32, i32) {
    %c0_i32 = arith.constant 0 : i32
    %c0_i32_0 = arith.constant 0 : i32
    %c0_i32_1 = arith.constant 0 : i32
    return %c0_i32, %c0_i32_0 : i32, i32
  }
  func.func @transform_10(%arg0: i32) -> (i32, i32) {
    %c0_i32 = arith.constant 0 : i32
    %c0_i32_0 = arith.constant 0 : i32
    %c0_i32_1 = arith.constant 0 : i32
    return %c0_i32, %c0_i32_0 : i32, i32
  }
  func.func @transform_11(%arg0: i32) -> (i32, i32) {
    %c0_i32 = arith.constant 0 : i32
    %c0_i32_0 = arith.constant 0 : i32
    %c0_i32_1 = arith.constant 0 : i32
    return %c0_i32, %c0_i32_0 : i32, i32
  }
  func.func @transform_12(%arg0: i32) -> (i32, i32) {
    %c0_i32 = arith.constant 0 : i32
    %c0_i32_0 = arith.constant 0 : i32
    %c0_i32_1 = arith.constant 0 : i32
    return %c0_i32, %c0_i32_0 : i32, i32
  }
  func.func @transform_13(%arg0: i32) -> (i32, i32) {
    %c0_i32 = arith.constant 0 : i32
    %c0_i32_0 = arith.constant 0 : i32
    %c0_i32_1 = arith.constant 0 : i32
    return %c0_i32, %c0_i32_0 : i32, i32
  }
  func.func @transform_14(%arg0: i32) -> (i32, i32) {
    %c0_i32 = arith.constant 0 : i32
    %c0_i32_0 = arith.constant 0 : i32
    %c0_i32_1 = arith.constant 0 : i32
    return %c0_i32, %c0_i32_0 : i32, i32
  }
  func.func @transform_15(%arg0: i32) -> (i32, i32) {
    %c0_i32 = arith.constant 0 : i32
    %c0_i32_0 = arith.constant 0 : i32
    %c0_i32_1 = arith.constant 0 : i32
    return %c0_i32, %c0_i32_0 : i32, i32
  }
  func.func @transform_16(%arg0: i32) -> (i32, i32) {
    %c0_i32 = arith.constant 0 : i32
    %c0_i32_0 = arith.constant 0 : i32
    %c0_i32_1 = arith.constant 0 : i32
    return %c0_i32, %c0_i32_0 : i32, i32
  }
  func.func @transform_17(%arg0: i32) -> (i32, i32) {
    %c0_i32 = arith.constant 0 : i32
    %c0_i32_0 = arith.constant 0 : i32
    return %arg0, %c0_i32 : i32, i32
  }
  func.func @transform_18(%arg0: i32) -> (i32, i32) {
    %c0_i32 = arith.constant 0 : i32
    %c0_i32_0 = arith.constant 0 : i32
    return %arg0, %c0_i32 : i32, i32
  }
}

</mosaic_0001>

<bundles_post_ra>
// kernel: autoencoder_forward.1
= control target key start
LH: loop header
LB: loop body
LE: loop exit
PB: predicated region body
PF: predicated region fallthrough
CT: control target
= control target key end

     0   :  { %s10536_s27 = smov 0   ;;  %s12570_s0 = inlined_call_operand.vmem [shape: f32[512,784], index: 0, kind: input, shape index: {}]   ;;  %s12571_s1 = inlined_call_operand.vmem [shape: bf16[784,128], index: 1, kind: input, shape index: {}]   ;;  %s12572_s2 = inlined_call_operand.vmem [shape: f32[1,128], index: 2, kind: input, shape index: {}]   ;;  %s12573_s3 = inlined_call_operand.vmem [shape: bf16[128,64], index: 3, kind: input, shape index: {}]   ;;  %s12574_s4 = inlined_call_operand.vmem [shape: f32[1,64], index: 4, kind: input, shape index: {}]   ;;  %s12575_s5 = inlined_call_operand.vmem [shape: bf16[64,12], index: 5, kind: input, shape index: {}]   ;;  %s12576_s6 = inlined_call_operand.vmem [shape: f32[1,12], index: 6, kind: input, shape index: {}]   ;;  %s12577_s7 = inlined_call_operand.vmem [shape: bf16[12,128], index: 7, kind: input, shape index: {}]   ;;  %s12578_s8 = inlined_call_operand.vmem [shape: f32[1,128], index: 8, kind: input, shape index: {}]   ;;  %s12579_s9 = inlined_call_operand.vmem [shape: bf16[128,12], index: 9, kind: input, shape index: {}]   ;;  %s12580_s10 = inlined_call_operand.vmem [shape: f32[1,12], index: 10, kind: input, shape index: {}]   ;;  %s12581_s11 = inlined_call_operand.vmem [shape: bf16[12,64], index: 11, kind: input, shape index: {}]   ;;  %s12582_s12 = inlined_call_operand.vmem [shape: f32[1,64], index: 12, kind: input, shape index: {}]   ;;  %s12583_s13 = inlined_call_operand.vmem [shape: bf16[64,128], index: 13, kind: input, shape index: {}]   ;;  %s12584_s14 = inlined_call_operand.vmem [shape: f32[1,128], index: 14, kind: input, shape index: {}]   ;;  %s12585_s15 = inlined_call_operand.vmem [shape: bf16[128,784], index: 15, kind: input, shape index: {}]   ;;  %s12586_s16 = inlined_call_operand.vmem [shape: f32[1,784], index: 16, kind: input, shape index: {}]   ;;  %s12587_s17 = inlined_call_operand.vmem [shape: bf16[512,128], index: 17, kind: output, shape index: {0}]   ;;  %s12588_s18 = inlined_call_operand.vmem [shape: bf16[512,784], index: 18, kind: output, shape index: {1}]  }
   0x1   :  { %12590 = sst [smem:[#allocation2_spill]] %s12570_s0 }
   0x2   :  { %12591 = sst [smem:[#allocation3_spill]] %s12571_s1 }
   0x3   :  { %12592 = sst [smem:[#allocation4_spill]] %s12572_s2 }
   0x4 LB: > { %s7288_s28 = sadd.s32 4294967295, %s10438_s27   ;;  %p7292_p0 = scmp.ge.s32.totalorder %s10438_s27, 1  ;;  %s10438_s27 = sphi %s10536_s27, %s29_s27  }
   0x5   : > { %p517_p1 = scmp.lt.s32.totalorder %s10438_s27, 3 }
   0x7   : > { %p518_p2 = pnand %p7292_p0, %p517_p1 }
   0x8   : > { %s12593_s0 = sld [smem:[#allocation3_spill]] (!%p518_p2)  ;;  %s7293_s20 = sshll.u32 (!%p518_p2), %s7288_s28, 5 }
   0x9   : > { %521 = sbr.rel (%p518_p2) target bundleno = 2358 (0x936), region = 88  ;;  %p579_p3 = scmp.lt.s32.totalorder (!%p518_p2), %s7293_s20, 63 }
   0xa   : > { %s12594_s30 = sld [smem:[#allocation2_spill]] (!%p518_p2) }
   0xb   : > { %s12595_s25 = sld [smem:[#allocation4_spill]] (!%p518_p2) }
   0xe   : > { %v8996_v0 = vld [vmem:[%s12593_s0 + $0x78] sm:$0xff]   ;;  %v9000_v4 = vld [vmem:[%s12593_s0 + $0x70] sm:$0xff]   ;;  %v9004_v8 = vld [vmem:[%s12593_s0 + $0x68] sm:$0xff]   ;;  %s12597_s20 = smov (!%p579_p3, %s7293_s20), 63  ;;  %vm1334_vm0 = vcmask 130048   ;;  %vm2715_vm1 = vcmask 1045504  }
   0xf   : > { %v8997_v1 = vld [vmem:[%s12593_s0 + $0x38] sm:$0xff]   ;;  %8158 = vmatprep.subr.bf16.mxu0 %v8996_v0  ;;  %v9001_v5 = vld [vmem:[%s12593_s0 + $0x30] sm:$0xff]   ;;  %v9005_v9 = vld [vmem:[%s12593_s0 + $0x28] sm:$0xff]   ;;  %s8985_s19 = smul.u32 56, %s12597_s20  ;;  %vm2394_vm2 = vcmask 523264   ;;  %vm2666_vm3 = vcmask 97280  }
  0x10   : > { %v8998_v2 = vld [vmem:[%s12593_s0 + $0xf8] sm:$0xff]   ;;  %8159 = vmatpush3.bf16.msra.mxu0 %v8997_v1  ;;  %v9002_v6 = vld [vmem:[%s12593_s0 + $0xf0] sm:$0xff]   ;;  %v9006_v10 = vld [vmem:[%s12593_s0 + $0xe8] sm:$0xff]   ;;  %s7296_s2 = sshll.u32 %s12597_s20, 2  ;;  %vm7070_vm4 = vcmask 125952  }
  0x11   : > { %v8999_v3 = vld [vmem:[%s12593_s0 + $0xb8] sm:$0xff]   ;;  %8270 = vmatprep.subr.bf16.mxu1 %v8998_v2  ;;  %8160 = vmatprep.subr.bf16.mxu0 %v9000_v4  ;;  %v9003_v7 = vld [vmem:[%s12593_s0 + $0xb0] sm:$0xff]   ;;  %v9007_v11 = vld [vmem:[%s12593_s0 + $0xa8] sm:$0xff]   ;;  %s10639_s1 = scalar_lea.vmem %s12594_s30, %s8985_s19  ;;  %s11261_s19 = scalar_lea.vmem %s12587_s17, %s7296_s2 }
  0x12   : > { %8271 = vmatpush3.bf16.msra.mxu1 %v8999_v3  ;;  %v9008_v12 = vld [vmem:[%s12593_s0 + $0x60] sm:$0xff]   ;;  %v9012_v16 = vld [vmem:[%s12593_s0 + $0x58] sm:$0xff]   ;;  %v9016_v20 = vld [vmem:[%s12593_s0 + $0x50] sm:$0xff]   ;;  %s8986_s2 = smul.u32 28, %s12597_s20 }
  0x13   : > { %8272 = vmatprep.subr.bf16.mxu1 %v9002_v6  ;;  %v9009_v13 = vld [vmem:[%s12593_s0 + $0x20] sm:$0xff]   ;;  %v9013_v17 = vld [vmem:[%s12593_s0 + $0x18] sm:$0xff]   ;;  %v9017_v21 = vld [vmem:[%s12593_s0 + $0x10] sm:$0xff]  }
  0x14   : > { %8161 = vmatpush3.bf16.msra.mxu0 %v9001_v5  ;;  %v9010_v14 = vld [vmem:[%s12593_s0 + $0xe0] sm:$0xff]   ;;  %v9014_v18 = vld [vmem:[%s12593_s0 + $0xd8] sm:$0xff]   ;;  %v9018_v22 = vld [vmem:[%s12593_s0 + $0xd0] sm:$0xff]  }
  0x15   : > { %8162 = vmatprep.subr.bf16.mxu0 %v9004_v8  ;;  %v9011_v15 = vld [vmem:[%s12593_s0 + $0xa0] sm:$0xff]   ;;  %v9015_v19 = vld [vmem:[%s12593_s0 + $0x98] sm:$0xff]   ;;  %v9019_v23 = vld [vmem:[%s12593_s0 + $0x90] sm:$0xff]  }
  0x16   : > { %8273 = vmatpush3.bf16.msra.mxu1 %v9003_v7  ;;  %v9020_v24 = vld [vmem:[%s12593_s0 + $0x48] sm:$0xff]   ;;  %v9024_v28 = vld [vmem:[%s12593_s0 + $0x40] sm:$0xff]   ;;  %v606_v36 = vld [vmem:[%s10639_s1 + $0x38] sm:$0xff] }
  0x17   : > { %8274 = vmatprep.subr.bf16.mxu1 %v9006_v10  ;;  %v9021_v25 = vld [vmem:[%s12593_s0 + $0x8] sm:$0xff]   ;;  %v9025_v29 = vld [vmem:[%s12593_s0] sm:$0xff]   ;;  %v9028_v38 = vld [vmem:[%s12593_s0 + $0x178] sm:$0xff]  }
  0x18   : > { %8163 = vmatpush3.bf16.msra.mxu0 %v9005_v9  ;;  %v9022_v26 = vld [vmem:[%s12593_s0 + $0xc8] sm:$0xff]   ;;  %v9026_v30 = vld [vmem:[%s12593_s0 + $0xc0] sm:$0xff]   ;;  %v602_v39 = vld [vmem:[%s10639_s1 + $0x18] sm:$0xff] }
  0x19   : > { %8164 = vmatprep.subr.bf16.mxu0 %v9008_v12  ;;  %v9023_v27 = vld [vmem:[%s12593_s0 + $0x88] sm:$0xff]   ;;  %v607_v32 = vld [vmem:[%s10639_s1 + $0x40] sm:$0xff]  ;;  %v609_v40 = vld [vmem:[%s10639_s1 + $0x50] sm:$0xff] }
  0x1a   : > { %8275 = vmatpush3.bf16.msra.mxu1 %v9007_v11  ;;  %v600_v31 = vld [vmem:[%s10639_s1 + $0x8] sm:$0xff]  ;;  %v9027_v34 = vld [vmem:[%s12593_s0 + $0x80] sm:$0xff]   ;;  %v826_v41 = vpack.c.bf16 %v609_v40, %v602_v39  ;;  %v9029_v42 = vld [vmem:[%s12593_s0 + $0x138] sm:$0xff]  }
  0x1b   : > { %8276 = vmatprep.subr.bf16.mxu1 %v9010_v14  ;;  %v824_v33 = vpack.c.bf16 %v607_v32, %v600_v31  ;;  %v599_v35 = vld [vmem:[%s10639_s1] sm:$0xff]  ;;  %v601_v43 = vld [vmem:[%s10639_s1 + $0x10] sm:$0xff]  ;;  %v608_v44 = vld [vmem:[%s10639_s1 + $0x48] sm:$0xff] }
  0x1c   : > { %8165 = vmatpush3.bf16.msra.mxu0 %v9009_v13  ;;  %v823_v37 = vpack.c.bf16 %v606_v36, %v599_v35  ;;  %v614_v45 = vld [vmem:[%s10639_s1 + $0x78] sm:$0xff]  ;;  %1576 = vmatprep.mubr.bf16.mxu1 %v826_v41  ;;  %v825_v46 = vpack.c.bf16 %v608_v44, %v601_v43  ;;  %v621_v47 = vld [vmem:[%s10639_s1 + $0xb0] sm:$0xff]  ;;  %v620_v49 = vld [vmem:[%s10639_s1 + $0xa8] sm:$0xff] }
  0x1d   : > { %8166 = vmatprep.subr.bf16.mxu0 %v9012_v16  ;;  %1415 = vmatprep.mubr.bf16.mxu0 %v824_v33  ;;  %v613_v48 = vld [vmem:[%s10639_s1 + $0x70] sm:$0xff]  ;;  %v831_v50 = vpack.c.bf16 %v621_v47, %v614_v45  ;;  %v616_v51 = vld [vmem:[%s10639_s1 + $0x88] sm:$0xff]  ;;  %v623_v52 = vld [vmem:[%s10639_s1 + $0xc0] sm:$0xff] }
  0x1e   : > { %8277 = vmatpush3.bf16.msra.mxu1 %v9011_v15  ;;  %v615_v53 = vld [vmem:[%s10639_s1 + $0x80] sm:$0xff]  ;;  %v833_v54 = vpack.c.bf16 %v623_v52, %v616_v51  ;;  %v622_v55 = vld [vmem:[%s10639_s1 + $0xb8] sm:$0xff]  ;;  %v830_v56 = vpack.c.bf16 %v620_v49, %v613_v48  ;;  %v628_v58 = vld [vmem:[%s10639_s1 + $0xe8] sm:$0xff] }
  0x1f   : > { %8278 = vmatprep.subr.bf16.mxu1 %v9014_v18  ;;  %v9030_v57 = vld [vmem:[%s12593_s0 + $0x180] sm:$0xff]   ;;  %v9031_v61 = vld [vmem:[%s12593_s0 + $0x170] sm:$0xff]   ;;  %v630_v62 = vld [vmem:[%s10639_s1 + $0xf8] sm:$0xff]  ;;  %v832_v63 = vpack.c.bf16 %v622_v55, %v615_v53 }
  0x20   : > { %8167 = vmatpush3.bf16.msra.mxu0 %v9013_v17  ;;  %v635_v59 = vld [vmem:[%s10639_s1 + $0x120] sm:$0xff]  ;;  %v637_v0 = vld [vmem:[%s10639_s1 + $0x130] sm:$0xff]  ;;  %v634_v4 = vld [vmem:[%s10639_s1 + $0x118] sm:$0xff] }
  0x21   : > { %8168 = vmatprep.subr.bf16.mxu0 %v9016_v20  ;;  %v838_v60 = vpack.c.bf16 %v635_v59, %v628_v58  ;;  %v840_v1 = vpack.c.bf16 %v637_v0, %v630_v62  ;;  %v9032_v2 = vld [vmem:[%s12593_s0 + $0x130] sm:$0xff]   ;;  %v627_v3 = vld [vmem:[%s10639_s1 + $0xe0] sm:$0xff]  ;;  %v642_v5 = vld [vmem:[%s10639_s1 + $0x158] sm:$0xff] }
  0x22   : > { %8279 = vmatpush3.bf16.msra.mxu1 %v9015_v19  ;;  %v649_v6 = vld [vmem:[%s10639_s1 + $0x190] sm:$0xff]  ;;  %v837_v8 = vpack.c.bf16 %v634_v4, %v627_v3  ;;  %v636_v9 = vld [vmem:[%s10639_s1 + $0x128] sm:$0xff]  ;;  %v651_v11 = vld [vmem:[%s10639_s1 + $0x1a0] sm:$0xff] }
  0x23   : > { %8280 = vmatprep.subr.bf16.mxu1 %v9018_v22  ;;  %v629_v7 = vld [vmem:[%s10639_s1 + $0xf0] sm:$0xff]  ;;  %v644_v10 = vld [vmem:[%s10639_s1 + $0x168] sm:$0xff]  ;;  %v845_v12 = vpack.c.bf16 %v649_v6, %v642_v5  ;;  %v663_v20 = vld [vmem:[%s10639_s1 + $0x200] sm:$0xff] }
  0x24   : > { %8169 = vmatpush3.bf16.msra.mxu0 %v9017_v21  ;;  %v9033_v13 = vld [vmem:[%s12593_s0 + $0x168] sm:$0xff]   ;;  %v839_v14 = vpack.c.bf16 %v636_v9, %v629_v7  ;;  %v847_v16 = vpack.c.bf16 %v651_v11, %v644_v10  ;;  %v641_v17 = vld [vmem:[%s10639_s1 + $0x150] sm:$0xff]  ;;  %v643_v21 = vld [vmem:[%s10639_s1 + $0x160] sm:$0xff] }
  0x25   : > { %8170 = vmatprep.subr.bf16.mxu0 %v9020_v24  ;;  %v9034_v15 = vld [vmem:[%s12593_s0 + $0x128] sm:$0xff]   ;;  %v655_v31 = vld [vmem:[%s10639_s1 + $0x1c0] sm:$0xff]  ;;  %v662_v32 = vld [vmem:[%s10639_s1 + $0x1f8] sm:$0xff] }
  0x26   : > { %8281 = vmatpush3.bf16.msra.mxu1 %v9019_v23  ;;  %v648_v18 = vld [vmem:[%s10639_s1 + $0x188] sm:$0xff]  ;;  %v650_v23 = vld [vmem:[%s10639_s1 + $0x198] sm:$0xff]  ;;  %v657_v35 = vld [vmem:[%s10639_s1 + $0x1d0] sm:$0xff] }
  0x27   : > { %8282 = vmatprep.subr.bf16.mxu1 %v9022_v26  ;;  %v656_v19 = vld [vmem:[%s10639_s1 + $0x1c8] sm:$0xff]  ;;  %v844_v22 = vpack.c.bf16 %v648_v18, %v641_v17  ;;  %v665_v26 = vld [vmem:[%s10639_s1 + $0x210] sm:$0xff]  ;;  %v670_v33 = vld [vmem:[%s10639_s1 + $0x238] sm:$0xff] }
  0x28   : > { %8171 = vmatpush3.bf16.msra.mxu0 %v9021_v25  ;;  %v852_v24 = vpack.c.bf16 %v663_v20, %v656_v19  ;;  %v658_v25 = vld [vmem:[%s10639_s1 + $0x1d8] sm:$0xff]  ;;  %v664_v36 = vld [vmem:[%s10639_s1 + $0x208] sm:$0xff]  ;;  %v679_v41 = vld [vmem:[%s10639_s1 + $0x280] sm:$0xff] }
  0x29   : > { %8172 = vmatprep.subr.bf16.mxu0 %v9024_v28  ;;  %v9036_v28 = vld [vmem:[%s12593_s0 + $0x120] sm:$0xff]   ;;  %v9037_v39 = vld [vmem:[%s12593_s0 + $0x158] sm:$0xff]   ;;  %v853_v43 = vpack.c.bf16 %v664_v36, %v657_v35  ;;  %v669_v45 = vld [vmem:[%s10639_s1 + $0x230] sm:$0xff] }
  0x2a   : > { %8283 = vmatpush3.bf16.msra.mxu1 %v9023_v27  ;;  %v9035_v27 = vld [vmem:[%s12593_s0 + $0x160] sm:$0xff]   ;;  %v684_v48 = vld [vmem:[%s10639_s1 + $0x2a8] sm:$0xff]  ;;  %v678_v52 = vld [vmem:[%s10639_s1 + $0x278] sm:$0xff] }
  0x2b   : > { %8284 = vmatprep.subr.bf16.mxu1 %v9026_v30  ;;  %v854_v30 = vpack.c.bf16 %v665_v26, %v658_v25  ;;  %v671_v47 = vld [vmem:[%s10639_s1 + $0x240] sm:$0xff]  ;;  %v686_v53 = vld [vmem:[%s10639_s1 + $0x2b8] sm:$0xff]  ;;  %v693_v55 = vld [vmem:[%s10639_s1 + $0x2f0] sm:$0xff] }
  0x2c   : > { %8173 = vmatpush3.bf16.msra.mxu0 %v9025_v29  ;;  %v846_v29 = vpack.c.bf16 %v650_v23, %v643_v21  ;;  %v691_v49 = vld [vmem:[%s10639_s1 + $0x2e0] sm:$0xff]  ;;  %v868_v58 = vpack.c.bf16 %v693_v55, %v686_v53  ;;  %v705_v62 = vld [vmem:[%s10639_s1 + $0x350] sm:$0xff]  ;;  %v692_v0 = vld [vmem:[%s10639_s1 + $0x2e8] sm:$0xff] }
  0x2d   : > { %8382 = vmatprep.subr.bf16.mxu0 %v9028_v38  ;;  %v672_v38 = vld [vmem:[%s10639_s1 + $0x248] sm:$0xff]  ;;  %v683_v59 = vld [vmem:[%s10639_s1 + $0x2a0] sm:$0xff]  ;;  %v714_v19 = vld [vmem:[%s10639_s1 + $0x398] sm:$0xff] }
  0x2e   : > { %8285 = vmatpush3.bf16.msra.mxu1 %v9027_v34  ;;  %v677_v34 = vld [vmem:[%s10639_s1 + $0x270] sm:$0xff]  ;;  %v861_v44 = vpack.c.bf16 %v679_v41, %v672_v38  ;;  %v9042_v3 = vld [vmem:[%s12593_s0 + $0x108] sm:$0xff]   ;;  %v707_v6 = vld [vmem:[%s10639_s1 + $0x360] sm:$0xff] }
  0x2f   : > { %1416 = vmatmul.mubr.bf16.vlgmr.msra.gmra.mxu0 %v823_v37  ;;  %8657 = vmatprep.subr.bf16.mxu1 %v9030_v57  ;;  %v851_v37 = vpack.c.bf16 %v662_v32, %v655_v31  ;;  %v859_v40 = vpack.c.bf16 %v677_v34, %v670_v33  ;;  %v700_v5 = vld [vmem:[%s10639_s1 + $0x328] sm:$0xff]  ;;  %v9044_v17 = vld [vmem:[%s12593_s0 + $0x100] sm:$0xff]   ;;  %v721_v20 = vld [vmem:[%s10639_s1 + $0x3d0] sm:$0xff] }
  0x30   : > { %8383 = vmatpush3.bf16.msra.mxu0 %v9029_v42  ;;  %1423 = vmatprep.mubr.bf16.mxu0 %v831_v50  ;;  %v9038_v42 = vld [vmem:[%s12593_s0 + $0x118] sm:$0xff]   ;;  %v9039_v50 = vld [vmem:[%s12593_s0 + $0x150] sm:$0xff]   ;;  %v875_v9 = vpack.c.bf16 %v707_v6, %v700_v5  ;;  %v704_v10 = vld [vmem:[%s10639_s1 + $0x348] sm:$0xff] }
  0x31   : > { %1577 = vmatmul.mubr.bf16.vlgmr.msra.gmra.mxu1 %v825_v46  ;;  %8384 = vmatprep.subr.bf16.mxu0 %v9031_v61  ;;  %v676_v46 = vld [vmem:[%s10639_s1 + $0x268] sm:$0xff]  ;;  %v698_v61 = vld [vmem:[%s10639_s1 + $0x318] sm:$0xff]  ;;  %v711_v23 = vld [vmem:[%s10639_s1 + $0x380] sm:$0xff] }
  0x32   : > { %1584 = vmatprep.mubr.bf16.mxu1 %v833_v54  ;;  %8658 = vmatpush3.bf16.msra.mxu1 %v9030_v57  ;;  %v858_v51 = vpack.c.bf16 %v676_v46, %v669_v45  ;;  %v866_v54 = vpack.c.bf16 %v691_v49, %v684_v48  ;;  %v860_v57 = vpack.c.bf16 %v678_v52, %v671_v47  ;;  %v712_v11 = vld [vmem:[%s10639_s1 + $0x388] sm:$0xff]  ;;  %v726_v25 = vld [vmem:[%s10639_s1 + $0x3f8] sm:$0xff]  ;;  %v733_v26 = vld [vmem:[%s10639_s1 + $0x430] sm:$0xff] }
  0x33   : > { %v873_v4 = vpack.c.bf16 %v705_v62, %v698_v61  ;;  %v728_v31 = vld [vmem:[%s10639_s1 + $0x408] sm:$0xff]  ;;  %v735_v32 = vld [vmem:[%s10639_s1 + $0x440] sm:$0xff]  ;;  %v725_v35 = vld [vmem:[%s10639_s1 + $0x3f0] sm:$0xff] }
  0x34   : > { %8385 = vmatpush3.bf16.msra.mxu0 %v9032_v2  ;;  %v889_v34 = vpack.c.bf16 %v735_v32, %v728_v31  ;;  %v732_v36 = vld [vmem:[%s10639_s1 + $0x428] sm:$0xff]  ;;  %v747_v38 = vld [vmem:[%s10639_s1 + $0x4a0] sm:$0xff]  ;;  %v734_v41 = vld [vmem:[%s10639_s1 + $0x438] sm:$0xff] }
  0x35   : > { %8386 = vmatprep.subr.bf16.mxu0 %v9033_v13  ;;  %v9043_v13 = vld [vmem:[%s12593_s0 + $0x140] sm:$0xff]   ;;  %v746_v48 = vld [vmem:[%s10639_s1 + $0x498] sm:$0xff]  ;;  %v748_v52 = vld [vmem:[%s10639_s1 + $0x4a8] sm:$0xff] }
  0x36   : > { %v739_v47 = vld [vmem:[%s10639_s1 + $0x460] sm:$0xff]  ;;  %v754_v49 = vld [vmem:[%s10639_s1 + $0x4d8] sm:$0xff]  ;;  %v756_v55 = vld [vmem:[%s10639_s1 + $0x4e8] sm:$0xff] }
  0x37   : > { %1424 = vmatmul.mubr.bf16.gmra.mxu0 %v830_v56  ;;  %v9040_v56 = vld [vmem:[%s12593_s0 + $0x110] sm:$0xff]   ;;  %v893_v53 = vpack.c.bf16 %v746_v48, %v739_v47  ;;  %v755_v61 = vld [vmem:[%s10639_s1 + $0x4e0] sm:$0xff]  ;;  %v762_v62 = vld [vmem:[%s10639_s1 + $0x518] sm:$0xff] }
  0x38   : > { %1431 = vmatprep.mubr.bf16.mxu0 %v838_v60  ;;  %8387 = vmatpush3.bf16.msra.mxu0 %v9034_v15  ;;  %v690_v60 = vld [vmem:[%s10639_s1 + $0x2d8] sm:$0xff]  ;;  %v699_v15 = vld [vmem:[%s10639_s1 + $0x320] sm:$0xff]  ;;  %v902_v5 = vpack.c.bf16 %v762_v62, %v755_v61  ;;  %v604_v47 = vld [vmem:[%s10639_s1 + $0x28] sm:$0xff] }
  0x39   : > { %1585 = vmatmul.mubr.bf16.gmra.mxu1 %v832_v63  ;;  %8388 = vmatprep.subr.bf16.mxu0 %v9035_v27  ;;  %v685_v63 = vld [vmem:[%s10639_s1 + $0x2b0] sm:$0xff]  ;;  %v865_v2 = vpack.c.bf16 %v690_v60, %v683_v59  ;;  %v760_v60 = vld [vmem:[%s10639_s1 + $0x508] sm:$0xff]  ;;  %v767_v6 = vld [vmem:[%s10639_s1 + $0x540] sm:$0xff] }
  0x3a   : > { %1592 = vmatprep.mubr.bf16.mxu1 %v840_v1  ;;  %v9041_v1 = vld [vmem:[%s12593_s0 + $0x148] sm:$0xff]   ;;  %v867_v7 = vpack.c.bf16 %v692_v0, %v685_v63  ;;  %v753_v59 = vld [vmem:[%s10639_s1 + $0x4d0] sm:$0xff]  ;;  %v775_v0 = vld [vmem:[%s10639_s1 + $0x580] sm:$0xff] }
  0x3b   : > { %v768_v63 = vld [vmem:[%s10639_s1 + $0x548] sm:$0xff]  ;;  %v802_v31 = vld [vmem:[%s10639_s1 + $0x658] sm:$0xff]  ;;  %v611_v48 = vld [vmem:[%s10639_s1 + $0x60] sm:$0xff] }
  0x3c   : > { %8389 = vmatpush3.bf16.msra.mxu0 %v9036_v28  ;;  %v713_v28 = vld [vmem:[%s10639_s1 + $0x390] sm:$0xff]  ;;  %v640_v62 = vld [vmem:[%s10639_s1 + $0x148] sm:$0xff] }
  0x3d   : > { %8390 = vmatprep.subr.bf16.mxu0 %v9037_v39  ;;  %v886_v39 = vpack.c.bf16 %v732_v36, %v725_v35  ;;  %v797_v35 = vld [vmem:[%s10639_s1 + $0x630] sm:$0xff]  ;;  %v804_v36 = vld [vmem:[%s10639_s1 + $0x668] sm:$0xff] }
  0x3e   : > { %v633_v61 = vld [vmem:[%s10639_s1 + $0x110] sm:$0xff] }
  0x3f   : > { %1432 = vmatmul.mubr.bf16.gmra.mxu0 %v837_v8  ;;  %v697_v8 = vld [vmem:[%s10639_s1 + $0x310] sm:$0xff] }
  0x40   : > { %1439 = vmatprep.mubr.bf16.mxu0 %v845_v12  ;;  %8391 = vmatpush3.bf16.msra.mxu0 %v9038_v42  ;;  %v719_v12 = vld [vmem:[%s10639_s1 + $0x3c0] sm:$0xff] }
  0x41   : > { %1593 = vmatmul.mubr.bf16.gmra.mxu1 %v839_v14  ;;  %8392 = vmatprep.subr.bf16.mxu0 %v9039_v50  ;;  %v872_v14 = vpack.c.bf16 %v704_v10, %v697_v8  ;;  %v880_v18 = vpack.c.bf16 %v719_v12, %v712_v11  ;;  %v761_v50 = vld [vmem:[%s10639_s1 + $0x510] sm:$0xff]  ;;  %v776_v12 = vld [vmem:[%s10639_s1 + $0x588] sm:$0xff] }
  0x42   : > { %1600 = vmatprep.mubr.bf16.mxu1 %v847_v16  ;;  %v706_v16 = vld [vmem:[%s10639_s1 + $0x358] sm:$0xff]  ;;  %v789_v10 = vld [vmem:[%s10639_s1 + $0x5f0] sm:$0xff] }
  0x43   : > { %v874_v21 = vpack.c.bf16 %v706_v16, %v699_v15  ;;  %v769_v11 = vld [vmem:[%s10639_s1 + $0x550] sm:$0xff]  ;;  %v784_v15 = vld [vmem:[%s10639_s1 + $0x5c8] sm:$0xff]  ;;  %v791_v16 = vld [vmem:[%s10639_s1 + $0x600] sm:$0xff] }
  0x44   : > { %8393 = vmatpush3.bf16.msra.mxu0 %v9040_v56  ;;  %v763_v56 = vld [vmem:[%s10639_s1 + $0x520] sm:$0xff] }
  0x45   : > { %8394 = vmatprep.subr.bf16.mxu0 %v9041_v1  ;;  %v900_v1 = vpack.c.bf16 %v760_v60, %v753_v59  ;;  %v619_v59 = vld [vmem:[%s10639_s1 + $0xa0] sm:$0xff]  ;;  %v626_v60 = vld [vmem:[%s10639_s1 + $0xd8] sm:$0xff] }
  0x47   : > { %1440 = vmatmul.mubr.bf16.gmra.mxu0 %v844_v22  ;;  %v882_v22 = vpack.c.bf16 %v721_v20, %v714_v19  ;;  %v781_v19 = vld [vmem:[%s10639_s1 + $0x5b0] sm:$0xff]  ;;  %v788_v20 = vld [vmem:[%s10639_s1 + $0x5e8] sm:$0xff] }
  0x48   : > { %1447 = vmatprep.mubr.bf16.mxu0 %v852_v24  ;;  %8395 = vmatpush3.bf16.msra.mxu0 %v9042_v3  ;;  %v718_v24 = vld [vmem:[%s10639_s1 + $0x3b8] sm:$0xff] }
  0x49   : > { %1601 = vmatmul.mubr.bf16.gmra.mxu1 %v846_v29  ;;  %8396 = vmatprep.subr.bf16.mxu0 %v9043_v13  ;;  %v879_v27 = vpack.c.bf16 %v718_v24, %v711_v23  ;;  %v720_v29 = vld [vmem:[%s10639_s1 + $0x3c8] sm:$0xff]  ;;  %v770_v3 = vld [vmem:[%s10639_s1 + $0x558] sm:$0xff]  ;;  %v803_v24 = vld [vmem:[%s10639_s1 + $0x660] sm:$0xff] }
  0x4a   : > { %1608 = vmatprep.mubr.bf16.mxu1 %v854_v30  ;;  %v887_v30 = vpack.c.bf16 %v733_v26, %v726_v25  ;;  %v881_v33 = vpack.c.bf16 %v720_v29, %v713_v28  ;;  %v796_v23 = vld [vmem:[%s10639_s1 + $0x628] sm:$0xff]  ;;  %v914_v25 = vpack.c.bf16 %v788_v20, %v781_v19  ;;  %v805_v28 = vld [vmem:[%s10639_s1 + $0x670] sm:$0xff]  ;;  %v675_v20 = vld [vmem:[%s10639_s1 + $0x260] sm:$0xff] }
  0x4b   : > { %v922_v26 = vpack.c.bf16 %v803_v24, %v796_v23  ;;  %v689_v23 = vld [vmem:[%s10639_s1 + $0x2d0] sm:$0xff]  ;;  %v696_v24 = vld [vmem:[%s10639_s1 + $0x308] sm:$0xff] }
  0x4c   : > { %8397 = vmatpush3.bf16.msra.mxu0 %v9044_v17  ;;  %v909_v17 = vpack.c.bf16 %v776_v12, %v769_v11  ;;  %v661_v11 = vld [vmem:[%s10639_s1 + $0x1f0] sm:$0xff]  ;;  %v668_v12 = vld [vmem:[%s10639_s1 + $0x228] sm:$0xff] }
  0x4f   : > { %1448 = vmatmul.mubr.bf16.gmra.mxu0 %v851_v37  ;;  %v740_v37 = vld [vmem:[%s10639_s1 + $0x468] sm:$0xff] }
  0x50   : > { %1455 = vmatprep.mubr.bf16.mxu0 %v859_v40  ;;  %v727_v40 = vld [vmem:[%s10639_s1 + $0x400] sm:$0xff]  ;;  %v894_v42 = vpack.c.bf16 %v747_v38, %v740_v37 }
  0x51   : > { %1609 = vmatmul.mubr.bf16.gmra.mxu1 %v853_v43  ;;  %v742_v43 = vld [vmem:[%s10639_s1 + $0x478] sm:$0xff]  ;;  %v888_v45 = vpack.c.bf16 %v734_v41, %v727_v40  ;;  %v819_v40 = vld [vmem:[%s10639_s1 + $0x6e0] sm:$0xff]  ;;  %v923_v41 = vpack.c.bf16 %v804_v36, %v797_v35  ;;  %v717_v35 = vld [vmem:[%s10639_s1 + $0x3b0] sm:$0xff] }
  0x52   : > { %1616 = vmatprep.mubr.bf16.mxu1 %v861_v44  ;;  %v749_v44 = vld [vmem:[%s10639_s1 + $0x4b0] sm:$0xff]  ;;  %v724_v36 = vld [vmem:[%s10639_s1 + $0x3e8] sm:$0xff] }
  0x53   : > { %v896_v46 = vpack.c.bf16 %v749_v44, %v742_v43  ;;  %v809_v43 = vld [vmem:[%s10639_s1 + $0x690] sm:$0xff]  ;;  %v816_v44 = vld [vmem:[%s10639_s1 + $0x6c8] sm:$0xff] }
  0x57   : > { %1456 = vmatmul.mubr.bf16.gmra.mxu0 %v858_v51  ;;  %v741_v51 = vld [vmem:[%s10639_s1 + $0x470] sm:$0xff] }
  0x58   : > { %1463 = vmatprep.mubr.bf16.mxu0 %v866_v54  ;;  %v901_v54 = vpack.c.bf16 %v761_v50, %v754_v49  ;;  %v928_v49 = vpack.c.bf16 %v816_v44, %v809_v43  ;;  %v828_v50 = vpack.c.bf16 %v611_v48, %v604_v47  ;;  %v731_v44 = vld [vmem:[%s10639_s1 + $0x420] sm:$0xff]  ;;  %v745_v47 = vld [vmem:[%s10639_s1 + $0x490] sm:$0xff]  ;;  %v752_v48 = vld [vmem:[%s10639_s1 + $0x4c8] sm:$0xff] }
  0x59   : > { %1617 = vmatmul.mubr.bf16.gmra.mxu1 %v860_v57  ;;  %v895_v57 = vpack.c.bf16 %v748_v52, %v741_v51  ;;  %v605_v51 = vld [vmem:[%s10639_s1 + $0x30] sm:$0xff]  ;;  %v612_v52 = vld [vmem:[%s10639_s1 + $0x68] sm:$0xff] }
  0x5a   : > { %1624 = vmatprep.mubr.bf16.mxu1 %v868_v58  ;;  %v903_v58 = vpack.c.bf16 %v763_v56, %v756_v55  ;;  %v610_v55 = vld [vmem:[%s10639_s1 + $0x58] sm:$0xff]  ;;  %v829_v56 = vpack.c.bf16 %v612_v52, %v605_v51  ;;  %v673_v51 = vld [vmem:[%s10639_s1 + $0x250] sm:$0xff]  ;;  %v680_v52 = vld [vmem:[%s10639_s1 + $0x288] sm:$0xff] }
  0x5f   : > { %1464 = vmatmul.mubr.bf16.gmra.mxu0 %v865_v2  ;;  %v908_v2 = vpack.c.bf16 %v775_v0, %v768_v63 }
  0x60   : > { %1471 = vmatprep.mubr.bf16.mxu0 %v873_v4  ;;  %v777_v4 = vld [vmem:[%s10639_s1 + $0x590] sm:$0xff] }
  0x61   : > { %1625 = vmatmul.mubr.bf16.gmra.mxu1 %v867_v7  ;;  %v774_v7 = vld [vmem:[%s10639_s1 + $0x578] sm:$0xff]  ;;  %v910_v8 = vpack.c.bf16 %v777_v4, %v770_v3  ;;  %v617_v3 = vld [vmem:[%s10639_s1 + $0x90] sm:$0xff]  ;;  %v624_v4 = vld [vmem:[%s10639_s1 + $0xc8] sm:$0xff] }
  0x62   : > { %1632 = vmatprep.mubr.bf16.mxu1 %v875_v9  ;;  %v782_v9 = vld [vmem:[%s10639_s1 + $0x5b8] sm:$0xff]  ;;  %v907_v13 = vpack.c.bf16 %v774_v7, %v767_v6  ;;  %v639_v6 = vld [vmem:[%s10639_s1 + $0x140] sm:$0xff]  ;;  %v834_v7 = vpack.c.bf16 %v624_v4, %v617_v3  ;;  %v709_v3 = vld [vmem:[%s10639_s1 + $0x370] sm:$0xff] }
  0x67   : > { %1472 = vmatmul.mubr.bf16.gmra.mxu0 %v872_v14  ;;  %v915_v14 = vpack.c.bf16 %v789_v10, %v782_v9  ;;  %v654_v9 = vld [vmem:[%s10639_s1 + $0x1b8] sm:$0xff] }
  0x68   : > { %1479 = vmatprep.mubr.bf16.mxu0 %v880_v18  ;;  %v917_v18 = vpack.c.bf16 %v791_v16, %v784_v15  ;;  %v631_v15 = vld [vmem:[%s10639_s1 + $0x100] sm:$0xff]  ;;  %v638_v16 = vld [vmem:[%s10639_s1 + $0x138] sm:$0xff] }
  0x69   : > { %1633 = vmatmul.mubr.bf16.gmra.mxu1 %v874_v21  ;;  %v783_v21 = vld [vmem:[%s10639_s1 + $0x5c0] sm:$0xff]  ;;  %v841_v19 = vpack.c.bf16 %v638_v16, %v631_v15  ;;  %v716_v15 = vld [vmem:[%s10639_s1 + $0x3a8] sm:$0xff] }
  0x6a   : > { %1640 = vmatprep.mubr.bf16.mxu1 %v882_v22  ;;  %v790_v22 = vld [vmem:[%s10639_s1 + $0x5f8] sm:$0xff]  ;;  %v723_v16 = vld [vmem:[%s10639_s1 + $0x3e0] sm:$0xff] }
  0x6b   : > { %v916_v29 = vpack.c.bf16 %v790_v22, %v783_v21  ;;  %v682_v21 = vld [vmem:[%s10639_s1 + $0x298] sm:$0xff] }
  0x6f   : > { %1480 = vmatmul.mubr.bf16.gmra.mxu0 %v879_v27  ;;  %v798_v27 = vld [vmem:[%s10639_s1 + $0x638] sm:$0xff] }
  0x70   : > { %1487 = vmatprep.mubr.bf16.mxu0 %v887_v30  ;;  %v795_v30 = vld [vmem:[%s10639_s1 + $0x620] sm:$0xff]  ;;  %v924_v32 = vpack.c.bf16 %v805_v28, %v798_v27  ;;  %v645_v27 = vld [vmem:[%s10639_s1 + $0x170] sm:$0xff]  ;;  %v652_v28 = vld [vmem:[%s10639_s1 + $0x1a8] sm:$0xff] }
  0x71   : > { %1641 = vmatmul.mubr.bf16.gmra.mxu1 %v881_v33  ;;  %v810_v33 = vld [vmem:[%s10639_s1 + $0x698] sm:$0xff]  ;;  %v921_v37 = vpack.c.bf16 %v802_v31, %v795_v30  ;;  %v667_v30 = vld [vmem:[%s10639_s1 + $0x220] sm:$0xff]  ;;  %v848_v31 = vpack.c.bf16 %v652_v28, %v645_v27 }
  0x72   : > { %1648 = vmatprep.mubr.bf16.mxu1 %v889_v34  ;;  %v817_v34 = vld [vmem:[%s10639_s1 + $0x6d0] sm:$0xff] }
  0x73   : > { %v929_v38 = vpack.c.bf16 %v817_v34, %v810_v33  ;;  %v710_v33 = vld [vmem:[%s10639_s1 + $0x378] sm:$0xff] }
  0x77   : > { %1488 = vmatmul.mubr.bf16.gmra.mxu0 %v886_v39  ;;  %v812_v39 = vld [vmem:[%s10639_s1 + $0x6a8] sm:$0xff] }
  0x78   : > { %1495 = vmatprep.mubr.bf16.mxu0 %v894_v42  ;;  %v931_v42 = vpack.c.bf16 %v819_v40, %v812_v39  ;;  %v659_v39 = vld [vmem:[%s10639_s1 + $0x1e0] sm:$0xff]  ;;  %v666_v40 = vld [vmem:[%s10639_s1 + $0x218] sm:$0xff] }
  0x79   : > { %1649 = vmatmul.mubr.bf16.gmra.mxu1 %v888_v45  ;;  %v811_v45 = vld [vmem:[%s10639_s1 + $0x6a0] sm:$0xff]  ;;  %v855_v43 = vpack.c.bf16 %v666_v40, %v659_v39 }
  0x7a   : > { %1656 = vmatprep.mubr.bf16.mxu1 %v896_v46  ;;  %v818_v46 = vld [vmem:[%s10639_s1 + $0x6d8] sm:$0xff] }
  0x7f   : > { %1496 = vmatmul.mubr.bf16.gmra.mxu0 %v893_v53  ;;  %v930_v53 = vpack.c.bf16 %v818_v46, %v811_v45  ;;  %v738_v45 = vld [vmem:[%s10639_s1 + $0x458] sm:$0xff] }
  0x80   : > { %1503 = vmatprep.mubr.bf16.mxu0 %v901_v54  ;;  %v603_v54 = vld [vmem:[%s10639_s1 + $0x20] sm:$0xff] }
  0x81   : > { %1657 = vmatmul.mubr.bf16.gmra.mxu1 %v895_v57  ;;  %v618_v57 = vld [vmem:[%s10639_s1 + $0x98] sm:$0xff]  ;;  %v827_v63 = vpack.c.bf16 %v610_v55, %v603_v54  ;;  %v695_v54 = vld [vmem:[%s10639_s1 + $0x300] sm:$0xff]  ;;  %v862_v55 = vpack.c.bf16 %v680_v52, %v673_v51 }
  0x82   : > { %1664 = vmatprep.mubr.bf16.mxu1 %v903_v58  ;;  %v625_v58 = vld [vmem:[%s10639_s1 + $0xd0] sm:$0xff] }
  0x83   : > { %v835_v0 = vpack.c.bf16 %v625_v58, %v618_v57  ;;  %v766_v57 = vld [vmem:[%s10639_s1 + $0x538] sm:$0xff] }
  0x87   : > { %1504 = vmatmul.mubr.bf16.gmra.mxu0 %v900_v1  ;;  %v836_v1 = vpack.c.bf16 %v626_v60, %v619_v59  ;;  %v773_v59 = vld [vmem:[%s10639_s1 + $0x570] sm:$0xff]  ;;  %v780_v60 = vld [vmem:[%s10639_s1 + $0x5a8] sm:$0xff] }
  0x88   : > { %1511 = vmatprep.mubr.bf16.mxu0 %v908_v2  ;;  %v843_v2 = vpack.c.bf16 %v640_v62, %v633_v61  ;;  %v913_v62 = vpack.c.bf16 %v780_v60, %v773_v59 }
  0x89   : > { %1665 = vmatmul.mubr.bf16.gmra.mxu1 %v902_v5  ;;  %v632_v5 = vld [vmem:[%s10639_s1 + $0x108] sm:$0xff] }
  0x8a   : > { %1672 = vmatprep.mubr.bf16.mxu1 %v910_v8  ;;  %v647_v8 = vld [vmem:[%s10639_s1 + $0x180] sm:$0xff]  ;;  %v842_v10 = vpack.c.bf16 %v639_v6, %v632_v5  ;;  %v794_v6 = vld [vmem:[%s10639_s1 + $0x618] sm:$0xff] }
  0x8b   : > { %v787_v5 = vld [vmem:[%s10639_s1 + $0x5e0] sm:$0xff] }
  0x8f   : > { %1512 = vmatmul.mubr.bf16.gmra.mxu0 %v907_v13  ;;  %v850_v13 = vpack.c.bf16 %v654_v9, %v647_v8  ;;  %v801_v8 = vld [vmem:[%s10639_s1 + $0x650] sm:$0xff]  ;;  %v808_v9 = vld [vmem:[%s10639_s1 + $0x688] sm:$0xff] }
  0x90   : > { %1519 = vmatprep.mubr.bf16.mxu0 %v915_v14  ;;  %v857_v14 = vpack.c.bf16 %v668_v12, %v661_v11  ;;  %v927_v11 = vpack.c.bf16 %v808_v9, %v801_v8  ;;  %v9046_v12 = vld [vmem:[%s12573_s3 + $0x30] sm:$0xff]  }
  0x91   : > { %1673 = vmatmul.mubr.bf16.gmra.mxu1 %v909_v17  ;;  %v646_v17 = vld [vmem:[%s10639_s1 + $0x178] sm:$0xff] }
  0x92   : > { %1680 = vmatprep.mubr.bf16.mxu1 %v917_v18  ;;  %v653_v18 = vld [vmem:[%s10639_s1 + $0x1b0] sm:$0xff] }
  0x93   : > { %v849_v22 = vpack.c.bf16 %v653_v18, %v646_v17  ;;  %v815_v18 = vld [vmem:[%s10639_s1 + $0x6c0] sm:$0xff] }
  0x97   : > { %1520 = vmatmul.mubr.bf16.gmra.mxu0 %v914_v25  ;;  %v864_v25 = vpack.c.bf16 %v682_v21, %v675_v20  ;;  %v884_v20 = vpack.c.bf16 %v723_v16, %v716_v15  ;;  %v772_v16 = vld [vmem:[%s10639_s1 + $0x568] sm:$0xff] }
  0x98   : > { %1527 = vmatprep.mubr.bf16.mxu0 %v922_v26  ;;  %v871_v26 = vpack.c.bf16 %v696_v24, %v689_v23  ;;  %v715_v23 = vld [vmem:[%s10639_s1 + $0x3a0] sm:$0xff]  ;;  %v722_v24 = vld [vmem:[%s10639_s1 + $0x3d8] sm:$0xff] }
  0x99   : > { %1681 = vmatmul.mubr.bf16.gmra.mxu1 %v916_v29  ;;  %v660_v29 = vld [vmem:[%s10639_s1 + $0x1e8] sm:$0xff]  ;;  %v883_v27 = vpack.c.bf16 %v722_v24, %v715_v23 }
  0x9a   : > { %1688 = vmatprep.mubr.bf16.mxu1 %v924_v32  ;;  %v703_v32 = vld [vmem:[%s10639_s1 + $0x340] sm:$0xff]  ;;  %v856_v34 = vpack.c.bf16 %v667_v30, %v660_v29 }
  0x9b   : > { %v9048_v30 = vld [vmem:[%s12573_s3 + $0x20] sm:$0xff]  }
  0x9f   : > { %1528 = vmatmul.mubr.bf16.gmra.mxu0 %v921_v37  ;;  %v878_v37 = vpack.c.bf16 %v710_v33, %v703_v32  ;;  %v736_v32 = vld [vmem:[%s10639_s1 + $0x448] sm:$0xff]  ;;  %v10932_v33 = vld [vmem:[%s12595_s25] ss:$0 sm:$0xff] }
  0xa0   : > { %1535 = vmatprep.mubr.bf16.mxu0 %v929_v38  ;;  %v885_v38 = vpack.c.bf16 %v724_v36, %v717_v35  ;;  %v744_v35 = vld [vmem:[%s10639_s1 + $0x488] sm:$0xff]  ;;  %v751_v36 = vld [vmem:[%s10639_s1 + $0x4c0] sm:$0xff] }
  0xa1   : > { %1689 = vmatmul.mubr.bf16.gmra.mxu1 %v923_v41  ;;  %v674_v41 = vld [vmem:[%s10639_s1 + $0x258] sm:$0xff] }
  0xa2   : > { %1696 = vmatprep.mubr.bf16.mxu1 %v931_v42  ;;  %v681_v42 = vld [vmem:[%s10639_s1 + $0x290] sm:$0xff] }
  0xa3   : > { %v863_v46 = vpack.c.bf16 %v681_v42, %v674_v41  ;;  %v9049_v41 = vld [vmem:[%s12573_s3 + $0x18] sm:$0xff]  }
  0xa7   : > { %1536 = vmatmul.mubr.bf16.gmra.mxu0 %v928_v49  ;;  %v892_v49 = vpack.c.bf16 %v738_v45, %v731_v44  ;;  %v898_v44 = vpack.c.bf16 %v751_v36, %v744_v35  ;;  %v771_v36 = vld [vmem:[%s10639_s1 + $0x560] sm:$0xff] }
  0xa8   : > { %1737 = vmatprep.mubr.bf16.mxu0 %v828_v50  ;;  %v899_v50 = vpack.c.bf16 %v752_v48, %v745_v47 }
  0xa9   : > { %1697 = vmatmul.mubr.bf16.gmra.mxu1 %v930_v53  ;;  %v688_v53 = vld [vmem:[%s10639_s1 + $0x2c8] sm:$0xff] }
  0xaa   : > { %8659 = vmatprep.mubr.msk.bf16.mxu1 %vm1334_vm0, %v829_v56  ;;  %v759_v56 = vld [vmem:[%s10639_s1 + $0x500] sm:$0xff]  ;;  %v870_v58 = vpack.c.bf16 %v695_v54, %v688_v53  ;;  %v750_v54 = vld [vmem:[%s10639_s1 + $0x4b8] sm:$0xff] }
  0xab   : > { %v906_v61 = vpack.c.bf16 %v766_v57, %v759_v56  ;;  %v743_v53 = vld [vmem:[%s10639_s1 + $0x480] sm:$0xff]  ;;  %v758_v57 = vld [vmem:[%s10639_s1 + $0x4f8] sm:$0xff] }
  0xaf   : > { %1738 = vmatmul.mubr.bf16.vlgmr.msra.gmra.mxu0 %v827_v63  ;;  %v9045_v63 = vld [vmem:[%s12573_s3 + $0x38] sm:$0xff]  }
  0xb0   : > { %1745 = vmatprep.mubr.bf16.mxu0 %v835_v0  ;;  %v687_v0 = vld [vmem:[%s10639_s1 + $0x2c0] sm:$0xff]  ;;  %8691 = vmatprep.subr.bf16.mxu1 %v9045_v63 }
  0xb1   : > { %8660 = vmatmul.mubr.msk.bf16.vlgmr.msra.gmra.mxu1 %vm1334_vm0, %v836_v1  ;;  %v694_v1 = vld [vmem:[%s10639_s1 + $0x2f8] sm:$0xff] }
  0xb2   : > { %8663 = vmatprep.mubr.msk.bf16.mxu1 %vm1334_vm0, %v843_v2  ;;  %v702_v2 = vld [vmem:[%s10639_s1 + $0x338] sm:$0xff]  ;;  %v869_v4 = vpack.c.bf16 %v694_v1, %v687_v0  ;;  %8692 = vmatpush3.bf16.msra.mxu1 %v9045_v63  ;;  %v897_v63 = vpack.c.bf16 %v750_v54, %v743_v53 }
  0xb3   : > { %8693 = vmatprep.subr.bf16.mxu1 %v9046_v12 }
  0xb6   : > { %8694 = vmatpush3.bf16.msra.mxu1 %v9046_v12  ;;  %v764_v12 = vld [vmem:[%s10639_s1 + $0x528] sm:$0xff] }
  0xb7   : > { %1746 = vmatmul.mubr.bf16.gmra.mxu0 %v834_v7  ;;  %v877_v7 = vpack.c.bf16 %v709_v3, %v702_v2 }
  0xb8   : > { %1753 = vmatprep.mubr.bf16.mxu0 %v842_v10  ;;  %v920_v10 = vpack.c.bf16 %v794_v6, %v787_v5 }
  0xb9   : > { %8664 = vmatmul.mubr.msk.bf16.gmra.mxu1 %vm1334_vm0, %v850_v13  ;;  %v701_v13 = vld [vmem:[%s10639_s1 + $0x330] sm:$0xff] }
  0xba   : > { %8667 = vmatprep.mubr.msk.bf16.mxu1 %vm1334_vm0, %v857_v14  ;;  %v708_v14 = vld [vmem:[%s10639_s1 + $0x368] sm:$0xff] }
  0xbb   : > { %v876_v17 = vpack.c.bf16 %v708_v14, %v701_v13  ;;  %v9050_v13 = vld [vmem:[%s12573_s3 + $0x10] sm:$0xff]  }
  0xbf   : > { %1754 = vmatmul.mubr.bf16.gmra.mxu0 %v841_v19  ;;  %v822_v19 = vld [vmem:[%s10639_s1 + $0x6f8] sm:$0xff] }
  0xc0   : > { %1761 = vmatprep.mubr.bf16.mxu0 %v849_v22  ;;  %v934_v21 = vpack.c.bf16 %v822_v19, %v815_v18  ;;  %v9047_v22 = vld [vmem:[%s12573_s3 + $0x28] sm:$0xff]  }
  0xc1   : > { %8668 = vmatmul.mubr.msk.bf16.gmra.mxu1 %vm1334_vm0, %v864_v25  ;;  %v730_v25 = vld [vmem:[%s10639_s1 + $0x418] sm:$0xff]  ;;  %8695 = vmatprep.subr.bf16.mxu1 %v9047_v22 }
  0xc2   : > { %8671 = vmatprep.mubr.msk.bf16.mxu1 %vm1334_vm0, %v871_v26  ;;  %v737_v26 = vld [vmem:[%s10639_s1 + $0x450] sm:$0xff]  ;;  %8696 = vmatpush3.bf16.msra.mxu1 %v9047_v22 }
  0xc3   : > { %v891_v28 = vpack.c.bf16 %v737_v26, %v730_v25  ;;  %8697 = vmatprep.subr.bf16.mxu1 %v9048_v30  ;;  %v9051_v26 = vld [vmem:[%s12573_s3 + $0x8] sm:$0xff]  }
  0xc6   : > { %8698 = vmatpush3.bf16.msra.mxu1 %v9048_v30 }
  0xc7   : > { %1762 = vmatmul.mubr.bf16.gmra.mxu0 %v848_v31  ;;  %v729_v31 = vld [vmem:[%s10639_s1 + $0x410] sm:$0xff]  ;;  %8699 = vmatprep.subr.bf16.mxu1 %v9049_v41 }
  0xc8   : > { %1769 = vmatprep.mubr.bf16.mxu0 %v856_v34  ;;  %v890_v40 = vpack.c.bf16 %v736_v32, %v729_v31 }
  0xc9   : > { %8672 = vmatmul.mubr.msk.bf16.gmra.mxu1 %vm1334_vm0, %v878_v37 }
  0xca   : > { %8675 = vmatprep.mubr.msk.bf16.mxu1 %vm1334_vm0, %v885_v38  ;;  %8700 = vmatpush3.bf16.msra.mxu1 %v9049_v41  ;;  %v793_v41 = vld [vmem:[%s10639_s1 + $0x610] sm:$0xff] }
  0xcb   : > { %8701 = vmatprep.subr.bf16.mxu1 %v9050_v13 }
  0xce   : > { %8702 = vmatpush3.bf16.msra.mxu1 %v9050_v13 }
  0xcf   : > { %1770 = vmatmul.mubr.bf16.gmra.mxu0 %v855_v43  ;;  %8703 = vmatprep.subr.bf16.mxu1 %v9051_v26 }
  0xd0   : > { %1777 = vmatprep.mubr.bf16.mxu0 %v863_v46 }
  0xd1   : > { %8676 = vmatmul.mubr.msk.bf16.gmra.mxu1 %vm1334_vm0, %v892_v49 }
  0xd2   : > { %8679 = vmatprep.mubr.msk.bf16.mxu1 %vm1334_vm0, %v899_v50  ;;  %8704 = vmatpush3.bf16.msra.mxu1 %v9051_v26  ;;  %v821_v26 = vld [vmem:[%s10639_s1 + $0x6f0] sm:$0xff] }
  0xd7   : > { %1778 = vmatmul.mubr.bf16.gmra.mxu0 %v862_v55 }
  0xd8   : > { %1785 = vmatprep.mubr.bf16.mxu0 %v870_v58  ;;  %v765_v58 = vld [vmem:[%s10639_s1 + $0x530] sm:$0xff] }
  0xd9   : > { %8680 = vmatmul.mubr.msk.bf16.gmra.mxu1 %vm1334_vm0, %v906_v61  ;;  %v905_v2 = vpack.c.bf16 %v765_v58, %v758_v57  ;;  %v9052_v57 = vld [vmem:[%s12573_s3] sm:$0xff]  }
  0xda   : > { %8683 = vmatprep.mubr.msk.bf16.mxu1 %vm1334_vm0, %v913_v62  ;;  %8705 = vmatprep.subr.bf16.mxu1 %v9052_v57 }
  0xdb   : > { %8706 = vmatpush3.bf16.msra.mxu1 %v9052_v57 }
  0xdf   : > { %1786 = vmatmul.mubr.bf16.gmra.mxu0 %v869_v4 }
  0xe0   : > { %1793 = vmatprep.mubr.bf16.mxu0 %v877_v7 }
  0xe1   : > { %8684 = vmatmul.mubr.msk.bf16.gmra.mxu1 %vm1334_vm0, %v920_v10 }
  0xe2   : > { %8687 = vmatprep.mubr.msk.bf16.mxu1 %vm1334_vm0, %v927_v11  ;;  %v757_v11 = vld [vmem:[%s10639_s1 + $0x4f0] sm:$0xff] }
  0xe3   : > { %v904_v22 = vpack.c.bf16 %v764_v12, %v757_v11 }
  0xe7   : > { %1794 = vmatmul.mubr.bf16.gmra.mxu0 %v876_v17  ;;  %v779_v17 = vld [vmem:[%s10639_s1 + $0x5a0] sm:$0xff] }
  0xe8   : > { %1801 = vmatprep.mubr.bf16.mxu0 %v884_v20  ;;  %v912_v25 = vpack.c.bf16 %v779_v17, %v772_v16 }
  0xe9   : > { %8688 = vmatmul.mubr.msk.bf16.gmra.mxu1 %vm1334_vm0, %v934_v21 }
  0xef   : > { %v8174_v29 = vpop.f32.mrf.mxu0  ;;  %1802 = vmatmul.mubr.bf16.gmra.mxu0 %v883_v27 }
  0xf0   : > { %1809 = vmatprep.mubr.bf16.mxu0 %v891_v28 }
  0xf1   : > { %v8175_v34 = vpop.f32.mrf.mxu0  ;;  %v8286_v38 = vpop.f32.mrf.mxu1 }
  0xf2   : > { %v8176_v37 = vadd.f32 %v8175_v34, %v8174_v29 }
  0xf3   : > { %v8177_v39 = vpop.f32.mrf.mxu0  ;;  %v8287_v43 = vpop.f32.mrf.mxu1 }
  0xf4   : > { %v1418_v42 = vadd.f32 %v8176_v37, %v10932_v33  ;;  %v8288_v45 = vadd.f32 %v8287_v43, %v8286_v38  ;;  %v778_v37 = vld [vmem:[%s10639_s1 + $0x598] sm:$0xff] }
  0xf5   : > { %v8178_v46 = vpop.f32.mrf.mxu0  ;;  %v8289_v48 = vpop.f32.mrf.mxu1 }
  0xf6   : > { %v8179_v47 = vadd.f32 %v8178_v46, %v8177_v39  ;;  %v10940_v49 = vadd.f32 %v8288_v45, %v1418_v42  ;;  %v911_v46 = vpack.c.bf16 %v778_v37, %v771_v36 }
  0xf7   : > { %v8180_v50 = vpop.f32.mrf.mxu0  ;;  %1810 = vmatmul.mubr.bf16.gmra.mxu0 %v890_v40  ;;  %v8290_v52 = vpop.f32.mrf.mxu1  ;;  %v786_v40 = vld [vmem:[%s10639_s1 + $0x5d8] sm:$0xff] }
  0xf8   : > { %v1421_v51 = vadd.f32 %v8179_v47, %v10932_v33  ;;  %1817 = vmatprep.mubr.bf16.mxu0 %v898_v44  ;;  %v8291_v55 = vadd.f32 %v8290_v52, %v8289_v48 }
  0xf9   : > { %v8181_v56 = vpop.f32.mrf.mxu0  ;;  %v8292_v60 = vpop.f32.mrf.mxu1 }
  0xfa   : > { %v8182_v59 = vadd.f32 %v8181_v56, %v8180_v50  ;;  %v10947_v61 = vadd.f32 %v8291_v55, %v1421_v51  ;;  %v919_v50 = vpack.c.bf16 %v793_v41, %v786_v40 }
  0xfb   : > { %v8183_v62 = vpop.f32.mrf.mxu0  ;;  %v8293_v1 = vpop.f32.mrf.mxu1 }
  0xfc   : > { %v1426_v0 = vadd.f32 %v8182_v59, %v10932_v33  ;;  %v8294_v3 = vadd.f32 %v8293_v1, %v8292_v60  ;;  %v785_v60 = vld [vmem:[%s10639_s1 + $0x5d0] sm:$0xff]  ;;  %v800_v1 = vld [vmem:[%s10639_s1 + $0x648] sm:$0xff] }
  0xfd   : > { %v8184_v4 = vpop.f32.mrf.mxu0  ;;  %v8295_v6 = vpop.f32.mrf.mxu1 }
  0xfe   : > { %v8185_v5 = vadd.f32 %v8184_v4, %v8183_v62  ;;  %v10950_v7 = vadd.f32 %v8294_v3, %v1426_v0  ;;  %v792_v62 = vld [vmem:[%s10639_s1 + $0x608] sm:$0xff] }
  0xff   : > { %v8186_v8 = vpop.f32.mrf.mxu0  ;;  %1818 = vmatmul.mubr.bf16.gmra.mxu0 %v897_v63  ;;  %v8296_v10 = vpop.f32.mrf.mxu1 }
 0x100   : > { %v1429_v9 = vadd.f32 %v8185_v5, %v10932_v33  ;;  %1825 = vmatprep.mubr.bf16.mxu0 %v905_v2  ;;  %v8297_v14 = vadd.f32 %v8296_v10, %v8295_v6  ;;  %v807_v2 = vld [vmem:[%s10639_s1 + $0x680] sm:$0xff] }
 0x101   : > { %v8187_v15 = vpop.f32.mrf.mxu0  ;;  %v8298_v19 = vpop.f32.mrf.mxu1  ;;  %v926_v11 = vpack.c.bf16 %v807_v2, %v800_v1 }
 0x102   : > { %v8188_v18 = vadd.f32 %v8187_v15, %v8186_v8  ;;  %v10960_v20 = vadd.f32 %v8297_v14, %v1429_v9  ;;  %v918_v8 = vpack.c.bf16 %v792_v62, %v785_v60 }
 0x103   : > { %v8189_v21 = vpop.f32.mrf.mxu0  ;;  %v8299_v24 = vpop.f32.mrf.mxu1 }
 0x104   : > { %v1434_v23 = vadd.f32 %v8188_v18, %v10932_v33  ;;  %v8300_v27 = vadd.f32 %v8299_v24, %v8298_v19 }
 0x105   : > { %v8190_v28 = vpop.f32.mrf.mxu0  ;;  %v8301_v30 = vpop.f32.mrf.mxu1 }
 0x106   : > { %v8191_v29 = vadd.f32 %v8190_v28, %v8189_v21  ;;  %v10966_v31 = vadd.f32 %v8300_v27, %v1434_v23  ;;  %v799_v21 = vld [vmem:[%s10639_s1 + $0x640] sm:$0xff] }
 0x107   : > { %v8192_v32 = vpop.f32.mrf.mxu0  ;;  %1826 = vmatmul.mubr.bf16.gmra.mxu0 %v904_v22  ;;  %v8302_v35 = vpop.f32.mrf.mxu1  ;;  %v806_v22 = vld [vmem:[%s10639_s1 + $0x678] sm:$0xff] }
 0x108   : > { %v1437_v34 = vadd.f32 %v8191_v29, %v10932_v33  ;;  %1833 = vmatprep.mubr.bf16.mxu0 %v912_v25  ;;  %v8303_v38 = vadd.f32 %v8302_v35, %v8301_v30  ;;  %v814_v25 = vld [vmem:[%s10639_s1 + $0x6b8] sm:$0xff] }
 0x109   : > { %v8193_v39 = vpop.f32.mrf.mxu0  ;;  %v8304_v43 = vpop.f32.mrf.mxu1  ;;  %v933_v36 = vpack.c.bf16 %v821_v26, %v814_v25 }
 0x10a   : > { %v8194_v42 = vadd.f32 %v8193_v39, %v8192_v32  ;;  %v10973_v44 = vadd.f32 %v8303_v38, %v1437_v34  ;;  %v925_v32 = vpack.c.bf16 %v806_v22, %v799_v21 }
 0x10b   : > { %v8195_v45 = vpop.f32.mrf.mxu0  ;;  %v8305_v48 = vpop.f32.mrf.mxu1 }
 0x10c   : > { %v1442_v47 = vadd.f32 %v8194_v42, %v10932_v33  ;;  %v8306_v51 = vadd.f32 %v8305_v48, %v8304_v43 }
 0x10d   : > { %v8196_v52 = vpop.f32.mrf.mxu0  ;;  %v8307_v54 = vpop.f32.mrf.mxu1 }
 0x10e   : > { %v8197_v53 = vadd.f32 %v8196_v52, %v8195_v45  ;;  %v10976_v55 = vadd.f32 %v8306_v51, %v1442_v47  ;;  %v820_v47 = vld [vmem:[%s10639_s1 + $0x6e8] sm:$0xff] }
 0x10f   : > { %v8198_v56 = vpop.f32.mrf.mxu0  ;;  %1834 = vmatmul.mubr.bf16.gmra.mxu0 %v911_v46  ;;  %v8308_v59 = vpop.f32.mrf.mxu1  ;;  %v813_v46 = vld [vmem:[%s10639_s1 + $0x6b0] sm:$0xff]  ;;  %s11827_s1 = scalar_lea.vmem %s12588_s18, %s8986_s2 }
 0x110   : > { %v1445_v58 = vadd.f32 %v8197_v53, %v10932_v33  ;;  %1841 = vmatprep.mubr.bf16.mxu0 %v919_v50  ;;  %v8309_v63 = vadd.f32 %v8308_v59, %v8307_v54 }
 0x111   : > { %v8199_v0 = vpop.f32.mrf.mxu0  ;;  %v8310_v4 = vpop.f32.mrf.mxu1 }
 0x112   : > { %v8200_v3 = vadd.f32 %v8199_v0, %v8198_v56  ;;  %v10986_v5 = vadd.f32 %v8309_v63, %v1445_v58  ;;  %v932_v56 = vpack.c.bf16 %v820_v47, %v813_v46 }
 0x113   : > { %v8201_v6 = vpop.f32.mrf.mxu0  ;;  %v8311_v10 = vpop.f32.mrf.mxu1 }
 0x114   : > { %v1450_v9 = vadd.f32 %v8200_v3, %v10932_v33  ;;  %v8312_v12 = vadd.f32 %v8311_v10, %v8310_v4 }
 0x115   : > { %v8202_v13 = vpop.f32.mrf.mxu0  ;;  %v8313_v15 = vpop.f32.mrf.mxu1 }
 0x116   : > { %v8203_v14 = vadd.f32 %v8202_v13, %v8201_v6  ;;  %v10989_v16 = vadd.f32 %v8312_v12, %v1450_v9 }
 0x117   : > { %v8204_v17 = vpop.f32.mrf.mxu0  ;;  %1842 = vmatmul.mubr.bf16.gmra.mxu0 %v918_v8  ;;  %v8314_v19 = vpop.f32.mrf.mxu1 }
 0x118   : > { %v1453_v18 = vadd.f32 %v8203_v14, %v10932_v33  ;;  %1849 = vmatprep.mubr.bf16.mxu0 %v926_v11  ;;  %v8315_v23 = vadd.f32 %v8314_v19, %v8313_v15 }
 0x119   : > { %v8205_v24 = vpop.f32.mrf.mxu0  ;;  %v8316_v28 = vpop.f32.mrf.mxu1 }
 0x11a   : > { %v8206_v27 = vadd.f32 %v8205_v24, %v8204_v17  ;;  %v10996_v29 = vadd.f32 %v8315_v23, %v1453_v18 }
 0x11b   : > { %v8207_v30 = vpop.f32.mrf.mxu0  ;;  %v8317_v35 = vpop.f32.mrf.mxu1 }
 0x11c   : > { %v1458_v34 = vadd.f32 %v8206_v27, %v10932_v33  ;;  %v8318_v37 = vadd.f32 %v8317_v35, %v8316_v28 }
 0x11d   : > { %v8208_v38 = vpop.f32.mrf.mxu0  ;;  %v8319_v40 = vpop.f32.mrf.mxu1 }
 0x11e   : > { %v8209_v39 = vadd.f32 %v8208_v38, %v8207_v30  ;;  %v10999_v41 = vadd.f32 %v8318_v37, %v1458_v34 }
 0x11f   : > { %v8210_v42 = vpop.f32.mrf.mxu0  ;;  %1850 = vmatmul.mubr.bf16.gmra.mxu0 %v925_v32  ;;  %v8320_v45 = vpop.f32.mrf.mxu1 }
 0x120   : > { %v1461_v43 = vadd.f32 %v8209_v39, %v10932_v33  ;;  %1857 = vmatprep.mubr.bf16.mxu0 %v933_v36  ;;  %v8321_v48 = vadd.f32 %v8320_v45, %v8319_v40 }
 0x121   : > { %v8211_v50 = vpop.f32.mrf.mxu0  ;;  %v8322_v52 = vpop.f32.mrf.mxu1 }
 0x122   : > { %v8212_v51 = vadd.f32 %v8211_v50, %v8210_v42  ;;  %v11004_v53 = vadd.f32 %v8321_v48, %v1461_v43 }
 0x123   : > { %v8213_v54 = vpop.f32.mrf.mxu0  ;;  %v8323_v58 = vpop.f32.mrf.mxu1 }
 0x124   : > { %v1466_v57 = vadd.f32 %v8212_v51, %v10932_v33  ;;  %v8324_v59 = vadd.f32 %v8323_v58, %v8322_v52 }
 0x125   : > { %v8214_v60 = vpop.f32.mrf.mxu0  ;;  %v8325_v63 = vpop.f32.mrf.mxu1 }
 0x126   : > { %v8215_v62 = vadd.f32 %v8214_v60, %v8213_v54  ;;  %v11007_v0 = vadd.f32 %v8324_v59, %v1466_v57 }
 0x127   : > { %v8216_v1 = vpop.f32.mrf.mxu0  ;;  %1858 = vmatmul.mubr.bf16.gmra.mxu0 %v932_v56  ;;  %v8326_v3 = vpop.f32.mrf.mxu1 }
 0x128   : > { %v1469_v2 = vadd.f32 %v8215_v62, %v10932_v33  ;;  %v8327_v4 = vadd.f32 %v8326_v3, %v8325_v63 }
 0x129   : > { %v8217_v6 = vpop.f32.mrf.mxu0  ;;  %v8328_v9 = vpop.f32.mrf.mxu1 }
 0x12a   : > { %v8218_v8 = vadd.f32 %v8217_v6, %v8216_v1  ;;  %v11010_v10 = vadd.f32 %v8327_v4, %v1469_v2 }
 0x12b   : > { %v8219_v11 = vpop.f32.mrf.mxu0  ;;  %v8329_v13 = vpop.f32.mrf.mxu1 }
 0x12c   : > { %v1474_v12 = vadd.f32 %v8218_v8, %v10932_v33  ;;  %v8330_v14 = vadd.f32 %v8329_v13, %v8328_v9 }
 0x12d   : > { %v8220_v15 = vpop.f32.mrf.mxu0  ;;  %v8331_v18 = vpop.f32.mrf.mxu1 }
 0x12e   : > { %v8221_v17 = vadd.f32 %v8220_v15, %v8219_v11  ;;  %v11013_v19 = vadd.f32 %v8330_v14, %v1474_v12 }
 0x12f   : > { %v8222_v21 = vpop.f32.mrf.mxu0  ;;  %v8332_v23 = vpop.f32.mrf.mxu1 }
 0x130   : > { %v1477_v22 = vadd.f32 %v8221_v17, %v10932_v33  ;;  %v8333_v24 = vadd.f32 %v8332_v23, %v8331_v18 }
 0x131   : > { %v8223_v25 = vpop.f32.mrf.mxu0  ;;  %v8334_v27 = vpop.f32.mrf.mxu1 }
 0x132   : > { %v8224_v26 = vadd.f32 %v8223_v25, %v8222_v21  ;;  %v11016_v28 = vadd.f32 %v8333_v24, %v1477_v22 }
 0x133   : > { %v8225_v30 = vpop.f32.mrf.mxu0  ;;  %v8335_v34 = vpop.f32.mrf.mxu1 }
 0x134   : > { %v1482_v32 = vadd.f32 %v8224_v26, %v10932_v33  ;;  %v8336_v35 = vadd.f32 %v8335_v34, %v8334_v27 }
 0x135   : > { %v8226_v36 = vpop.f32.mrf.mxu0  ;;  %v8337_v38 = vpop.f32.mrf.mxu1 }
 0x136   : > { %v8227_v37 = vadd.f32 %v8226_v36, %v8225_v30  ;;  %v11019_v39 = vadd.f32 %v8336_v35, %v1482_v32 }
 0x137   : > { %v8228_v40 = vpop.f32.mrf.mxu0  ;;  %v8338_v43 = vpop.f32.mrf.mxu1 }
 0x138   : > { %v1485_v42 = vadd.f32 %v8227_v37, %v10932_v33  ;;  %v8339_v45 = vadd.f32 %v8338_v43, %v8337_v38 }
 0x139   : > { %v8229_v46 = vpop.f32.mrf.mxu0  ;;  %v8340_v48 = vpop.f32.mrf.mxu1 }
 0x13a   : > { %v8230_v47 = vadd.f32 %v8229_v46, %v8228_v40  ;;  %v11022_v50 = vadd.f32 %v8339_v45, %v1485_v42 }
 0x13b   : > { %v8231_v51 = vpop.f32.mrf.mxu0  ;;  %v8341_v54 = vpop.f32.mrf.mxu1 }
 0x13c   : > { %v1490_v52 = vadd.f32 %v8230_v47, %v10932_v33  ;;  %v8342_v56 = vadd.f32 %v8341_v54, %v8340_v48 }
 0x13d   : > { %v8232_v57 = vpop.f32.mrf.mxu0  ;;  %v8343_v59 = vpop.f32.mrf.mxu1 }
 0x13e   : > { %v8233_v58 = vadd.f32 %v8232_v57, %v8231_v51  ;;  %v11025_v60 = vadd.f32 %v8342_v56, %v1490_v52 }
 0x13f   : > { %v8234_v62 = vpop.f32.mrf.mxu0  ;;  %v8344_v1 = vpop.f32.mrf.mxu1 }
 0x140   : > { %v1493_v63 = vadd.f32 %v8233_v58, %v10932_v33  ;;  %v8345_v2 = vadd.f32 %v8344_v1, %v8343_v59 }
 0x141   : > { %v8235_v3 = vpop.f32.mrf.mxu0  ;;  %v8346_v6 = vpop.f32.mrf.mxu1 }
 0x142   : > { %v8236_v4 = vadd.f32 %v8235_v3, %v8234_v62  ;;  %v11028_v8 = vadd.f32 %v8345_v2, %v1493_v63 }
 0x143   : > { %v8237_v9 = vpop.f32.mrf.mxu0  ;;  %v8347_v12 = vpop.f32.mrf.mxu1 }
 0x144   : > { %v1498_v11 = vadd.f32 %v8236_v4, %v10932_v33  ;;  %v8348_v13 = vadd.f32 %v8347_v12, %v8346_v6 }
 0x145   : > { %v8238_v14 = vpop.f32.mrf.mxu0  ;;  %v8349_v17 = vpop.f32.mrf.mxu1 }
 0x146   : > { %v8239_v15 = vadd.f32 %v8238_v14, %v8237_v9  ;;  %v11031_v18 = vadd.f32 %v8348_v13, %v1498_v11 }
 0x147   : > { %v8240_v21 = vpop.f32.mrf.mxu0  ;;  %v8350_v23 = vpop.f32.mrf.mxu1 }
 0x148   : > { %v1501_v22 = vadd.f32 %v8239_v15, %v10932_v33  ;;  %v8351_v24 = vadd.f32 %v8350_v23, %v8349_v17 }
 0x149   : > { %v8241_v25 = vpop.f32.mrf.mxu0  ;;  %v8352_v27 = vpop.f32.mrf.mxu1 }
 0x14a   : > { %v8242_v26 = vadd.f32 %v8241_v25, %v8240_v21  ;;  %v11034_v30 = vadd.f32 %v8351_v24, %v1501_v22 }
 0x14b   : > { %v8243_v32 = vpop.f32.mrf.mxu0  ;;  %v8353_v35 = vpop.f32.mrf.mxu1 }
 0x14c   : > { %v1506_v34 = vadd.f32 %v8242_v26, %v10932_v33  ;;  %v8354_v36 = vadd.f32 %v8353_v35, %v8352_v27 }
 0x14d   : > { %v8244_v37 = vpop.f32.mrf.mxu0  ;;  %v8355_v40 = vpop.f32.mrf.mxu1 }
 0x14e   : > { %v8245_v38 = vadd.f32 %v8244_v37, %v8243_v32  ;;  %v11037_v42 = vadd.f32 %v8354_v36, %v1506_v34 }
 0x14f   : > { %v8246_v43 = vpop.f32.mrf.mxu0  ;;  %v8356_v46 = vpop.f32.mrf.mxu1 }
 0x150   : > { %v1509_v45 = vadd.f32 %v8245_v38, %v10932_v33  ;;  %v8357_v47 = vadd.f32 %v8356_v46, %v8355_v40 }
 0x151   : > { %v8247_v48 = vpop.f32.mrf.mxu0  ;;  %v8358_v52 = vpop.f32.mrf.mxu1 }
 0x152   : > { %v8248_v51 = vadd.f32 %v8247_v48, %v8246_v43  ;;  %v11040_v54 = vadd.f32 %v8357_v47, %v1509_v45 }
 0x153   : > { %v8249_v56 = vpop.f32.mrf.mxu0  ;;  %v8359_v58 = vpop.f32.mrf.mxu1 }
 0x154   : > { %v1514_v57 = vadd.f32 %v8248_v51, %v10932_v33  ;;  %v8360_v59 = vadd.f32 %v8359_v58, %v8358_v52 }
 0x155   : > { %v8250_v62 = vpop.f32.mrf.mxu0  ;;  %v8361_v1 = vpop.f32.mrf.mxu1 }
 0x156   : > { %v8251_v63 = vadd.f32 %v8250_v62, %v8249_v56  ;;  %v11043_v2 = vadd.f32 %v8360_v59, %v1514_v57 }
 0x157   : > { %v8252_v3 = vpop.f32.mrf.mxu0  ;;  %v8362_v6 = vpop.f32.mrf.mxu1 }
 0x158   : > { %v1517_v4 = vadd.f32 %v8251_v63, %v10932_v33  ;;  %v8363_v9 = vadd.f32 %v8362_v6, %v8361_v1 }
 0x159   : > { %v8253_v11 = vpop.f32.mrf.mxu0  ;;  %v8364_v13 = vpop.f32.mrf.mxu1 }
 0x15a   : > { %v8254_v12 = vadd.f32 %v8253_v11, %v8252_v3  ;;  %v11046_v14 = vadd.f32 %v8363_v9, %v1517_v4 }
 0x15b   : > { %v8255_v15 = vpop.f32.mrf.mxu0  ;;  %v8365_v21 = vpop.f32.mrf.mxu1 }
 0x15c   : > { %v1522_v17 = vadd.f32 %v8254_v12, %v10932_v33  ;;  %v8366_v22 = vadd.f32 %v8365_v21, %v8364_v13 }
 0x15d   : > { %v8256_v23 = vpop.f32.mrf.mxu0  ;;  %v8367_v25 = vpop.f32.mrf.mxu1 }
 0x15e   : > { %v8257_v24 = vadd.f32 %v8256_v23, %v8255_v15  ;;  %v11049_v26 = vadd.f32 %v8366_v22, %v1522_v17 }
 0x15f   : > { %v8258_v27 = vpop.f32.mrf.mxu0  ;;  %v8368_v34 = vpop.f32.mrf.mxu1 }
 0x160   : > { %v1525_v32 = vadd.f32 %v8257_v24, %v10932_v33  ;;  %v8369_v35 = vadd.f32 %v8368_v34, %v8367_v25 }
 0x161   : > { %v8259_v36 = vpop.f32.mrf.mxu0  ;;  %v8370_v38 = vpop.f32.mrf.mxu1 }
 0x162   : > { %v8260_v37 = vadd.f32 %v8259_v36, %v8258_v27  ;;  %v11052_v40 = vadd.f32 %v8369_v35, %v1525_v32 }
 0x163   : > { %v8261_v43 = vpop.f32.mrf.mxu0  ;;  %v8371_v46 = vpop.f32.mrf.mxu1 }
 0x164   : > { %v1530_v45 = vadd.f32 %v8260_v37, %v10932_v33  ;;  %v8372_v47 = vadd.f32 %v8371_v46, %v8370_v38 }
 0x165   : > { %v8262_v48 = vpop.f32.mrf.mxu0  ;;  %v8373_v52 = vpop.f32.mrf.mxu1 }
 0x166   : > { %v8263_v51 = vadd.f32 %v8262_v48, %v8261_v43  ;;  %v11055_v56 = vadd.f32 %v8372_v47, %v1530_v45  ;;  %v9053_v43 = vld [vmem:[%s12575_s5 + $0x18] sm:$0xff]  }
 0x167   : > { %v8264_v57 = vpop.f32.mrf.mxu0  ;;  %v8374_v59 = vpop.f32.mrf.mxu1  ;;  %8739 = vmatprep.subr.bf16.mxu0 %v9053_v43 }
 0x168   : > { %v1533_v58 = vadd.f32 %v8263_v51, %v10932_v33  ;;  %v8375_v62 = vadd.f32 %v8374_v59, %v8373_v52  ;;  %8740 = vmatpush3.bf16.msra.mxu0 %v9053_v43 }
 0x169   : > { %v8265_v63 = vpop.f32.mrf.mxu0  ;;  %v8376_v3 = vpop.f32.mrf.mxu1 }
 0x16a   : > { %v8266_v1 = vadd.f32 %v8265_v63, %v8264_v57  ;;  %v11058_v4 = vadd.f32 %v8375_v62, %v1533_v58 }
 0x16b   : > { %v8267_v6 = vpop.f32.mrf.mxu0  ;;  %v8377_v11 = vpop.f32.mrf.mxu1 }
 0x16c   : > { %v1538_v9 = vadd.f32 %v8266_v1, %v10932_v33  ;;  %v8378_v12 = vadd.f32 %v8377_v11, %v8376_v3 }
 0x16d   : > { %v8268_v13 = vpop.f32.mrf.mxu0  ;;  %v8379_v17 = vpop.f32.mrf.mxu1 }
 0x16e   : > { %v8269_v15 = vadd.f32 %v8268_v13, %v8267_v6  ;;  %v11061_v21 = vadd.f32 %v8378_v12, %v1538_v9 }
 0x16f   : > { %v8398_v22 = vpop.f32.mrf.mxu0  ;;  %v8380_v24 = vpop.f32.mrf.mxu1 }
 0x170   : > { %v1541_v23 = vadd.f32 %v8269_v15, %v10932_v33  ;;  %v8381_v25 = vadd.f32 %v8380_v24, %v8379_v17  ;;  %v9055_v24 = vld [vmem:[%s12575_s5 + $0x8] sm:$0xff]  }
 0x171   : > { %v8399_v27 = vpop.f32.mrf.mxu0  ;;  %v8661_v34 = vpop.f32.mrf.mxu1 }
 0x172   : > { %v8400_v32 = vadd.f32 %v8399_v27, %v8398_v22  ;;  %v11064_v35 = vadd.f32 %v8381_v25, %v1541_v23 }
 0x173   : > { %v8401_v36 = vpop.f32.mrf.mxu0  ;;  %v1900_v38 = vpop.f32.mrf.mxu1 }
 0x174   : > { %v1740_v37 = vadd.f32 %v8400_v32, %v10940_v49 }
 0x175   : > { %v8402_v45 = vpop.f32.mrf.mxu0  ;;  %v8662_v47 = vpop.f32.mrf.mxu1 }
 0x176   : > { %v8403_v46 = vadd.f32 %v8402_v45, %v8401_v36  ;;  %v1901_v33 = vadd.f32 %v1900_v38, %v1740_v37 }
 0x177   : > { %v8404_v48 = vpop.f32.mrf.mxu0  ;;  %v1903_v52 = vpop.f32.mrf.mxu1 }
 0x178   : > { %v1743_v51 = vadd.f32 %v8403_v46, %v10947_v61  ;;  %9151 = vtanh.f32 %v1901_v33 }
 0x179   : > { %v8405_v57 = vpop.f32.mrf.mxu0  ;;  %v8665_v62 = vpop.f32.mrf.mxu1 }
 0x17a   : > { %v8406_v58 = vadd.f32 %v8405_v57, %v8404_v48  ;;  %v1904_v59 = vadd.f32 %v1903_v52, %v1743_v51 }
 0x17b   : > { %v8407_v49 = vpop.f32.mrf.mxu0  ;;  %v1916_v11 = vpop.f32.mrf.mxu1 }
 0x17c   : > { %v1748_v63 = vadd.f32 %v8406_v58, %v10950_v7  ;;  %9153 = vtanh.f32 %v1904_v59  ;;  %v9054_v7 = vld [vmem:[%s12575_s5 + $0x10] sm:$0xff]  }
 0x17d   : > { %v8408_v1 = vpop.f32.mrf.mxu0  ;;  %v8666_v22 = vpop.f32.mrf.mxu1  ;;  %8741 = vmatprep.subr.bf16.mxu0 %v9054_v7 }
 0x17e   : > { %v8409_v3 = vadd.f32 %v8408_v1, %v8407_v49  ;;  %v1909_v6 = vadd.f32 %v8661_v34, %v1748_v63  ;;  %8742 = vmatpush3.bf16.msra.mxu0 %v9054_v7 }
 0x17f   : > { %v8410_v9 = vpop.f32.mrf.mxu0  ;;  %v1919_v34 = vpop.f32.mrf.mxu1  ;;  %8743 = vmatprep.subr.bf16.mxu0 %v9055_v24 }
 0x180   : > { %v1751_v12 = vadd.f32 %v8409_v3, %v10960_v20  ;;  %9155 = vtanh.f32 %v1909_v6 }
 0x181   : > { %v8411_v13 = vpop.f32.mrf.mxu0  ;;  %v8669_v48 = vpop.f32.mrf.mxu1 }
 0x182   : > { %v1912_v15 = vadd.f32 %v8662_v47, %v1751_v12  ;;  %v8412_v61 = vadd.f32 %v8411_v13, %v8410_v9  ;;  %8744 = vmatpush3.bf16.msra.mxu0 %v9055_v24 }
 0x183   : > { %v8413_v17 = vpop.f32.mrf.mxu0  ;;  %v1932_v59 = vpop.f32.mrf.mxu1 }
 0x184   : > { %9157 = vtanh.f32 %v1912_v15  ;;  %v1756_v23 = vadd.f32 %v8412_v61, %v10966_v31  ;;  %v9056_v31 = vld [vmem:[%s12575_s5] sm:$0xff]  }
 0x185   : > { %v8414_v25 = vpop.f32.mrf.mxu0  ;;  %v9152_v36 = vpop.eup %9151  ;;  %8745 = vmatprep.subr.bf16.mxu0 %v9056_v31 }
 0x186   : > { %v8415_v27 = vadd.f32 %v8414_v25, %v8413_v17  ;;  %v1917_v20 = vadd.f32 %v1916_v11, %v1756_v23  ;;  %8746 = vmatpush3.bf16.msra.mxu0 %v9056_v31 }
 0x187   : > { %v8416_v32 = vpop.f32.mrf.mxu0 }
 0x188   : > { %v1759_v37 = vadd.f32 %v8415_v27, %v10973_v44  ;;  %9159 = vtanh.f32 %v1917_v20 }
 0x189   : > { %v9154_v38 = vpop.eup %9153  ;;  %v8417_v43 = vpop.f32.mrf.mxu0 }
 0x18a   : > { %v8418_v45 = vadd.f32 %v8417_v43, %v8416_v32  ;;  %v1920_v46 = vadd.f32 %v1919_v34, %v1759_v37  ;;  %v2059_v47 = vpack.c.bf16 %v9154_v38, %v9152_v36 }
 0x18b   : > { %v8419_v33 = vpop.f32.mrf.mxu0 }
 0x18c   : > { %v1764_v51 = vadd.f32 %v8418_v45, %v10976_v55  ;;  %9161 = vtanh.f32 %v1920_v46  ;;  %8707 = vmatprep.mubr.bf16.mxu1 %v2059_v47  ;;  %v8670_v55 = vpop.f32.mrf.mxu1 }
 0x18d   : > { %v8420_v44 = vpop.f32.mrf.mxu0  ;;  %v9156_v49 = vpop.eup %9155 }
 0x18e   : > { %v8421_v52 = vadd.f32 %v8420_v44, %v8419_v33  ;;  %v1925_v57 = vadd.f32 %v8665_v62, %v1764_v51  ;;  %v1935_v23 = vpop.f32.mrf.mxu1 }
 0x18f   : > { %v8422_v58 = vpop.f32.mrf.mxu0 }
 0x190   : > { %v1767_v63 = vadd.f32 %v8421_v52, %v10986_v5  ;;  %9163 = vtanh.f32 %v1925_v57  ;;  %v8673_v34 = vpop.f32.mrf.mxu1 }
 0x191   : > { %v9158_v1 = vpop.eup %9157  ;;  %v8423_v3 = vpop.f32.mrf.mxu0 }
 0x192   : > { %v1928_v6 = vadd.f32 %v8666_v22, %v1767_v63  ;;  %v8424_v9 = vadd.f32 %v8423_v3, %v8422_v58  ;;  %v2060_v11 = vpack.c.bf16 %v9158_v1, %v9156_v49  ;;  %v1948_v43 = vpop.f32.mrf.mxu1 }
 0x193   : > { %v8425_v12 = vpop.f32.mrf.mxu0 }
 0x194   : > { %9165 = vtanh.f32 %v1928_v6  ;;  %8708 = vmatmul.mubr.bf16.vlgmr.msra.gmra.mxu1 %v2060_v11  ;;  %v1772_v13 = vadd.f32 %v8424_v9, %v10989_v16  ;;  %v8674_v57 = vpop.f32.mrf.mxu1 }
 0x195   : > { %v8426_v15 = vpop.f32.mrf.mxu0  ;;  %v9160_v7 = vpop.eup %9159 }
 0x196   : > { %v8427_v62 = vadd.f32 %v8426_v15, %v8425_v12  ;;  %v1933_v61 = vadd.f32 %v1932_v59, %v1772_v13  ;;  %v1951_v63 = vpop.f32.mrf.mxu1 }
 0x197   : > { %v8428_v17 = vpop.f32.mrf.mxu0 }
 0x198   : > { %v1775_v5 = vadd.f32 %v8427_v62, %v10996_v29  ;;  %9167 = vtanh.f32 %v1933_v61  ;;  %v8677_v13 = vpop.f32.mrf.mxu1 }
 0x199   : > { %v9162_v24 = vpop.eup %9161  ;;  %v8429_v25 = vpop.f32.mrf.mxu0 }
 0x19a   : > { %v8430_v22 = vadd.f32 %v8429_v25, %v8428_v17  ;;  %v1936_v27 = vadd.f32 %v1935_v23, %v1775_v5  ;;  %v2061_v20 = vpack.c.bf16 %v9162_v24, %v9160_v7  ;;  %v1964_v23 = vpop.f32.mrf.mxu1 }
 0x19b   : > { %v8431_v32 = vpop.f32.mrf.mxu0 }
 0x19c   : > { %v1780_v36 = vadd.f32 %v8430_v22, %v10999_v41  ;;  %9169 = vtanh.f32 %v1936_v27  ;;  %8711 = vmatprep.mubr.bf16.mxu1 %v2061_v20 }
 0x19d   : > { %v8432_v16 = vpop.f32.mrf.mxu0  ;;  %v9164_v45 = vpop.eup %9163 }
 0x19e   : > { %v8433_v37 = vadd.f32 %v8432_v16, %v8431_v32  ;;  %v1941_v31 = vadd.f32 %v8669_v48, %v1780_v36  ;;  %v8678_v32 = vpop.f32.mrf.mxu1 }
 0x19f   : > { %v8434_v38 = vpop.f32.mrf.mxu0 }
 0x1a0   : > { %v1783_v29 = vadd.f32 %v8433_v37, %v11004_v53  ;;  %9171 = vtanh.f32 %v1941_v31  ;;  %v1967_v31 = vpop.f32.mrf.mxu1 }
 0x1a1   : > { %v9166_v46 = vpop.eup %9165  ;;  %v8435_v47 = vpop.f32.mrf.mxu0 }
 0x1a2   : > { %v1944_v33 = vadd.f32 %v8670_v55, %v1783_v29  ;;  %v8436_v51 = vadd.f32 %v8435_v47, %v8434_v38  ;;  %v2062_v44 = vpack.c.bf16 %v9166_v46, %v9164_v45 }
 0x1a3   : > { %v8437_v52 = vpop.f32.mrf.mxu0 }
 0x1a4   : > { %9173 = vtanh.f32 %v1944_v33  ;;  %8712 = vmatmul.mubr.bf16.gmra.mxu1 %v2062_v44  ;;  %v1788_v41 = vadd.f32 %v8436_v51, %v11007_v0  ;;  %v8681_v51 = vpop.f32.mrf.mxu1 }
 0x1a5   : > { %v8438_v58 = vpop.f32.mrf.mxu0  ;;  %v9168_v1 = vpop.eup %9167 }
 0x1a6   : > { %v8439_v59 = vadd.f32 %v8438_v58, %v8437_v52  ;;  %v1949_v48 = vadd.f32 %v1948_v43, %v1788_v41  ;;  %v1980_v58 = vpop.f32.mrf.mxu1 }
 0x1a7   : > { %v8440_v49 = vpop.f32.mrf.mxu0 }
 0x1a8   : > { %v1791_v53 = vadd.f32 %v8439_v59, %v11010_v10  ;;  %9175 = vtanh.f32 %v1949_v48 }
 0x1a9   : > { %v9170_v3 = vpop.eup %9169  ;;  %v8441_v6 = vpop.f32.mrf.mxu0 }
 0x1aa   : > { %v8442_v9 = vadd.f32 %v8441_v6, %v8440_v49  ;;  %v1952_v11 = vadd.f32 %v1951_v63, %v1791_v53  ;;  %v2063_v12 = vpack.c.bf16 %v9170_v3, %v9168_v1  ;;  %v8682_v6 = vpop.f32.mrf.mxu1 }
 0x1ab   : > { %v8443_v55 = vpop.f32.mrf.mxu0 }
 0x1ac   : > { %v1796_v15 = vadd.f32 %v8442_v9, %v11013_v19  ;;  %9177 = vtanh.f32 %v1952_v11  ;;  %8715 = vmatprep.mubr.bf16.mxu1 %v2063_v12 }
 0x1ad   : > { %v8444_v0 = vpop.f32.mrf.mxu0  ;;  %v9172_v7 = vpop.eup %9171 }
 0x1ae   : > { %v8445_v62 = vadd.f32 %v8444_v0, %v8443_v55  ;;  %v1957_v61 = vadd.f32 %v8673_v34, %v1796_v15 }
 0x1af   : > { %v8446_v17 = vpop.f32.mrf.mxu0 }
 0x1b0   : > { %v1799_v10 = vadd.f32 %v8445_v62, %v11016_v28  ;;  %9179 = vtanh.f32 %v1957_v61 }
 0x1b1   : > { %v9174_v5 = vpop.eup %9173  ;;  %v8447_v24 = vpop.f32.mrf.mxu0 }
 0x1b2   : > { %v1960_v25 = vadd.f32 %v8674_v57, %v1799_v10  ;;  %v8448_v22 = vadd.f32 %v8447_v24, %v8446_v17  ;;  %v2064_v27 = vpack.c.bf16 %v9174_v5, %v9172_v7 }
 0x1b3   : > { %v8449_v20 = vpop.f32.mrf.mxu0 }
 0x1b4   : > { %9181 = vtanh.f32 %v1960_v25  ;;  %8716 = vmatmul.mubr.bf16.gmra.mxu1 %v2064_v27  ;;  %v1804_v19 = vadd.f32 %v8448_v22, %v11019_v39 }
 0x1b5   : > { %v8450_v36 = vpop.f32.mrf.mxu0  ;;  %v9176_v38 = vpop.eup %9175 }
 0x1b6   : > { %v8451_v16 = vadd.f32 %v8450_v36, %v8449_v20  ;;  %v1965_v34 = vadd.f32 %v1964_v23, %v1804_v19 }
 0x1b7   : > { %v8452_v37 = vpop.f32.mrf.mxu0 }
 0x1b8   : > { %v1807_v28 = vadd.f32 %v8451_v16, %v11022_v50  ;;  %9183 = vtanh.f32 %v1965_v34 }
 0x1b9   : > { %v9178_v43 = vpop.eup %9177  ;;  %v8453_v45 = vpop.f32.mrf.mxu0 }
 0x1ba   : > { %v8454_v29 = vadd.f32 %v8453_v45, %v8452_v37  ;;  %v1968_v46 = vadd.f32 %v1967_v31, %v1807_v28  ;;  %v2065_v47 = vpack.c.bf16 %v9178_v43, %v9176_v38 }
 0x1bb   : > { %v8455_v33 = vpop.f32.mrf.mxu0 }
 0x1bc   : > { %v1812_v44 = vadd.f32 %v8454_v29, %v11025_v60  ;;  %9185 = vtanh.f32 %v1968_v46  ;;  %8719 = vmatprep.mubr.bf16.mxu1 %v2065_v47 }
 0x1bd   : > { %v8456_v39 = vpop.f32.mrf.mxu0  ;;  %v9180_v59 = vpop.eup %9179 }
 0x1be   : > { %v8457_v52 = vadd.f32 %v8456_v39, %v8455_v33  ;;  %v1973_v57 = vadd.f32 %v8677_v13, %v1812_v44  ;;  %v1983_v13 = vpop.f32.mrf.mxu1 }
 0x1bf   : > { %v8458_v41 = vpop.f32.mrf.mxu0 }
 0x1c0   : > { %v1815_v50 = vadd.f32 %v8457_v52, %v11028_v8  ;;  %9187 = vtanh.f32 %v1973_v57  ;;  %v8685_v10 = vpop.f32.mrf.mxu1 }
 0x1c1   : > { %v9182_v48 = vpop.eup %9181  ;;  %v8459_v49 = vpop.f32.mrf.mxu0 }
 0x1c2   : > { %v1976_v63 = vadd.f32 %v8678_v32, %v1815_v50  ;;  %v8460_v1 = vadd.f32 %v8459_v49, %v8458_v41  ;;  %v2066_v53 = vpack.c.bf16 %v9182_v48, %v9180_v59  ;;  %v1996_v27 = vpop.f32.mrf.mxu1 }
 0x1c3   : > { %v8461_v3 = vpop.f32.mrf.mxu0 }
 0x1c4   : > { %9189 = vtanh.f32 %v1976_v63  ;;  %8720 = vmatmul.mubr.bf16.gmra.mxu1 %v2066_v53  ;;  %v1820_v60 = vadd.f32 %v8460_v1, %v11031_v18  ;;  %v8686_v31 = vpop.f32.mrf.mxu1 }
 0x1c5   : > { %v8462_v9 = vpop.f32.mrf.mxu0  ;;  %v9184_v15 = vpop.eup %9183 }
 0x1c6   : > { %v8463_v11 = vadd.f32 %v8462_v9, %v8461_v3  ;;  %v1981_v12 = vadd.f32 %v1980_v58, %v1820_v60  ;;  %v1999_v29 = vpop.f32.mrf.mxu1 }
 0x1c7   : > { %v8464_v55 = vpop.f32.mrf.mxu0 }
 0x1c8   : > { %v1823_v8 = vadd.f32 %v8463_v11, %v11034_v30  ;;  %9191 = vtanh.f32 %v1981_v12  ;;  %v8689_v57 = vpop.f32.mrf.mxu1 }
 0x1c9   : > { %v9186_v0 = vpop.eup %9185  ;;  %v8465_v62 = vpop.f32.mrf.mxu0 }
 0x1ca   : > { %v8466_v61 = vadd.f32 %v8465_v62, %v8464_v55  ;;  %v1984_v17 = vadd.f32 %v1983_v13, %v1823_v8  ;;  %v2067_v23 = vpack.c.bf16 %v9186_v0, %v9184_v15  ;;  %v2012_v48 = vpop.f32.mrf.mxu1 }
 0x1cb   : > { %v8467_v7 = vpop.f32.mrf.mxu0 }
 0x1cc   : > { %v1828_v5 = vadd.f32 %v8466_v61, %v11037_v42  ;;  %9193 = vtanh.f32 %v1984_v17  ;;  %8723 = vmatprep.mubr.bf16.mxu1 %v2067_v23  ;;  %v8690_v9 = vpop.f32.mrf.mxu1 }
 0x1cd   : > { %v8468_v18 = vpop.f32.mrf.mxu0  ;;  %v9188_v20 = vpop.eup %9187 }
 0x1ce   : > { %v8469_v24 = vadd.f32 %v8468_v18, %v8467_v7  ;;  %v1989_v25 = vadd.f32 %v8681_v51, %v1828_v5  ;;  %v2015_v15 = vpop.f32.mrf.mxu1 }
 0x1cf   : > { %v8470_v22 = vpop.f32.mrf.mxu0 }
 0x1d0   : > { %v1831_v30 = vadd.f32 %v8469_v24, %v11040_v54  ;;  %9195 = vtanh.f32 %v1989_v25 }
 0x1d1   : > { %v9190_v32 = vpop.eup %9189  ;;  %v8471_v19 = vpop.f32.mrf.mxu0 }
 0x1d2   : > { %v1992_v36 = vadd.f32 %v8682_v6, %v1831_v30  ;;  %v8472_v16 = vadd.f32 %v8471_v19, %v8470_v22  ;;  %v2068_v34 = vpack.c.bf16 %v9190_v32, %v9188_v20 }
 0x1d3   : > { %v8473_v37 = vpop.f32.mrf.mxu0 }
 0x1d4   : > { %9197 = vtanh.f32 %v1992_v36  ;;  %8724 = vmatmul.mubr.bf16.gmra.mxu1 %v2068_v34  ;;  %v1836_v42 = vadd.f32 %v8472_v16, %v11043_v2  ;;  %v11113_v34 = vld [vmem:[%s12574_s4] ss:$0 sm:$0xff] }
 0x1d5   : > { %v8474_v38 = vpop.f32.mrf.mxu0  ;;  %v9192_v46 = vpop.eup %9191 }
 0x1d6   : > { %v8475_v28 = vadd.f32 %v8474_v38, %v8473_v37  ;;  %v1997_v43 = vadd.f32 %v1996_v27, %v1836_v42 }
 0x1d7   : > { %v8476_v45 = vpop.f32.mrf.mxu0 }
 0x1d8   : > { %v1839_v54 = vadd.f32 %v8475_v28, %v11046_v14  ;;  %9199 = vtanh.f32 %v1997_v43 }
 0x1d9   : > { %v9194_v47 = vpop.eup %9193  ;;  %v8477_v33 = vpop.f32.mrf.mxu0 }
 0x1da   : > { %v8478_v51 = vadd.f32 %v8477_v33, %v8476_v45  ;;  %v2000_v44 = vadd.f32 %v1999_v29, %v1839_v54  ;;  %v2069_v39 = vpack.c.bf16 %v9194_v47, %v9192_v46  ;;  %v9057_v45 = vld [vmem:[%s12577_s7] sm:$0x3f]  }
 0x1db   : > { %v8479_v52 = vpop.f32.mrf.mxu0  ;;  %8983 = vmatprep.subr.msk.bf16.mxu1 %vm2715_vm1, %v9057_v45  ;;  %v2717_v29 = vsel %vm2715_vm1, %v9057_v45, 0 }
 0x1dc   : > { %v1844_v41 = vadd.f32 %v8478_v51, %v11049_v26  ;;  %9201 = vtanh.f32 %v2000_v44  ;;  %8727 = vmatprep.mubr.bf16.mxu1 %v2069_v39  ;;  %8780 = vmatpush3.bf16.msra.mxu1 %v2717_v29 }
 0x1dd   : > { %v8480_v2 = vpop.f32.mrf.mxu0  ;;  %v9196_v49 = vpop.eup %9195 }
 0x1de   : > { %v8481_v58 = vadd.f32 %v8480_v2, %v8479_v52  ;;  %v2005_v59 = vadd.f32 %v8685_v10, %v1844_v41 }
 0x1df   : > { %v8482_v50 = vpop.f32.mrf.mxu0 }
 0x1e0   : > { %v1847_v14 = vadd.f32 %v8481_v58, %v11052_v40  ;;  %9203 = vtanh.f32 %v2005_v59 }
 0x1e1   : > { %v9198_v63 = vpop.eup %9197  ;;  %v8483_v1 = vpop.f32.mrf.mxu0 }
 0x1e2   : > { %v2008_v53 = vadd.f32 %v8686_v31, %v1847_v14  ;;  %v8484_v3 = vadd.f32 %v8483_v1, %v8482_v50  ;;  %v2070_v6 = vpack.c.bf16 %v9198_v63, %v9196_v49 }
 0x1e3   : > { %v8485_v60 = vpop.f32.mrf.mxu0 }
 0x1e4   : > { %9205 = vtanh.f32 %v2008_v53  ;;  %8728 = vmatmul.mubr.bf16.gmra.mxu1 %v2070_v6  ;;  %v1852_v26 = vadd.f32 %v8484_v3, %v11055_v56 }
 0x1e5   : > { %v8486_v11 = vpop.f32.mrf.mxu0  ;;  %v9200_v8 = vpop.eup %9199 }
 0x1e6   : > { %v8487_v12 = vadd.f32 %v8486_v11, %v8485_v60  ;;  %v2013_v55 = vadd.f32 %v2012_v48, %v1852_v26 }
 0x1e7   : > { %v8488_v13 = vpop.f32.mrf.mxu0 }
 0x1e8   : > { %v1855_v40 = vadd.f32 %v8487_v12, %v11058_v4  ;;  %9207 = vtanh.f32 %v2013_v55 }
 0x1e9   : > { %v9202_v0 = vpop.eup %9201  ;;  %v8489_v62 = vpop.f32.mrf.mxu0 }
 0x1ea   : > { %v8490_v61 = vadd.f32 %v8489_v62, %v8488_v13  ;;  %v2016_v17 = vadd.f32 %v2015_v15, %v1855_v40  ;;  %v2071_v23 = vpack.c.bf16 %v9202_v0, %v9200_v8 }
 0x1eb   : > { %v8491_v7 = vpop.f32.mrf.mxu0 }
 0x1ec   : > { %v1860_v10 = vadd.f32 %v8490_v61, %v11061_v21  ;;  %9209 = vtanh.f32 %v2016_v17  ;;  %8731 = vmatprep.mubr.bf16.mxu1 %v2071_v23 }
 0x1ed   : > { %v8492_v56 = vpop.f32.mrf.mxu0  ;;  %v9204_v24 = vpop.eup %9203 }
 0x1ee   : > { %v8493_v5 = vadd.f32 %v8492_v56, %v8491_v7  ;;  %v2021_v18 = vadd.f32 %v8689_v57, %v1860_v10 }
 0x1f0   : > { %v1863_v25 = vadd.f32 %v8493_v5, %v11064_v35  ;;  %9211 = vtanh.f32 %v2021_v18 }
 0x1f1   : > { %v9206_v22 = vpop.eup %9205 }
 0x1f2   : > { %v2024_v27 = vadd.f32 %v8690_v9, %v1863_v25  ;;  %v2072_v4 = vpack.c.bf16 %v9206_v22, %v9204_v24 }
 0x1f4   : > { %9213 = vtanh.f32 %v2024_v27  ;;  %8732 = vmatmul.mubr.bf16.gmra.mxu1 %v2072_v4 }
 0x1f5   : > { %v9208_v20 = vpop.eup %9207 }
 0x1f9   : > { %v9210_v30 = vpop.eup %9209 }
 0x1fa   : > { %v2073_v32 = vpack.c.bf16 %v9210_v30, %v9208_v20 }
 0x1fc   : > { %8735 = vmatprep.mubr.bf16.mxu1 %v2073_v32 }
 0x1fd   : > { %v9212_v19 = vpop.eup %9211 }
 0x201   : > { %v9214_v21 = vpop.eup %9213 }
 0x202   : > { %v2074_v36 = vpack.c.bf16 %v9214_v21, %v9212_v19 }
 0x204   : > { %8736 = vmatmul.mubr.bf16.gmra.mxu1 %v2074_v36 }
 0x254   : > { %v8709_v16 = vpop.f32.mrf.mxu1 }
 0x255   : > { %v2189_v38 = vadd.f32 %v8709_v16, %v11113_v34 }
 0x256   : > { %v2180_v35 = vpop.f32.mrf.mxu1 }
 0x257   : > { %v2181_v37 = vadd.f32 %v11113_v34, %v2180_v35 }
 0x258   : > { %v8710_v31 = vpop.f32.mrf.mxu1 }
 0x259   : > { %v2192_v42 = vadd.f32 %v8710_v31, %v11113_v34  ;;  %9215 = vtanh.f32 %v2181_v37 }
 0x25a   : > { %v2183_v28 = vpop.f32.mrf.mxu1 }
 0x25b   : > { %v2184_v43 = vadd.f32 %v11113_v34, %v2183_v28  ;;  %9217 = vtanh.f32 %v2192_v42 }
 0x25d   : > { %9219 = vtanh.f32 %v2184_v43 }
 0x25e   : > { %9221 = vtanh.f32 %v2189_v38 }
 0x264   : > { %v8713_v46 = vpop.f32.mrf.mxu1 }
 0x265   : > { %v2205_v57 = vadd.f32 %v8713_v46, %v11113_v34 }
 0x266   : > { %v2196_v54 = vpop.f32.mrf.mxu1  ;;  %v9216_v33 = vpop.eup %9215 }
 0x267   : > { %v2197_v47 = vadd.f32 %v11113_v34, %v2196_v54 }
 0x268   : > { %v8714_v51 = vpop.f32.mrf.mxu1  ;;  %v9218_v44 = vpop.eup %9217 }
 0x269   : > { %v2208_v39 = vadd.f32 %v8714_v51, %v11113_v34  ;;  %9223 = vtanh.f32 %v2197_v47 }
 0x26a   : > { %v9220_v52 = vpop.eup %9219  ;;  %v2199_v41 = vpop.f32.mrf.mxu1 }
 0x26b   : > { %v9222_v2 = vpop.eup %9221  ;;  %v2200_v58 = vadd.f32 %v11113_v34, %v2199_v41  ;;  %v2339_v59 = vpack.c.bf16 %v9220_v52, %v9216_v33  ;;  %9225 = vtanh.f32 %v2208_v39 }
 0x26c   : > { %v2340_v50 = vpack.c.bf16 %v9218_v44, %v9222_v2 }
 0x26d   : > { %9227 = vtanh.f32 %v2200_v58  ;;  %8747 = vmatprep.mubr.msk.bf16.mxu0 %vm2394_vm2, %v2339_v59 }
 0x26e   : > { %9229 = vtanh.f32 %v2205_v57  ;;  %8748 = vmatmul.mubr.msk.bf16.vlgmr.msra.gmra.mxu0 %vm2394_vm2, %v2340_v50 }
 0x274   : > { %v8717_v48 = vpop.f32.mrf.mxu1 }
 0x275   : > { %v2221_v60 = vadd.f32 %v8717_v48, %v11113_v34 }
 0x276   : > { %v2212_v49 = vpop.f32.mrf.mxu1  ;;  %v9224_v63 = vpop.eup %9223 }
 0x277   : > { %v2213_v14 = vadd.f32 %v11113_v34, %v2212_v49 }
 0x278   : > { %v8718_v1 = vpop.f32.mrf.mxu1  ;;  %v9226_v53 = vpop.eup %9225 }
 0x279   : > { %v2224_v3 = vadd.f32 %v8718_v1, %v11113_v34  ;;  %9231 = vtanh.f32 %v2213_v14 }
 0x27a   : > { %v9228_v6 = vpop.eup %9227  ;;  %v2215_v9 = vpop.f32.mrf.mxu1 }
 0x27b   : > { %v9230_v26 = vpop.eup %9229  ;;  %v2216_v11 = vadd.f32 %v11113_v34, %v2215_v9  ;;  %v2341_v12 = vpack.c.bf16 %v9228_v6, %v9224_v63  ;;  %9233 = vtanh.f32 %v2224_v3 }
 0x27c   : > { %v2342_v55 = vpack.c.bf16 %v9226_v53, %v9230_v26 }
 0x27d   : > { %9235 = vtanh.f32 %v2216_v11  ;;  %8751 = vmatprep.mubr.msk.bf16.mxu0 %vm2394_vm2, %v2341_v12 }
 0x27e   : > { %9237 = vtanh.f32 %v2221_v60  ;;  %8752 = vmatmul.mubr.msk.bf16.gmra.mxu0 %vm2394_vm2, %v2342_v55 }
 0x284   : > { %v8721_v13 = vpop.f32.mrf.mxu1 }
 0x285   : > { %v2237_v23 = vadd.f32 %v8721_v13, %v11113_v34 }
 0x286   : > { %v2228_v15 = vpop.f32.mrf.mxu1  ;;  %v9232_v40 = vpop.eup %9231 }
 0x287   : > { %v2229_v8 = vadd.f32 %v11113_v34, %v2228_v15 }
 0x288   : > { %v8722_v0 = vpop.f32.mrf.mxu1  ;;  %v9234_v62 = vpop.eup %9233 }
 0x289   : > { %v2240_v61 = vadd.f32 %v8722_v0, %v11113_v34  ;;  %9239 = vtanh.f32 %v2229_v8 }
 0x28a   : > { %v9236_v17 = vpop.eup %9235  ;;  %v2231_v7 = vpop.f32.mrf.mxu1 }
 0x28b   : > { %v9238_v10 = vpop.eup %9237  ;;  %v2232_v56 = vadd.f32 %v11113_v34, %v2231_v7  ;;  %v2343_v5 = vpack.c.bf16 %v9236_v17, %v9232_v40  ;;  %9241 = vtanh.f32 %v2240_v61 }
 0x28c   : > { %v2344_v18 = vpack.c.bf16 %v9234_v62, %v9238_v10 }
 0x28d   : > { %9243 = vtanh.f32 %v2232_v56  ;;  %8755 = vmatprep.mubr.msk.bf16.mxu0 %vm2394_vm2, %v2343_v5 }
 0x28e   : > { %9245 = vtanh.f32 %v2237_v23  ;;  %8756 = vmatmul.mubr.msk.bf16.gmra.mxu0 %vm2394_vm2, %v2344_v18  ;;  %v11171_v18 = vld [vmem:[%s12576_s6] ss:$0 sm:$0xff] }
 0x294   : > { %v8725_v24 = vpop.f32.mrf.mxu1 }
 0x295   : > { %v2253_v19 = vadd.f32 %v8725_v24, %v11113_v34 }
 0x296   : > { %v2244_v25 = vpop.f32.mrf.mxu1  ;;  %v9240_v27 = vpop.eup %9239 }
 0x297   : > { %v2245_v22 = vadd.f32 %v11113_v34, %v2244_v25 }
 0x298   : > { %v8726_v4 = vpop.f32.mrf.mxu1  ;;  %v9242_v20 = vpop.eup %9241 }
 0x299   : > { %v2256_v30 = vadd.f32 %v8726_v4, %v11113_v34  ;;  %9247 = vtanh.f32 %v2245_v22 }
 0x29a   : > { %v9244_v32 = vpop.eup %9243  ;;  %v2247_v21 = vpop.f32.mrf.mxu1 }
 0x29b   : > { %v9246_v36 = vpop.eup %9245  ;;  %v2248_v16 = vadd.f32 %v11113_v34, %v2247_v21  ;;  %v2345_v35 = vpack.c.bf16 %v9244_v32, %v9240_v27  ;;  %9249 = vtanh.f32 %v2256_v30  ;;  %v9058_v32 = vld [vmem:[%s12579_s9 + $0x38] sm:$0xff]   ;;  %v9060_v21 = vld [vmem:[%s12579_s9 + $0x28] sm:$0xff]  }
 0x29c   : > { %v2346_v37 = vpack.c.bf16 %v9242_v20, %v9246_v36  ;;  %8813 = vmatprep.subr.bf16.mxu0 %v9058_v32 }
 0x29d   : > { %9251 = vtanh.f32 %v2248_v16  ;;  %8759 = vmatprep.mubr.msk.bf16.mxu0 %vm2394_vm2, %v2345_v35  ;;  %8814 = vmatpush3.bf16.msra.mxu0 %v9058_v32  ;;  %v9061_v35 = vld [vmem:[%s12579_s9 + $0x20] sm:$0xff]  }
 0x29e   : > { %9253 = vtanh.f32 %v2253_v19  ;;  %8760 = vmatmul.mubr.msk.bf16.gmra.mxu0 %vm2394_vm2, %v2346_v37  ;;  %v9059_v19 = vld [vmem:[%s12579_s9 + $0x30] sm:$0xff]  }
 0x29f   : > { %8815 = vmatprep.subr.bf16.mxu0 %v9059_v19 }
 0x2a1   : > { %8816 = vmatpush3.bf16.msra.mxu0 %v9059_v19 }
 0x2a2   : > { %8817 = vmatprep.subr.bf16.mxu0 %v9060_v21 }
 0x2a4   : > { %v8729_v31 = vpop.f32.mrf.mxu1 }
 0x2a5   : > { %v2269_v54 = vadd.f32 %v8729_v31, %v11113_v34  ;;  %8818 = vmatpush3.bf16.msra.mxu0 %v9060_v21 }
 0x2a6   : > { %v2260_v42 = vpop.f32.mrf.mxu1  ;;  %v9248_v28 = vpop.eup %9247  ;;  %8819 = vmatprep.subr.bf16.mxu0 %v9061_v35 }
 0x2a7   : > { %v2261_v38 = vadd.f32 %v11113_v34, %v2260_v42 }
 0x2a8   : > { %v8730_v43 = vpop.f32.mrf.mxu1  ;;  %v9250_v45 = vpop.eup %9249 }
 0x2a9   : > { %v2272_v29 = vadd.f32 %v8730_v43, %v11113_v34  ;;  %9255 = vtanh.f32 %v2261_v38  ;;  %8820 = vmatpush3.bf16.msra.mxu0 %v9061_v35 }
 0x2aa   : > { %v9252_v46 = vpop.eup %9251  ;;  %v2263_v47 = vpop.f32.mrf.mxu1 }
 0x2ab   : > { %v9254_v33 = vpop.eup %9253  ;;  %v2264_v51 = vadd.f32 %v11113_v34, %v2263_v47  ;;  %v2347_v44 = vpack.c.bf16 %v9252_v46, %v9248_v28  ;;  %9257 = vtanh.f32 %v2272_v29  ;;  %v9062_v46 = vld [vmem:[%s12579_s9 + $0x18] sm:$0xff]  }
 0x2ac   : > { %v2348_v39 = vpack.c.bf16 %v9250_v45, %v9254_v33  ;;  %8821 = vmatprep.subr.bf16.mxu0 %v9062_v46 }
 0x2ad   : > { %9259 = vtanh.f32 %v2264_v51  ;;  %8763 = vmatprep.mubr.msk.bf16.mxu0 %vm2394_vm2, %v2347_v44  ;;  %v9063_v44 = vld [vmem:[%s12579_s9 + $0x10] sm:$0xff]   ;;  %8822 = vmatpush3.bf16.msra.mxu0 %v9062_v46 }
 0x2ae   : > { %9261 = vtanh.f32 %v2269_v54  ;;  %8764 = vmatmul.mubr.msk.bf16.gmra.mxu0 %vm2394_vm2, %v2348_v39  ;;  %8823 = vmatprep.subr.bf16.mxu0 %v9063_v44  ;;  %v9064_v39 = vld [vmem:[%s12579_s9 + $0x8] sm:$0xff]  }
 0x2b1   : > { %8824 = vmatpush3.bf16.msra.mxu0 %v9063_v44 }
 0x2b2   : > { %8825 = vmatprep.subr.bf16.mxu0 %v9064_v39 }
 0x2b4   : > { %v8733_v52 = vpop.f32.mrf.mxu1 }
 0x2b5   : > { %v2285_v49 = vadd.f32 %v8733_v52, %v11113_v34  ;;  %8826 = vmatpush3.bf16.msra.mxu0 %v9064_v39 }
 0x2b6   : > { %v2276_v57 = vpop.f32.mrf.mxu1  ;;  %v9256_v2 = vpop.eup %9255 }
 0x2b7   : > { %v2277_v41 = vadd.f32 %v11113_v34, %v2276_v57 }
 0x2b8   : > { %v8734_v58 = vpop.f32.mrf.mxu1  ;;  %v9258_v59 = vpop.eup %9257 }
 0x2b9   : > { %v2288_v50 = vadd.f32 %v8734_v58, %v11113_v34  ;;  %9263 = vtanh.f32 %v2277_v41 }
 0x2ba   : > { %v9260_v48 = vpop.eup %9259  ;;  %v2279_v14 = vpop.f32.mrf.mxu1 }
 0x2bb   : > { %v9262_v63 = vpop.eup %9261  ;;  %v2280_v1 = vadd.f32 %v11113_v34, %v2279_v14  ;;  %v2349_v53 = vpack.c.bf16 %v9260_v48, %v9256_v2  ;;  %9265 = vtanh.f32 %v2288_v50 }
 0x2bc   : > { %v2350_v3 = vpack.c.bf16 %v9258_v59, %v9262_v63 }
 0x2bd   : > { %9267 = vtanh.f32 %v2280_v1  ;;  %8767 = vmatprep.mubr.msk.bf16.mxu0 %vm2394_vm2, %v2349_v53 }
 0x2be   : > { %9269 = vtanh.f32 %v2285_v49  ;;  %8768 = vmatmul.mubr.msk.bf16.gmra.mxu0 %vm2394_vm2, %v2350_v3 }
 0x2c4   : > { %v8737_v6 = vpop.f32.mrf.mxu1 }
 0x2c5   : > { %v2301_v15 = vadd.f32 %v8737_v6, %v11113_v34 }
 0x2c6   : > { %v2292_v60 = vpop.f32.mrf.mxu1  ;;  %v9264_v26 = vpop.eup %9263 }
 0x2c7   : > { %v2293_v9 = vadd.f32 %v11113_v34, %v2292_v60 }
 0x2c8   : > { %v8738_v11 = vpop.f32.mrf.mxu1  ;;  %v9266_v12 = vpop.eup %9265 }
 0x2c9   : > { %v2304_v55 = vadd.f32 %v8738_v11, %v11113_v34  ;;  %9271 = vtanh.f32 %v2293_v9 }
 0x2ca   : > { %v9268_v13 = vpop.eup %9267  ;;  %v2295_v8 = vpop.f32.mrf.mxu1 }
 0x2cb   : > { %v9270_v40 = vpop.eup %9269  ;;  %v2296_v0 = vadd.f32 %v11113_v34, %v2295_v8  ;;  %v2351_v62 = vpack.c.bf16 %v9268_v13, %v9264_v26  ;;  %9273 = vtanh.f32 %v2304_v55 }
 0x2cc   : > { %v2352_v61 = vpack.c.bf16 %v9266_v12, %v9270_v40 }
 0x2cd   : > { %9275 = vtanh.f32 %v2296_v0  ;;  %8771 = vmatprep.mubr.msk.bf16.mxu0 %vm2394_vm2, %v2351_v62 }
 0x2ce   : > { %9277 = vtanh.f32 %v2301_v15  ;;  %8772 = vmatmul.mubr.msk.bf16.gmra.mxu0 %vm2394_vm2, %v2352_v61 }
 0x2d6   : > { %v9272_v17 = vpop.eup %9271 }
 0x2d8   : > { %v9274_v23 = vpop.eup %9273 }
 0x2da   : > { %v9276_v7 = vpop.eup %9275 }
 0x2db   : > { %v9278_v10 = vpop.eup %9277  ;;  %v2353_v56 = vpack.c.bf16 %v9276_v7, %v9272_v17 }
 0x2dc   : > { %v2354_v5 = vpack.c.bf16 %v9274_v23, %v9278_v10 }
 0x2dd   : > { %8775 = vmatprep.mubr.msk.bf16.mxu0 %vm2394_vm2, %v2353_v56 }
 0x2de   : > { %8776 = vmatmul.mubr.msk.bf16.gmra.mxu0 %vm2394_vm2, %v2354_v5 }
 0x32e   : > { %v8749_v34 = vpop.f32.mrf.mxu0 }
 0x32f   : > { %v2486_v4 = vadd.f32 %v8749_v34, %v11171_v18 }
 0x330   : > { %v2477_v24 = vpop.f32.mrf.mxu0 }
 0x331   : > { %v2478_v25 = vadd.f32 %v11171_v18, %v2477_v24 }
 0x332   : > { %v8750_v22 = vpop.f32.mrf.mxu0 }
 0x333   : > { %v2489_v27 = vadd.f32 %v8750_v22, %v11171_v18  ;;  %9279 = vtanh.f32 %v2478_v25 }
 0x334   : > { %v2480_v20 = vpop.f32.mrf.mxu0 }
 0x335   : > { %v2481_v30 = vadd.f32 %v11171_v18, %v2480_v20  ;;  %9281 = vtanh.f32 %v2489_v27 }
 0x337   : > { %9283 = vtanh.f32 %v2481_v30 }
 0x338   : > { %9285 = vtanh.f32 %v2486_v4 }
 0x33e   : > { %v8753_v36 = vpop.f32.mrf.mxu0 }
 0x33f   : > { %v2502_v45 = vadd.f32 %v8753_v36, %v11171_v18 }
 0x340   : > { %v2493_v16 = vpop.f32.mrf.mxu0  ;;  %v9280_v31 = vpop.eup %9279 }
 0x341   : > { %v2494_v37 = vadd.f32 %v11171_v18, %v2493_v16 }
 0x342   : > { %v8754_v42 = vpop.f32.mrf.mxu0  ;;  %v9282_v38 = vpop.eup %9281 }
 0x343   : > { %v2505_v28 = vadd.f32 %v8754_v42, %v11171_v18  ;;  %9287 = vtanh.f32 %v2494_v37 }
 0x344   : > { %v9284_v43 = vpop.eup %9283  ;;  %v2496_v29 = vpop.f32.mrf.mxu0 }
 0x345   : > { %v9286_v54 = vpop.eup %9285  ;;  %v2497_v47 = vadd.f32 %v11171_v18, %v2496_v29  ;;  %v2636_v33 = vpack.c.bf16 %v9284_v43, %v9280_v31  ;;  %9289 = vtanh.f32 %v2505_v28 }
 0x346   : > { %v2637_v51 = vpack.c.bf16 %v9282_v38, %v9286_v54  ;;  %v9065_v54 = vld [vmem:[%s12579_s9] sm:$0xff]  }
 0x347   : > { %9291 = vtanh.f32 %v2497_v47  ;;  %8781 = vmatprep.mubr.msk.bf16.mxu1 %vm2666_vm3, %v2636_v33  ;;  %8827 = vmatprep.subr.bf16.mxu0 %v9065_v54 }
 0x348   : > { %9293 = vtanh.f32 %v2502_v45  ;;  %8782 = vmatmul.mubr.msk.bf16.vlgmr.msra.gmra.mxu1 %vm2666_vm3, %v2637_v51  ;;  %8828 = vmatpush3.bf16.msra.mxu0 %v9065_v54 }
 0x34e   : > { %v8757_v52 = vpop.f32.mrf.mxu0 }
 0x34f   : > { %v2518_v49 = vadd.f32 %v8757_v52, %v11171_v18 }
 0x350   : > { %v2509_v57 = vpop.f32.mrf.mxu0  ;;  %v9288_v2 = vpop.eup %9287 }
 0x351   : > { %v2510_v41 = vadd.f32 %v11171_v18, %v2509_v57 }
 0x352   : > { %v8758_v58 = vpop.f32.mrf.mxu0  ;;  %v9290_v59 = vpop.eup %9289 }
 0x353   : > { %v2521_v50 = vadd.f32 %v8758_v58, %v11171_v18  ;;  %9295 = vtanh.f32 %v2510_v41 }
 0x354   : > { %v9292_v48 = vpop.eup %9291  ;;  %v2512_v14 = vpop.f32.mrf.mxu0 }
 0x355   : > { %v9294_v63 = vpop.eup %9293  ;;  %v2513_v1 = vadd.f32 %v11171_v18, %v2512_v14  ;;  %v2638_v53 = vpack.c.bf16 %v9292_v48, %v9288_v2  ;;  %9297 = vtanh.f32 %v2521_v50 }
 0x356   : > { %v2639_v3 = vpack.c.bf16 %v9290_v59, %v9294_v63 }
 0x357   : > { %9299 = vtanh.f32 %v2513_v1  ;;  %8785 = vmatprep.mubr.msk.bf16.mxu1 %vm2666_vm3, %v2638_v53 }
 0x358   : > { %9301 = vtanh.f32 %v2518_v49  ;;  %8786 = vmatmul.mubr.msk.bf16.gmra.mxu1 %vm2666_vm3, %v2639_v3 }
 0x35e   : > { %v8761_v6 = vpop.f32.mrf.mxu0 }
 0x35f   : > { %v2534_v15 = vadd.f32 %v8761_v6, %v11171_v18 }
 0x360   : > { %v2525_v60 = vpop.f32.mrf.mxu0  ;;  %v9296_v26 = vpop.eup %9295 }
 0x361   : > { %v2526_v9 = vadd.f32 %v11171_v18, %v2525_v60 }
 0x362   : > { %v8762_v11 = vpop.f32.mrf.mxu0  ;;  %v9298_v12 = vpop.eup %9297 }
 0x363   : > { %v2537_v55 = vadd.f32 %v8762_v11, %v11171_v18  ;;  %9303 = vtanh.f32 %v2526_v9 }
 0x364   : > { %v9300_v13 = vpop.eup %9299  ;;  %v2528_v8 = vpop.f32.mrf.mxu0 }
 0x365   : > { %v9302_v40 = vpop.eup %9301  ;;  %v2529_v0 = vadd.f32 %v11171_v18, %v2528_v8  ;;  %v2640_v62 = vpack.c.bf16 %v9300_v13, %v9296_v26  ;;  %9305 = vtanh.f32 %v2537_v55 }
 0x366   : > { %v2641_v61 = vpack.c.bf16 %v9298_v12, %v9302_v40 }
 0x367   : > { %9307 = vtanh.f32 %v2529_v0  ;;  %8789 = vmatprep.mubr.msk.bf16.mxu1 %vm2666_vm3, %v2640_v62 }
 0x368   : > { %9309 = vtanh.f32 %v2534_v15  ;;  %8790 = vmatmul.mubr.msk.bf16.gmra.mxu1 %vm2666_vm3, %v2641_v61 }
 0x36e   : > { %v8765_v17 = vpop.f32.mrf.mxu0 }
 0x36f   : > { %v2550_v25 = vadd.f32 %v8765_v17, %v11171_v18 }
 0x370   : > { %v2541_v23 = vpop.f32.mrf.mxu0  ;;  %v9304_v10 = vpop.eup %9303 }
 0x371   : > { %v2542_v7 = vadd.f32 %v11171_v18, %v2541_v23 }
 0x372   : > { %v8766_v56 = vpop.f32.mrf.mxu0  ;;  %v9306_v5 = vpop.eup %9305 }
 0x373   : > { %v2553_v34 = vadd.f32 %v8766_v56, %v11171_v18  ;;  %9311 = vtanh.f32 %v2542_v7  ;;  %v11253_v7 = vld [vmem:[%s12578_s8] ss:$0 sm:$0xff] }
 0x374   : > { %v9308_v24 = vpop.eup %9307  ;;  %v2544_v22 = vpop.f32.mrf.mxu0 }
 0x375   : > { %v9310_v27 = vpop.eup %9309  ;;  %v2545_v4 = vadd.f32 %v11171_v18, %v2544_v22  ;;  %v2642_v20 = vpack.c.bf16 %v9308_v24, %v9304_v10  ;;  %9313 = vtanh.f32 %v2553_v34 }
 0x376   : > { %v2643_v30 = vpack.c.bf16 %v9306_v5, %v9310_v27 }
 0x377   : > { %9315 = vtanh.f32 %v2545_v4  ;;  %8793 = vmatprep.mubr.msk.bf16.mxu1 %vm2666_vm3, %v2642_v20 }
 0x378   : > { %9317 = vtanh.f32 %v2550_v25  ;;  %8794 = vmatmul.mubr.msk.bf16.gmra.mxu1 %vm2666_vm3, %v2643_v30 }
 0x37e   : > { %v8769_v32 = vpop.f32.mrf.mxu0 }
 0x37f   : > { %v2566_v42 = vadd.f32 %v8769_v32, %v11171_v18 }
 0x380   : > { %v2557_v19 = vpop.f32.mrf.mxu0  ;;  %v9312_v36 = vpop.eup %9311 }
 0x381   : > { %v2558_v21 = vadd.f32 %v11171_v18, %v2557_v19 }
 0x382   : > { %v8770_v16 = vpop.f32.mrf.mxu0  ;;  %v9314_v35 = vpop.eup %9313 }
 0x383   : > { %v2569_v37 = vadd.f32 %v8770_v16, %v11171_v18  ;;  %9319 = vtanh.f32 %v2558_v21 }
 0x384   : > { %v9316_v31 = vpop.eup %9315  ;;  %v2560_v38 = vpop.f32.mrf.mxu0 }
 0x385   : > { %v9318_v28 = vpop.eup %9317  ;;  %v2561_v43 = vadd.f32 %v11171_v18, %v2560_v38  ;;  %v2644_v45 = vpack.c.bf16 %v9316_v31, %v9312_v36  ;;  %9321 = vtanh.f32 %v2569_v37 }
 0x386   : > { %v2645_v29 = vpack.c.bf16 %v9314_v35, %v9318_v28 }
 0x387   : > { %9323 = vtanh.f32 %v2561_v43  ;;  %8797 = vmatprep.mubr.msk.bf16.mxu1 %vm2666_vm3, %v2644_v45 }
 0x388   : > { %9325 = vtanh.f32 %v2566_v42  ;;  %8798 = vmatmul.mubr.msk.bf16.gmra.mxu1 %vm2666_vm3, %v2645_v29 }
 0x38e   : > { %v8773_v46 = vpop.f32.mrf.mxu0 }
 0x38f   : > { %v2582_v41 = vadd.f32 %v8773_v46, %v11171_v18 }
 0x390   : > { %v2573_v47 = vpop.f32.mrf.mxu0  ;;  %v9320_v51 = vpop.eup %9319 }
 0x391   : > { %v2574_v33 = vadd.f32 %v11171_v18, %v2573_v47 }
 0x392   : > { %v8774_v44 = vpop.f32.mrf.mxu0  ;;  %v9322_v39 = vpop.eup %9321 }
 0x393   : > { %v2585_v52 = vadd.f32 %v8774_v44, %v11171_v18  ;;  %9327 = vtanh.f32 %v2574_v33 }
 0x394   : > { %v9324_v57 = vpop.eup %9323  ;;  %v2576_v2 = vpop.f32.mrf.mxu0 }
 0x395   : > { %v9326_v58 = vpop.eup %9325  ;;  %v2577_v59 = vadd.f32 %v11171_v18, %v2576_v2  ;;  %v2646_v50 = vpack.c.bf16 %v9324_v57, %v9320_v51  ;;  %9329 = vtanh.f32 %v2585_v52 }
 0x396   : > { %v2647_v48 = vpack.c.bf16 %v9322_v39, %v9326_v58 }
 0x397   : > { %9331 = vtanh.f32 %v2577_v59  ;;  %8801 = vmatprep.mubr.msk.bf16.mxu1 %vm2666_vm3, %v2646_v50 }
 0x398   : > { %9333 = vtanh.f32 %v2582_v41  ;;  %8802 = vmatmul.mubr.msk.bf16.gmra.mxu1 %vm2666_vm3, %v2647_v48 }
 0x39e   : > { %v8777_v49 = vpop.f32.mrf.mxu0 }
 0x39f   : > { %v2598_v9 = vadd.f32 %v8777_v49, %v11171_v18 }
 0x3a0   : > { %v2589_v14 = vpop.f32.mrf.mxu0  ;;  %v9328_v1 = vpop.eup %9327 }
 0x3a1   : > { %v2590_v63 = vadd.f32 %v11171_v18, %v2589_v14 }
 0x3a2   : > { %v8778_v53 = vpop.f32.mrf.mxu0  ;;  %v9330_v3 = vpop.eup %9329 }
 0x3a3   : > { %v2601_v6 = vadd.f32 %v8778_v53, %v11171_v18  ;;  %9335 = vtanh.f32 %v2590_v63 }
 0x3a4   : > { %v9332_v60 = vpop.eup %9331  ;;  %v2592_v26 = vpop.f32.mrf.mxu0 }
 0x3a5   : > { %v9334_v11 = vpop.eup %9333  ;;  %v2593_v12 = vadd.f32 %v11171_v18, %v2592_v26  ;;  %v2648_v55 = vpack.c.bf16 %v9332_v60, %v9328_v1  ;;  %9337 = vtanh.f32 %v2601_v6  ;;  %v9066_v18 = vld [vmem:[%s12581_s11] sm:$0x3f]  }
 0x3a6   : > { %v2649_v13 = vpack.c.bf16 %v9330_v3, %v9334_v11  ;;  %8984 = vmatprep.subr.msk.bf16.mxu1 %vm2715_vm1, %v9066_v18  ;;  %v3383_v17 = vsel %vm2715_vm1, %v9066_v18, 0 }
 0x3a7   : > { %9339 = vtanh.f32 %v2593_v12  ;;  %8805 = vmatprep.mubr.msk.bf16.mxu1 %vm2666_vm3, %v2648_v55  ;;  %8862 = vmatpush3.bf16.msra.mxu1 %v3383_v17 }
 0x3a8   : > { %9341 = vtanh.f32 %v2598_v9  ;;  %8806 = vmatmul.mubr.msk.bf16.gmra.mxu1 %vm2666_vm3, %v2649_v13 }
 0x3b0   : > { %v9336_v15 = vpop.eup %9335 }
 0x3b2   : > { %v9338_v8 = vpop.eup %9337 }
 0x3b4   : > { %v9340_v40 = vpop.eup %9339 }
 0x3b5   : > { %v9342_v0 = vpop.eup %9341  ;;  %v2650_v62 = vpack.c.bf16 %v9340_v40, %v9336_v15 }
 0x3b6   : > { %v2651_v61 = vpack.c.bf16 %v9338_v8, %v9342_v0 }
 0x3b7   : > { %8809 = vmatprep.mubr.msk.bf16.mxu1 %vm2666_vm3, %v2650_v62 }
 0x3b8   : > { %8810 = vmatmul.mubr.msk.bf16.gmra.mxu1 %vm2666_vm3, %v2651_v61 }
 0x408   : > { %v8783_v23 = vpop.f32.mrf.mxu1 }
 0x409   : > { %v2762_v5 = vadd.f32 %v8783_v23, %v11253_v7 }
 0x40a   : > { %v2753_v10 = vpop.f32.mrf.mxu1 }
 0x40b   : > { %v2754_v25 = vadd.f32 %v11253_v7, %v2753_v10 }
 0x40c   : > { %v8784_v56 = vpop.f32.mrf.mxu1 }
 0x40d   : > { %v2765_v34 = vadd.f32 %v8784_v56, %v11253_v7 }
 0x40e   : > { %v2756_v24 = vpop.f32.mrf.mxu1 }
 0x40f   : > { %v2881_v22 = vpack.c.bf16 %v2765_v34, %v2762_v5  ;;  %v2757_v27 = vadd.f32 %v11253_v7, %v2756_v24 }
 0x411   : > { %8143 = vst [vmem:[%s11261_s19 + $0x8] sm:$0xff] %v2881_v22   ;;  %v2880_v4 = vpack.c.bf16 %v2757_v27, %v2754_v25 }
 0x413   : > { %8067 = vst [vmem:[%s11261_s19] sm:$0xff] %v2880_v4   ;;  %8829 = vmatprep.mubr.bf16.mxu0 %v2880_v4 }
 0x414   : > { %8830 = vmatmul.mubr.bf16.vlgmr.msra.gmra.mxu0 %v2881_v22 }
 0x418   : > { %v8787_v20 = vpop.f32.mrf.mxu1 }
 0x419   : > { %v2778_v19 = vadd.f32 %v8787_v20, %v11253_v7 }
 0x41a   : > { %v2769_v30 = vpop.f32.mrf.mxu1 }
 0x41b   : > { %v2770_v16 = vadd.f32 %v11253_v7, %v2769_v30 }
 0x41c   : > { %v8788_v32 = vpop.f32.mrf.mxu1 }
 0x41d   : > { %v2781_v21 = vadd.f32 %v8788_v32, %v11253_v7 }
 0x41e   : > { %v2772_v36 = vpop.f32.mrf.mxu1 }
 0x41f   : > { %v2883_v35 = vpack.c.bf16 %v2781_v21, %v2778_v19  ;;  %v2773_v37 = vadd.f32 %v11253_v7, %v2772_v36 }
 0x421   : > { %8145 = vst [vmem:[%s11261_s19 + $0x18] sm:$0xff] %v2883_v35   ;;  %v2882_v31 = vpack.c.bf16 %v2773_v37, %v2770_v16  ;;  %v11312_v37 = vld [vmem:[%s12580_s10] ss:$0 sm:$0xff] }
 0x423   : > { %8144 = vst [vmem:[%s11261_s19 + $0x10] sm:$0xff] %v2882_v31   ;;  %8833 = vmatprep.mubr.bf16.mxu0 %v2882_v31 }
 0x424   : > { %8834 = vmatmul.mubr.bf16.gmra.mxu0 %v2883_v35 }
 0x428   : > { %v8791_v42 = vpop.f32.mrf.mxu1 }
 0x429   : > { %v2794_v43 = vadd.f32 %v8791_v42, %v11253_v7 }
 0x42a   : > { %v2785_v38 = vpop.f32.mrf.mxu1 }
 0x42b   : > { %v2786_v46 = vadd.f32 %v11253_v7, %v2785_v38 }
 0x42c   : > { %v8792_v28 = vpop.f32.mrf.mxu1 }
 0x42d   : > { %v2797_v45 = vadd.f32 %v8792_v28, %v11253_v7 }
 0x42e   : > { %v2788_v29 = vpop.f32.mrf.mxu1 }
 0x42f   : > { %v2885_v54 = vpack.c.bf16 %v2797_v45, %v2794_v43  ;;  %v2789_v47 = vadd.f32 %v11253_v7, %v2788_v29  ;;  %v9067_v29 = vld [vmem:[%s12583_s13 + $0x18] sm:$0xff]  }
 0x430   : > { %8895 = vmatprep.subr.bf16.mxu0 %v9067_v29 }
 0x431   : > { %8147 = vst [vmem:[%s11261_s19 + $0x28] sm:$0xff] %v2885_v54   ;;  %v2884_v33 = vpack.c.bf16 %v2789_v47, %v2786_v46  ;;  %v9068_v46 = vld [vmem:[%s12583_s13 + $0x10] sm:$0xff]   ;;  %8896 = vmatpush3.bf16.msra.mxu0 %v9067_v29 }
 0x432   : > { %8897 = vmatprep.subr.bf16.mxu0 %v9068_v46 }
 0x433   : > { %8146 = vst [vmem:[%s11261_s19 + $0x20] sm:$0xff] %v2884_v33   ;;  %8837 = vmatprep.mubr.bf16.mxu0 %v2884_v33 }
 0x434   : > { %8838 = vmatmul.mubr.bf16.gmra.mxu0 %v2885_v54  ;;  %v9069_v54 = vld [vmem:[%s12583_s13 + $0x8] sm:$0xff]  }
 0x435   : > { %8898 = vmatpush3.bf16.msra.mxu0 %v9068_v46 }
 0x436   : > { %8899 = vmatprep.subr.bf16.mxu0 %v9069_v54 }
 0x438   : > { %v8795_v51 = vpop.f32.mrf.mxu1 }
 0x439   : > { %v2810_v52 = vadd.f32 %v8795_v51, %v11253_v7  ;;  %8900 = vmatpush3.bf16.msra.mxu0 %v9069_v54 }
 0x43a   : > { %v2801_v44 = vpop.f32.mrf.mxu1 }
 0x43b   : > { %v2802_v2 = vadd.f32 %v11253_v7, %v2801_v44 }
 0x43c   : > { %v8796_v39 = vpop.f32.mrf.mxu1 }
 0x43d   : > { %v2813_v57 = vadd.f32 %v8796_v39, %v11253_v7 }
 0x43e   : > { %v2804_v41 = vpop.f32.mrf.mxu1 }
 0x43f   : > { %v2887_v58 = vpack.c.bf16 %v2813_v57, %v2810_v52  ;;  %v2805_v59 = vadd.f32 %v11253_v7, %v2804_v41 }
 0x441   : > { %8149 = vst [vmem:[%s11261_s19 + $0x38] sm:$0xff] %v2887_v58   ;;  %v2886_v50 = vpack.c.bf16 %v2805_v59, %v2802_v2 }
 0x443   : > { %8148 = vst [vmem:[%s11261_s19 + $0x30] sm:$0xff] %v2886_v50   ;;  %8841 = vmatprep.mubr.bf16.mxu0 %v2886_v50 }
 0x444   : > { %8842 = vmatmul.mubr.bf16.gmra.mxu0 %v2887_v58 }
 0x448   : > { %v8799_v48 = vpop.f32.mrf.mxu1 }
 0x449   : > { %v2826_v63 = vadd.f32 %v8799_v48, %v11253_v7 }
 0x44a   : > { %v2817_v49 = vpop.f32.mrf.mxu1 }
 0x44b   : > { %v2818_v3 = vadd.f32 %v11253_v7, %v2817_v49 }
 0x44c   : > { %v8800_v14 = vpop.f32.mrf.mxu1 }
 0x44d   : > { %v2829_v1 = vadd.f32 %v8800_v14, %v11253_v7 }
 0x44e   : > { %v2820_v53 = vpop.f32.mrf.mxu1 }
 0x44f   : > { %v2889_v6 = vpack.c.bf16 %v2829_v1, %v2826_v63  ;;  %v2821_v60 = vadd.f32 %v11253_v7, %v2820_v53 }
 0x451   : > { %8151 = vst [vmem:[%s11261_s19 + $0x48] sm:$0xff] %v2889_v6   ;;  %v2888_v9 = vpack.c.bf16 %v2821_v60, %v2818_v3 }
 0x453   : > { %8150 = vst [vmem:[%s11261_s19 + $0x40] sm:$0xff] %v2888_v9   ;;  %8845 = vmatprep.mubr.bf16.mxu0 %v2888_v9 }
 0x454   : > { %8846 = vmatmul.mubr.bf16.gmra.mxu0 %v2889_v6 }
 0x458   : > { %v8803_v26 = vpop.f32.mrf.mxu1 }
 0x459   : > { %v2842_v55 = vadd.f32 %v8803_v26, %v11253_v7 }
 0x45a   : > { %v2833_v11 = vpop.f32.mrf.mxu1 }
 0x45b   : > { %v2834_v8 = vadd.f32 %v11253_v7, %v2833_v11 }
 0x45c   : > { %v8804_v12 = vpop.f32.mrf.mxu1 }
 0x45d   : > { %v2845_v13 = vadd.f32 %v8804_v12, %v11253_v7 }
 0x45e   : > { %v2836_v15 = vpop.f32.mrf.mxu1 }
 0x45f   : > { %v2891_v40 = vpack.c.bf16 %v2845_v13, %v2842_v55  ;;  %v2837_v0 = vadd.f32 %v11253_v7, %v2836_v15 }
 0x461   : > { %8153 = vst [vmem:[%s11261_s19 + $0x58] sm:$0xff] %v2891_v40   ;;  %v2890_v62 = vpack.c.bf16 %v2837_v0, %v2834_v8 }
 0x463   : > { %8152 = vst [vmem:[%s11261_s19 + $0x50] sm:$0xff] %v2890_v62   ;;  %8849 = vmatprep.mubr.bf16.mxu0 %v2890_v62 }
 0x464   : > { %8850 = vmatmul.mubr.bf16.gmra.mxu0 %v2891_v40 }
 0x468   : > { %v8807_v61 = vpop.f32.mrf.mxu1 }
 0x469   : > { %v2858_v23 = vadd.f32 %v8807_v61, %v11253_v7 }
 0x46a   : > { %v2849_v18 = vpop.f32.mrf.mxu1 }
 0x46b   : > { %v2850_v5 = vadd.f32 %v11253_v7, %v2849_v18 }
 0x46c   : > { %v8808_v17 = vpop.f32.mrf.mxu1 }
 0x46d   : > { %v2861_v10 = vadd.f32 %v8808_v17, %v11253_v7 }
 0x46e   : > { %v2852_v56 = vpop.f32.mrf.mxu1 }
 0x46f   : > { %v2893_v34 = vpack.c.bf16 %v2861_v10, %v2858_v23  ;;  %v2853_v24 = vadd.f32 %v11253_v7, %v2852_v56 }
 0x471   : > { %8155 = vst [vmem:[%s11261_s19 + $0x68] sm:$0xff] %v2893_v34   ;;  %v2892_v25 = vpack.c.bf16 %v2853_v24, %v2850_v5 }
 0x473   : > { %8154 = vst [vmem:[%s11261_s19 + $0x60] sm:$0xff] %v2892_v25   ;;  %8853 = vmatprep.mubr.bf16.mxu0 %v2892_v25 }
 0x474   : > { %8854 = vmatmul.mubr.bf16.gmra.mxu0 %v2893_v34 }
 0x478   : > { %v8811_v22 = vpop.f32.mrf.mxu1 }
 0x479   : > { %v2874_v20 = vadd.f32 %v8811_v22, %v11253_v7 }
 0x47a   : > { %v2865_v27 = vpop.f32.mrf.mxu1 }
 0x47b   : > { %v2866_v19 = vadd.f32 %v11253_v7, %v2865_v27 }
 0x47c   : > { %v8812_v4 = vpop.f32.mrf.mxu1 }
 0x47d   : > { %v2877_v30 = vadd.f32 %v8812_v4, %v11253_v7 }
 0x47e   : > { %v2868_v32 = vpop.f32.mrf.mxu1 }
 0x47f   : > { %v2895_v21 = vpack.c.bf16 %v2877_v30, %v2874_v20  ;;  %v2869_v36 = vadd.f32 %v11253_v7, %v2868_v32 }
 0x481   : > { %8157 = vst [vmem:[%s11261_s19 + $0x78] sm:$0xff] %v2895_v21   ;;  %v2894_v16 = vpack.c.bf16 %v2869_v36, %v2866_v19 }
 0x483   : > { %8156 = vst [vmem:[%s11261_s19 + $0x70] sm:$0xff] %v2894_v16   ;;  %8857 = vmatprep.mubr.bf16.mxu0 %v2894_v16 }
 0x484   : > { %8858 = vmatmul.mubr.bf16.gmra.mxu0 %v2895_v21 }
 0x4d4   : > { %v8831_v35 = vpop.f32.mrf.mxu0 }
 0x4d5   : > { %v3154_v43 = vadd.f32 %v8831_v35, %v11312_v37 }
 0x4d6   : > { %v3145_v31 = vpop.f32.mrf.mxu0 }
 0x4d7   : > { %v3146_v42 = vadd.f32 %v11312_v37, %v3145_v31 }
 0x4d8   : > { %v8832_v38 = vpop.f32.mrf.mxu0 }
 0x4d9   : > { %v3157_v28 = vadd.f32 %v8832_v38, %v11312_v37  ;;  %9343 = vtanh.f32 %v3146_v42 }
 0x4da   : > { %v3148_v7 = vpop.f32.mrf.mxu0 }
 0x4db   : > { %v3149_v45 = vadd.f32 %v11312_v37, %v3148_v7  ;;  %9345 = vtanh.f32 %v3157_v28 }
 0x4dd   : > { %9347 = vtanh.f32 %v3149_v45 }
 0x4de   : > { %9349 = vtanh.f32 %v3154_v43 }
 0x4e4   : > { %v8835_v47 = vpop.f32.mrf.mxu0 }
 0x4e5   : > { %v3170_v2 = vadd.f32 %v8835_v47, %v11312_v37 }
 0x4e6   : > { %v3161_v33 = vpop.f32.mrf.mxu0  ;;  %v9344_v44 = vpop.eup %9343 }
 0x4e7   : > { %v3162_v51 = vadd.f32 %v11312_v37, %v3161_v33 }
 0x4e8   : > { %v8836_v39 = vpop.f32.mrf.mxu0  ;;  %v9346_v52 = vpop.eup %9345 }
 0x4e9   : > { %v3173_v57 = vadd.f32 %v8836_v39, %v11312_v37  ;;  %9351 = vtanh.f32 %v3162_v51 }
 0x4ea   : > { %v9348_v41 = vpop.eup %9347  ;;  %v3164_v58 = vpop.f32.mrf.mxu0 }
 0x4eb   : > { %v9350_v59 = vpop.eup %9349  ;;  %v3165_v50 = vadd.f32 %v11312_v37, %v3164_v58  ;;  %v3304_v48 = vpack.c.bf16 %v9348_v41, %v9344_v44  ;;  %9353 = vtanh.f32 %v3173_v57 }
 0x4ec   : > { %v3305_v49 = vpack.c.bf16 %v9346_v52, %v9350_v59 }
 0x4ed   : > { %9355 = vtanh.f32 %v3165_v50  ;;  %8863 = vmatprep.mubr.msk.bf16.mxu1 %vm2666_vm3, %v3304_v48 }
 0x4ee   : > { %9357 = vtanh.f32 %v3170_v2  ;;  %8864 = vmatmul.mubr.msk.bf16.vlgmr.msra.gmra.mxu1 %vm2666_vm3, %v3305_v49 }
 0x4f4   : > { %v8839_v14 = vpop.f32.mrf.mxu0 }
 0x4f5   : > { %v3186_v26 = vadd.f32 %v8839_v14, %v11312_v37 }
 0x4f6   : > { %v3177_v63 = vpop.f32.mrf.mxu0  ;;  %v9352_v53 = vpop.eup %9351 }
 0x4f7   : > { %v3178_v1 = vadd.f32 %v11312_v37, %v3177_v63 }
 0x4f8   : > { %v8840_v3 = vpop.f32.mrf.mxu0  ;;  %v9354_v6 = vpop.eup %9353 }
 0x4f9   : > { %v3189_v60 = vadd.f32 %v8840_v3, %v11312_v37  ;;  %9359 = vtanh.f32 %v3178_v1 }
 0x4fa   : > { %v9356_v9 = vpop.eup %9355  ;;  %v3180_v11 = vpop.f32.mrf.mxu0 }
 0x4fb   : > { %v9358_v12 = vpop.eup %9357  ;;  %v3181_v55 = vadd.f32 %v11312_v37, %v3180_v11  ;;  %v3306_v13 = vpack.c.bf16 %v9356_v9, %v9352_v53  ;;  %9361 = vtanh.f32 %v3189_v60  ;;  %v9070_v9 = vld [vmem:[%s12583_s13] sm:$0xff]  }
 0x4fc   : > { %v3307_v15 = vpack.c.bf16 %v9354_v6, %v9358_v12  ;;  %8901 = vmatprep.subr.bf16.mxu0 %v9070_v9 }
 0x4fd   : > { %9363 = vtanh.f32 %v3181_v55  ;;  %8867 = vmatprep.mubr.msk.bf16.mxu1 %vm2666_vm3, %v3306_v13  ;;  %8902 = vmatpush3.bf16.msra.mxu0 %v9070_v9 }
 0x4fe   : > { %9365 = vtanh.f32 %v3186_v26  ;;  %8868 = vmatmul.mubr.msk.bf16.gmra.mxu1 %vm2666_vm3, %v3307_v15 }
 0x504   : > { %v8843_v8 = vpop.f32.mrf.mxu0 }
 0x505   : > { %v3202_v10 = vadd.f32 %v8843_v8, %v11312_v37 }
 0x506   : > { %v3193_v40 = vpop.f32.mrf.mxu0  ;;  %v9360_v62 = vpop.eup %9359 }
 0x507   : > { %v3194_v0 = vadd.f32 %v11312_v37, %v3193_v40 }
 0x508   : > { %v8844_v61 = vpop.f32.mrf.mxu0  ;;  %v9362_v18 = vpop.eup %9361 }
 0x509   : > { %v3205_v17 = vadd.f32 %v8844_v61, %v11312_v37  ;;  %9367 = vtanh.f32 %v3194_v0 }
 0x50a   : > { %v9364_v23 = vpop.eup %9363  ;;  %v3196_v56 = vpop.f32.mrf.mxu0 }
 0x50b   : > { %v9366_v5 = vpop.eup %9365  ;;  %v3197_v34 = vadd.f32 %v11312_v37, %v3196_v56  ;;  %v3308_v24 = vpack.c.bf16 %v9364_v23, %v9360_v62  ;;  %9369 = vtanh.f32 %v3205_v17 }
 0x50c   : > { %v3309_v25 = vpack.c.bf16 %v9362_v18, %v9366_v5 }
 0x50d   : > { %9371 = vtanh.f32 %v3197_v34  ;;  %8871 = vmatprep.mubr.msk.bf16.mxu1 %vm2666_vm3, %v3308_v24 }
 0x50e   : > { %9373 = vtanh.f32 %v3202_v10  ;;  %8872 = vmatmul.mubr.msk.bf16.gmra.mxu1 %vm2666_vm3, %v3309_v25 }
 0x514   : > { %v8847_v22 = vpop.f32.mrf.mxu0 }
 0x515   : > { %v3218_v36 = vadd.f32 %v8847_v22, %v11312_v37  ;;  %v11377_v22 = vld [vmem:[%s12582_s12] ss:$0 sm:$0xff] }
 0x516   : > { %v3209_v27 = vpop.f32.mrf.mxu0  ;;  %v9368_v20 = vpop.eup %9367 }
 0x517   : > { %v3210_v4 = vadd.f32 %v11312_v37, %v3209_v27 }
 0x518   : > { %v8848_v30 = vpop.f32.mrf.mxu0  ;;  %v9370_v32 = vpop.eup %9369 }
 0x519   : > { %v3221_v19 = vadd.f32 %v8848_v30, %v11312_v37  ;;  %9375 = vtanh.f32 %v3210_v4 }
 0x51a   : > { %v9372_v21 = vpop.eup %9371  ;;  %v3212_v16 = vpop.f32.mrf.mxu0 }
 0x51b   : > { %v9374_v35 = vpop.eup %9373  ;;  %v3213_v31 = vadd.f32 %v11312_v37, %v3212_v16  ;;  %v3310_v42 = vpack.c.bf16 %v9372_v21, %v9368_v20  ;;  %9377 = vtanh.f32 %v3221_v19  ;;  %v9073_v16 = vld [vmem:[%s12585_s15 + $0x18c] ss:$28 sps:$4 sm:$0xff]  }
 0x51c   : > { %v3311_v38 = vpack.c.bf16 %v9370_v32, %v9374_v35  ;;  %v9076_v35 = vld [vmem:[%s12585_s15 + $0x154] ss:$28 sps:$4 sm:$0xff]   ;;  %4279 = vmatprep.subr.bf16.mxu1 %v9073_v16 }
 0x51d   : > { %9379 = vtanh.f32 %v3213_v31  ;;  %8875 = vmatprep.mubr.msk.bf16.mxu1 %vm2666_vm3, %v3310_v42  ;;  %v9074_v31 = vld [vmem:[%s12585_s15 + $0x150] ss:$28 sps:$4 sm:$0xff]  }
 0x51e   : > { %9381 = vtanh.f32 %v3218_v36  ;;  %8876 = vmatmul.mubr.msk.bf16.gmra.mxu1 %vm2666_vm3, %v3311_v38  ;;  %v9071_v36 = vld [vmem:[%s12585_s15 + $0x188] ss:$28 sps:$4 sm:$0xff]   ;;  %v9088_v42 = vld [vmem:[%s12585_s15 + $0x194] ss:$28 sps:$4 sm:$0xff]   ;;  %v9079_v38 = vld [vmem:[%s12585_s15 + $0x11c] ss:$28 sps:$4 sm:$0xff]  }
 0x51f   : > { %4280 = vmatpush1.bf16.msra.mxu1 %v9071_v36  ;;  %4472 = vmatprep.subr.bf16.mxu0 %v9088_v42 }
 0x520   : > { %4281 = vmatprep.subr.bf16.mxu1 %v9076_v35 }
 0x523   : > { %4282 = vmatpush1.bf16.msra.mxu1 %v9074_v31 }
 0x524   : > { %v8851_v28 = vpop.f32.mrf.mxu0  ;;  %4283 = vmatprep.subr.bf16.mxu1 %v9079_v38 }
 0x525   : > { %v3234_v33 = vadd.f32 %v8851_v28, %v11312_v37 }
 0x526   : > { %v3225_v43 = vpop.f32.mrf.mxu0  ;;  %v9376_v45 = vpop.eup %9375 }
 0x527   : > { %v3226_v7 = vadd.f32 %v11312_v37, %v3225_v43  ;;  %v9077_v43 = vld [vmem:[%s12585_s15 + $0x118] ss:$28 sps:$4 sm:$0xff]  }
 0x528   : > { %v8852_v29 = vpop.f32.mrf.mxu0  ;;  %v9378_v46 = vpop.eup %9377  ;;  %4284 = vmatpush1.bf16.msra.mxu1 %v9077_v43 }
 0x529   : > { %v3237_v54 = vadd.f32 %v8852_v29, %v11312_v37  ;;  %9383 = vtanh.f32 %v3226_v7 }
 0x52a   : > { %v9380_v47 = vpop.eup %9379  ;;  %v3228_v51 = vpop.f32.mrf.mxu0 }
 0x52b   : > { %v9382_v44 = vpop.eup %9381  ;;  %v3229_v39 = vadd.f32 %v11312_v37, %v3228_v51  ;;  %v3312_v52 = vpack.c.bf16 %v9380_v47, %v9376_v45  ;;  %9385 = vtanh.f32 %v3237_v54  ;;  %v9082_v45 = vld [vmem:[%s12585_s15 + $0xe4] ss:$28 sps:$4 sm:$0xff]  }
 0x52c   : > { %v3313_v57 = vpack.c.bf16 %v9378_v46, %v9382_v44  ;;  %v9080_v51 = vld [vmem:[%s12585_s15 + $0xe0] ss:$28 sps:$4 sm:$0xff]   ;;  %4285 = vmatprep.subr.bf16.mxu1 %v9082_v45 }
 0x52d   : > { %9387 = vtanh.f32 %v3229_v39  ;;  %8879 = vmatprep.mubr.msk.bf16.mxu1 %vm2666_vm3, %v3312_v52  ;;  %4286 = vmatpush1.bf16.msra.mxu1 %v9080_v51 }
 0x52e   : > { %9389 = vtanh.f32 %v3234_v33  ;;  %8880 = vmatmul.mubr.msk.bf16.gmra.mxu1 %vm2666_vm3, %v3313_v57  ;;  %v9085_v57 = vld [vmem:[%s12585_s15 + $0xac] ss:$28 sps:$4 sm:$0xff]  }
 0x52f   : > { %4287 = vmatprep.subr.bf16.mxu1 %v9085_v57 }
 0x534   : > { %v8855_v41 = vpop.f32.mrf.mxu0 }
 0x535   : > { %v3250_v63 = vadd.f32 %v8855_v41, %v11312_v37 }
 0x536   : > { %v3241_v2 = vpop.f32.mrf.mxu0  ;;  %v9384_v59 = vpop.eup %9383 }
 0x537   : > { %v3242_v58 = vadd.f32 %v11312_v37, %v3241_v2 }
 0x538   : > { %v8856_v50 = vpop.f32.mrf.mxu0  ;;  %v9386_v48 = vpop.eup %9385 }
 0x539   : > { %v3253_v49 = vadd.f32 %v8856_v50, %v11312_v37  ;;  %9391 = vtanh.f32 %v3242_v58 }
 0x53a   : > { %v9388_v14 = vpop.eup %9387  ;;  %v3244_v1 = vpop.f32.mrf.mxu0 }
 0x53b   : > { %v9390_v53 = vpop.eup %9389  ;;  %v3245_v3 = vadd.f32 %v11312_v37, %v3244_v1  ;;  %v3314_v6 = vpack.c.bf16 %v9388_v14, %v9384_v59  ;;  %9393 = vtanh.f32 %v3253_v49  ;;  %v9086_v59 = vld [vmem:[%s12585_s15 + $0x190] ss:$28 sps:$4 sm:$0xff]   ;;  %v9083_v49 = vld [vmem:[%s12585_s15 + $0xa8] ss:$28 sps:$4 sm:$0xff]   ;;  %v9089_v14 = vld [vmem:[%s12585_s15 + $0x158] ss:$28 sps:$4 sm:$0xff]  }
 0x53c   : > { %v3315_v60 = vpack.c.bf16 %v9386_v48, %v9390_v53  ;;  %v9091_v48 = vld [vmem:[%s12585_s15 + $0x15c] ss:$28 sps:$4 sm:$0xff]   ;;  %4288 = vmatpush1.bf16.msra.mxu1 %v9083_v49  ;;  %v9098_v49 = vld [vmem:[%s12585_s15 + $0xe8] ss:$28 sps:$4 sm:$0xff]  }
 0x53d   : > { %9395 = vtanh.f32 %v3245_v3  ;;  %8883 = vmatprep.mubr.msk.bf16.mxu1 %vm2666_vm3, %v3314_v6 }
 0x53e   : > { %9397 = vtanh.f32 %v3250_v63  ;;  %8884 = vmatmul.mubr.msk.bf16.gmra.mxu1 %vm2666_vm3, %v3315_v60 }
 0x544   : > { %v8859_v26 = vpop.f32.mrf.mxu0 }
 0x545   : > { %v3266_v0 = vadd.f32 %v8859_v26, %v11312_v37 }
 0x546   : > { %v3257_v11 = vpop.f32.mrf.mxu0  ;;  %v9392_v55 = vpop.eup %9391 }
 0x547   : > { %v3258_v12 = vadd.f32 %v11312_v37, %v3257_v11 }
 0x548   : > { %v8860_v13 = vpop.f32.mrf.mxu0  ;;  %v9394_v15 = vpop.eup %9393 }
 0x549   : > { %v3269_v8 = vadd.f32 %v8860_v13, %v11312_v37  ;;  %9399 = vtanh.f32 %v3258_v12 }
 0x54a   : > { %v9396_v40 = vpop.eup %9395  ;;  %v3260_v62 = vpop.f32.mrf.mxu0 }
 0x54b   : > { %v9398_v61 = vpop.eup %9397  ;;  %v3261_v18 = vadd.f32 %v11312_v37, %v3260_v62  ;;  %v3316_v17 = vpack.c.bf16 %v9396_v40, %v9392_v55  ;;  %9401 = vtanh.f32 %v3269_v8 }
 0x54c   : > { %v3317_v23 = vpack.c.bf16 %v9394_v15, %v9398_v61 }
 0x54d   : > { %9403 = vtanh.f32 %v3261_v18  ;;  %8887 = vmatprep.mubr.msk.bf16.mxu1 %vm2666_vm3, %v3316_v17 }
 0x54e   : > { %9405 = vtanh.f32 %v3266_v0  ;;  %8888 = vmatmul.mubr.msk.bf16.gmra.mxu1 %vm2666_vm3, %v3317_v23 }
 0x556   : > { %v9400_v10 = vpop.eup %9399 }
 0x558   : > { %v9402_v56 = vpop.eup %9401 }
 0x55a   : > { %v9404_v5 = vpop.eup %9403 }
 0x55b   : > { %v9406_v34 = vpop.eup %9405  ;;  %v3318_v24 = vpack.c.bf16 %v9404_v5, %v9400_v10 }
 0x55c   : > { %v3319_v25 = vpack.c.bf16 %v9402_v56, %v9406_v34 }
 0x55d   : > { %8891 = vmatprep.mubr.msk.bf16.mxu1 %vm2666_vm3, %v3318_v24 }
 0x55e   : > { %8892 = vmatmul.mubr.msk.bf16.gmra.mxu1 %vm2666_vm3, %v3319_v25 }
 0x5ae   : > { %v8865_v37 = vpop.f32.mrf.mxu1 }
 0x5af   : > { %v3428_v32 = vadd.f32 %v8865_v37, %v11377_v22 }
 0x5b0   : > { %v3419_v27 = vpop.f32.mrf.mxu1 }
 0x5b1   : > { %v3420_v4 = vadd.f32 %v11377_v22, %v3419_v27 }
 0x5b2   : > { %v8866_v20 = vpop.f32.mrf.mxu1 }
 0x5b3   : > { %v3431_v30 = vadd.f32 %v8866_v20, %v11377_v22  ;;  %9407 = vtanh.f32 %v3420_v4 }
 0x5b4   : > { %v3422_v19 = vpop.f32.mrf.mxu1 }
 0x5b5   : > { %v3423_v21 = vadd.f32 %v11377_v22, %v3422_v19  ;;  %9409 = vtanh.f32 %v3431_v30 }
 0x5b7   : > { %9411 = vtanh.f32 %v3423_v21 }
 0x5b8   : > { %9413 = vtanh.f32 %v3428_v32 }
 0x5be   : > { %v8869_v28 = vpop.f32.mrf.mxu1 }
 0x5bf   : > { %v3444_v39 = vadd.f32 %v8869_v28, %v11377_v22 }
 0x5c0   : > { %v3435_v7 = vpop.f32.mrf.mxu1  ;;  %v9408_v46 = vpop.eup %9407 }
 0x5c1   : > { %v3436_v29 = vadd.f32 %v11377_v22, %v3435_v7 }
 0x5c2   : > { %v8870_v54 = vpop.f32.mrf.mxu1  ;;  %v9410_v47 = vpop.eup %9409 }
 0x5c3   : > { %v3447_v33 = vadd.f32 %v8870_v54, %v11377_v22  ;;  %9415 = vtanh.f32 %v3436_v29 }
 0x5c4   : > { %v9412_v44 = vpop.eup %9411  ;;  %v3438_v52 = vpop.f32.mrf.mxu1 }
 0x5c5   : > { %v9414_v41 = vpop.eup %9413  ;;  %v3439_v2 = vadd.f32 %v11377_v22, %v3438_v52  ;;  %v3578_v58 = vpack.c.bf16 %v9412_v44, %v9408_v46  ;;  %9417 = vtanh.f32 %v3447_v33 }
 0x5c6   : > { %v3579_v50 = vpack.c.bf16 %v9410_v47, %v9414_v41 }
 0x5c7   : > { %9419 = vtanh.f32 %v3439_v2  ;;  %8903 = vmatprep.mubr.msk.bf16.mxu0 %vm2394_vm2, %v3578_v58  ;;  %v9097_v2 = vld [vmem:[%s12585_s15 + $0x124] ss:$28 sps:$4 sm:$0xff]  }
 0x5c8   : > { %9421 = vtanh.f32 %v3444_v39  ;;  %8904 = vmatmul.mubr.msk.bf16.vlgmr.msra.gmra.mxu0 %vm2394_vm2, %v3579_v50  ;;  %v9095_v58 = vld [vmem:[%s12585_s15 + $0x120] ss:$28 sps:$4 sm:$0xff]   ;;  %v9094_v50 = vld [vmem:[%s12585_s15 + $0x74] ss:$28 sps:$4 sm:$0xff]  }
 0x5c9   : > { %4473 = vmatpush1.bf16.msra.mxu0 %v9086_v59  ;;  %v9092_v59 = vld [vmem:[%s12585_s15 + $0x70] ss:$28 sps:$4 sm:$0xff]   ;;  %4289 = vmatprep.subr.bf16.mxu1 %v9094_v50 }
 0x5ca   : > { %4474 = vmatprep.subr.bf16.mxu0 %v9091_v48  ;;  %v9100_v48 = vld [vmem:[%s12585_s15 + $0xec] ss:$28 sps:$4 sm:$0xff]   ;;  %4290 = vmatpush1.bf16.msra.mxu1 %v9092_v59 }
 0x5cd   : > { %4475 = vmatpush1.bf16.msra.mxu0 %v9089_v14 }
 0x5ce   : > { %v8873_v63 = vpop.f32.mrf.mxu1  ;;  %4476 = vmatprep.subr.bf16.mxu0 %v9097_v2 }
 0x5cf   : > { %v3460_v11 = vadd.f32 %v8873_v63, %v11377_v22 }
 0x5d0   : > { %v3451_v1 = vpop.f32.mrf.mxu1  ;;  %v9416_v3 = vpop.eup %9415 }
 0x5d1   : > { %v3452_v53 = vadd.f32 %v11377_v22, %v3451_v1  ;;  %4477 = vmatpush1.bf16.msra.mxu0 %v9095_v58  ;;  %v9106_v1 = vld [vmem:[%s12585_s15 + $0xb4] ss:$28 sps:$4 sm:$0xff]  }
 0x5d2   : > { %v8874_v6 = vpop.f32.mrf.mxu1  ;;  %v9418_v60 = vpop.eup %9417  ;;  %4478 = vmatprep.subr.bf16.mxu0 %v9100_v48 }
 0x5d3   : > { %v3463_v9 = vadd.f32 %v8874_v6, %v11377_v22  ;;  %9423 = vtanh.f32 %v3452_v53 }
 0x5d4   : > { %v9420_v26 = vpop.eup %9419  ;;  %v3454_v12 = vpop.f32.mrf.mxu1 }
 0x5d5   : > { %v9422_v55 = vpop.eup %9421  ;;  %v3455_v13 = vadd.f32 %v11377_v22, %v3454_v12  ;;  %v3580_v15 = vpack.c.bf16 %v9420_v26, %v9416_v3  ;;  %9425 = vtanh.f32 %v3463_v9  ;;  %4479 = vmatpush1.bf16.msra.mxu0 %v9098_v49  ;;  %v9104_v3 = vld [vmem:[%s12585_s15 + $0xb0] ss:$28 sps:$4 sm:$0xff]  }
 0x5d6   : > { %v3581_v8 = vpack.c.bf16 %v9418_v60, %v9422_v55  ;;  %4480 = vmatprep.subr.bf16.mxu0 %v9106_v1 }
 0x5d7   : > { %9427 = vtanh.f32 %v3455_v13  ;;  %8907 = vmatprep.mubr.msk.bf16.mxu0 %vm2394_vm2, %v3580_v15  ;;  %v9109_v13 = vld [vmem:[%s12585_s15 + $0x7c] ss:$28 sps:$4 sm:$0xff]  }
 0x5d8   : > { %9429 = vtanh.f32 %v3460_v11  ;;  %8908 = vmatmul.mubr.msk.bf16.gmra.mxu0 %vm2394_vm2, %v3581_v8 }
 0x5d9   : > { %4481 = vmatpush1.bf16.msra.mxu0 %v9104_v3  ;;  %v9124_v3 = vld [vmem:[%s12585_s15 + $0x164] ss:$28 sps:$4 sm:$0xff]  }
 0x5da   : > { %4482 = vmatprep.subr.bf16.mxu0 %v9109_v13 }
 0x5de   : > { %v8877_v40 = vpop.f32.mrf.mxu1 }
 0x5df   : > { %v3476_v56 = vadd.f32 %v8877_v40, %v11377_v22 }
 0x5e0   : > { %v3467_v0 = vpop.f32.mrf.mxu1  ;;  %v9424_v61 = vpop.eup %9423 }
 0x5e1   : > { %v3468_v62 = vadd.f32 %v11377_v22, %v3467_v0  ;;  %v9107_v0 = vld [vmem:[%s12585_s15 + $0x78] ss:$28 sps:$4 sm:$0xff]  }
 0x5e2   : > { %v8878_v18 = vpop.f32.mrf.mxu1  ;;  %v9426_v17 = vpop.eup %9425  ;;  %4483 = vmatpush1.bf16.msra.mxu0 %v9107_v0  ;;  %v9130_v0 = vld [vmem:[%s12585_s15 + $0xf4] ss:$28 sps:$4 sm:$0xff]  }
 0x5e3   : > { %v3479_v23 = vadd.f32 %v8878_v18, %v11377_v22  ;;  %9431 = vtanh.f32 %v3468_v62  ;;  %v9115_v18 = vld [vmem:[%s12585_s15 + $0x44] ss:$28 sps:$4 sm:$0xff]  }
 0x5e4   : > { %v9428_v10 = vpop.eup %9427  ;;  %v3470_v5 = vpop.f32.mrf.mxu1  ;;  %4484 = vmatprep.subr.bf16.mxu0 %v9115_v18  ;;  %v9128_v18 = vld [vmem:[%s12585_s15 + $0xf0] ss:$28 sps:$4 sm:$0xff]  }
 0x5e5   : > { %v9430_v34 = vpop.eup %9429  ;;  %v3471_v24 = vadd.f32 %v11377_v22, %v3470_v5  ;;  %v3582_v25 = vpack.c.bf16 %v9428_v10, %v9424_v61  ;;  %9433 = vtanh.f32 %v3479_v23  ;;  %v9103_v61 = vld [vmem:[%s12585_s15 + $0x3c] ss:$28 sps:$4 sm:$0xff]   ;;  %v9112_v10 = vld [vmem:[%s12585_s15 + $0x4] ss:$28 sps:$4 sm:$0xff]  }
 0x5e6   : > { %v3583_v37 = vpack.c.bf16 %v9426_v17, %v9430_v34  ;;  %v9101_v17 = vld [vmem:[%s12585_s15 + $0x38] ss:$28 sps:$4 sm:$0xff]   ;;  %v9113_v23 = vld [vmem:[%s12585_s15 + $0x40] ss:$28 sps:$4 sm:$0xff]   ;;  %4291 = vmatprep.subr.bf16.mxu1 %v9103_v61  ;;  %v9116_v34 = vld [vmem:[%s12585_s15 + $0x8] ss:$28 sps:$4 sm:$0xff]  }
 0x5e7   : > { %9435 = vtanh.f32 %v3471_v24  ;;  %8911 = vmatprep.mubr.msk.bf16.mxu0 %vm2394_vm2, %v3582_v25  ;;  %4292 = vmatpush1.bf16.msra.mxu1 %v9101_v17  ;;  %v9110_v5 = vld [vmem:[%s12585_s15] ss:$28 sps:$4 sm:$0xff]  }
 0x5e8   : > { %9437 = vtanh.f32 %v3476_v56  ;;  %8912 = vmatmul.mubr.msk.bf16.gmra.mxu0 %vm2394_vm2, %v3583_v37  ;;  %v9118_v56 = vld [vmem:[%s12585_s15 + $0xc] ss:$28 sps:$4 sm:$0xff]   ;;  %4293 = vmatprep.subr.bf16.mxu1 %v9112_v10  ;;  %v9133_v10 = vld [vmem:[%s12585_s15 + $0xbc] ss:$28 sps:$4 sm:$0xff]  }
 0x5e9   : > { %4485 = vmatpush1.bf16.msra.mxu0 %v9113_v23 }
 0x5ea   : > { %4486 = vmatprep.subr.bf16.mxu0 %v9118_v56 }
 0x5eb   : > { %4294 = vmatpush1.bf16.msra.mxu1 %v9110_v5 }
 0x5ed   : > { %4487 = vmatpush1.bf16.msra.mxu0 %v9116_v34 }
 0x5ee   : > { %v8881_v27 = vpop.f32.mrf.mxu1 }
 0x5ef   : > { %v3492_v16 = vadd.f32 %v8881_v27, %v11377_v22  ;;  %v10440_v27 = vmov 0  }
 0x5f0   : > { %v3483_v4 = vpop.f32.mrf.mxu1  ;;  %v9432_v30 = vpop.eup %9431  ;;  %4311 = vmatprep.mubr.bf16.mxu1 %v10440_v27 }
 0x5f1   : > { %v3484_v20 = vadd.f32 %v11377_v22, %v3483_v4  ;;  %v9121_v4 = vld [vmem:[%s12585_s15 + $0x19c] ss:$28 sps:$4 sm:$0xff]  }
 0x5f2   : > { %v8882_v32 = vpop.f32.mrf.mxu1  ;;  %v9434_v19 = vpop.eup %9433  ;;  %4665 = vmatprep.subr.bf16.mxu1 %v9121_v4  ;;  %v9147_v4 = vld [vmem:[%s12585_s15 + $0xc0] ss:$28 sps:$4 sm:$0xff]  }
 0x5f3   : > { %v3495_v21 = vadd.f32 %v8882_v32, %v11377_v22  ;;  %9439 = vtanh.f32 %v3484_v20 }
 0x5f4   : > { %v9436_v36 = vpop.eup %9435  ;;  %v3486_v35 = vpop.f32.mrf.mxu1 }
 0x5f5   : > { %v9438_v31 = vpop.eup %9437  ;;  %v3487_v42 = vadd.f32 %v11377_v22, %v3486_v35  ;;  %v3584_v38 = vpack.c.bf16 %v9436_v36, %v9432_v30  ;;  %9441 = vtanh.f32 %v3495_v21 }
 0x5f6   : > { %v3585_v28 = vpack.c.bf16 %v9434_v19, %v9438_v31 }
 0x5f7   : > { %9443 = vtanh.f32 %v3487_v42  ;;  %8915 = vmatprep.mubr.msk.bf16.mxu0 %vm2394_vm2, %v3584_v38 }
 0x5f8   : > { %9445 = vtanh.f32 %v3492_v16  ;;  %8916 = vmatmul.mubr.msk.bf16.gmra.mxu0 %vm2394_vm2, %v3585_v28 }
 0x5fe   : > { %v8885_v43 = vpop.f32.mrf.mxu1 }
 0x5ff   : > { %v3508_v51 = vadd.f32 %v8885_v43, %v11377_v22 }
 0x600   : > { %v3499_v7 = vpop.f32.mrf.mxu1  ;;  %v9440_v29 = vpop.eup %9439 }
 0x601   : > { %v3500_v45 = vadd.f32 %v11377_v22, %v3499_v7 }
 0x602   : > { %v8886_v46 = vpop.f32.mrf.mxu1  ;;  %v9442_v54 = vpop.eup %9441 }
 0x603   : > { %v3511_v47 = vadd.f32 %v8886_v46, %v11377_v22  ;;  %9447 = vtanh.f32 %v3500_v45 }
 0x604   : > { %v9444_v33 = vpop.eup %9443  ;;  %v3502_v44 = vpop.f32.mrf.mxu1 }
 0x605   : > { %v9446_v39 = vpop.eup %9445  ;;  %v3503_v52 = vadd.f32 %v11377_v22, %v3502_v44  ;;  %v3586_v57 = vpack.c.bf16 %v9444_v33, %v9440_v29  ;;  %9449 = vtanh.f32 %v3511_v47  ;;  %v11534_v33 = vld [vmem:[%s12584_s14] ss:$0 sm:$0xff] }
 0x606   : > { %v3587_v41 = vpack.c.bf16 %v9442_v54, %v9446_v39 }
 0x607   : > { %9451 = vtanh.f32 %v3503_v52  ;;  %8919 = vmatprep.mubr.msk.bf16.mxu0 %vm2394_vm2, %v3586_v57 }
 0x608   : > { %9453 = vtanh.f32 %v3508_v51  ;;  %8920 = vmatmul.mubr.msk.bf16.gmra.mxu0 %vm2394_vm2, %v3587_v41 }
 0x60e   : > { %v8889_v14 = vpop.f32.mrf.mxu1 }
 0x60f   : > { %v3524_v12 = vadd.f32 %v8889_v14, %v11377_v22 }
 0x610   : > { %v3515_v63 = vpop.f32.mrf.mxu1  ;;  %v9448_v6 = vpop.eup %9447 }
 0x611   : > { %v3516_v53 = vadd.f32 %v11377_v22, %v3515_v63  ;;  %v9119_v63 = vld [vmem:[%s12585_s15 + $0x198] ss:$28 sps:$4 sm:$0xff]  }
 0x612   : > { %v8890_v60 = vpop.f32.mrf.mxu1  ;;  %v9450_v9 = vpop.eup %9449 }
 0x613   : > { %v3527_v26 = vadd.f32 %v8890_v60, %v11377_v22  ;;  %9455 = vtanh.f32 %v3516_v53  ;;  %v9122_v60 = vld [vmem:[%s12585_s15 + $0x160] ss:$28 sps:$4 sm:$0xff]  }
 0x614   : > { %v9452_v11 = vpop.eup %9451  ;;  %v3518_v55 = vpop.f32.mrf.mxu1 }
 0x615   : > { %v9454_v15 = vpop.eup %9453  ;;  %v3519_v8 = vadd.f32 %v11377_v22, %v3518_v55  ;;  %v3588_v40 = vpack.c.bf16 %v9452_v11, %v9448_v6  ;;  %9457 = vtanh.f32 %v3527_v26  ;;  %v9138_v6 = vld [vmem:[%s12585_s15 + $0x168] ss:$28 sps:$4 sm:$0xff]  }
 0x616   : > { %v3589_v62 = vpack.c.bf16 %v9450_v9, %v9454_v15  ;;  %v9127_v26 = vld [vmem:[%s12585_s15 + $0x12c] ss:$28 sps:$4 sm:$0xff]  }
 0x617   : > { %9459 = vtanh.f32 %v3519_v8  ;;  %8923 = vmatprep.mubr.msk.bf16.mxu0 %vm2394_vm2, %v3588_v40  ;;  %v9125_v15 = vld [vmem:[%s12585_s15 + $0x128] ss:$28 sps:$4 sm:$0xff]   ;;  %v9142_v8 = vld [vmem:[%s12585_s15 + $0x130] ss:$28 sps:$4 sm:$0xff]  }
 0x618   : > { %9461 = vtanh.f32 %v3524_v12  ;;  %8924 = vmatmul.mubr.msk.bf16.gmra.mxu0 %vm2394_vm2, %v3589_v62  ;;  %v9143_v62 = vld [vmem:[%s12585_s15 + $0xf8] ss:$28 sps:$4 sm:$0xff]  }
 0x61e   : > { %v8893_v24 = vpop.f32.mrf.mxu1 }
 0x61f   : > { %v3540_v36 = vadd.f32 %v8893_v24, %v11377_v22 }
 0x620   : > { %v3531_v25 = vpop.f32.mrf.mxu1  ;;  %v9456_v20 = vpop.eup %9455 }
 0x621   : > { %v3532_v37 = vadd.f32 %v11377_v22, %v3531_v25 }
 0x622   : > { %v8894_v30 = vpop.f32.mrf.mxu1  ;;  %v9458_v32 = vpop.eup %9457 }
 0x623   : > { %v3543_v19 = vadd.f32 %v8894_v30, %v11377_v22  ;;  %9463 = vtanh.f32 %v3532_v37  ;;  %v9131_v37 = vld [vmem:[%s12585_s15 + $0xb8] ss:$28 sps:$4 sm:$0xff]   ;;  %v9148_v30 = vld [vmem:[%s12585_s15 + $0x88] ss:$28 sps:$4 sm:$0xff]  }
 0x624   : > { %v9460_v21 = vpop.eup %9459  ;;  %v3534_v16 = vpop.f32.mrf.mxu1 }
 0x625   : > { %v9462_v35 = vpop.eup %9461  ;;  %v3535_v31 = vadd.f32 %v11377_v22, %v3534_v16  ;;  %v3590_v42 = vpack.c.bf16 %v9460_v21, %v9456_v20  ;;  %9465 = vtanh.f32 %v3543_v19  ;;  %v9134_v22 = vld [vmem:[%s12585_s15 + $0x1a0] ss:$28 sps:$4 sm:$0xff]  }
 0x626   : > { %v3591_v38 = vpack.c.bf16 %v9458_v32, %v9462_v35  ;;  %8935 = vmatprep.subr.bf16.mxu0 %v9134_v22  ;;  %v9137_v20 = vld [vmem:[%s12585_s15 + $0x84] ss:$28 sps:$4 sm:$0xff]  }
 0x627   : > { %9467 = vtanh.f32 %v3535_v31  ;;  %8927 = vmatprep.mubr.msk.bf16.mxu0 %vm2394_vm2, %v3590_v42  ;;  %v9135_v19 = vld [vmem:[%s12585_s15 + $0x80] ss:$28 sps:$4 sm:$0xff]   ;;  %v9139_v42 = vld [vmem:[%s12585_s15 + $0x48] ss:$28 sps:$4 sm:$0xff]  }
 0x628   : > { %9469 = vtanh.f32 %v3540_v36  ;;  %8928 = vmatmul.mubr.msk.bf16.gmra.mxu0 %vm2394_vm2, %v3591_v38  ;;  %v9141_v36 = vld [vmem:[%s12585_s15 + $0x4c] ss:$28 sps:$4 sm:$0xff]  }
 0x629   : > { %v9149_v38 = vld [vmem:[%s12585_s15 + $0x50] ss:$28 sps:$4 sm:$0xff]  }
 0x630   : > { %v9464_v28 = vpop.eup %9463 }
 0x632   : > { %v9466_v43 = vpop.eup %9465 }
 0x634   : > { %v9468_v7 = vpop.eup %9467 }
 0x635   : > { %v9470_v45 = vpop.eup %9469  ;;  %v3592_v29 = vpack.c.bf16 %v9468_v7, %v9464_v28  ;;  %v9150_v7 = vld [vmem:[%s12585_s15 + $0x18] ss:$28 sps:$4 sm:$0xff]  }
 0x636   : > { %v3593_v46 = vpack.c.bf16 %v9466_v43, %v9470_v45  ;;  %v9146_v43 = vld [vmem:[%s12585_s15 + $0x14] ss:$28 sps:$4 sm:$0xff]  }
 0x637   : > { %8931 = vmatprep.mubr.msk.bf16.mxu0 %vm2394_vm2, %v3592_v29  ;;  %v9144_v29 = vld [vmem:[%s12585_s15 + $0x10] ss:$28 sps:$4 sm:$0xff]  }
 0x638   : > { %8932 = vmatmul.mubr.msk.bf16.gmra.mxu0 %vm2394_vm2, %v3593_v46 }
 0x639   : > { %4504 = vmatprep.mubr.bf16.mxu0 %v10440_v27 }
 0x688   : > { %v8905_v54 = vpop.f32.mrf.mxu0 }
 0x689   : > { %v3724_v41 = vadd.f32 %v8905_v54, %v11534_v33 }
 0x68a   : > { %v3715_v47 = vpop.f32.mrf.mxu0 }
 0x68b   : > { %v3716_v51 = vadd.f32 %v11534_v33, %v3715_v47 }
 0x68c   : > { %v8906_v44 = vpop.f32.mrf.mxu0 }
 0x68d   : > { %9471 = vtanh.f32 %v3716_v51  ;;  %v3727_v57 = vadd.f32 %v8906_v44, %v11534_v33 }
 0x68e   : > { %v3718_v39 = vpop.f32.mrf.mxu0 }
 0x68f   : > { %v3719_v52 = vadd.f32 %v11534_v33, %v3718_v39 }
 0x691   : > { %9473 = vtanh.f32 %v3719_v52 }
 0x692   : > { %9475 = vtanh.f32 %v3727_v57 }
 0x693   : > { %9477 = vtanh.f32 %v3724_v41 }
 0x698   : > { %v8909_v2 = vpop.f32.mrf.mxu0 }
 0x699   : > { %v3740_v12 = vadd.f32 %v8909_v2, %v11534_v33 }
 0x69a   : > { %v3731_v58 = vpop.f32.mrf.mxu0  ;;  %v9472_v48 = vpop.eup %9471 }
 0x69b   : > { %v3732_v59 = vadd.f32 %v11534_v33, %v3731_v58 }
 0x69c   : > { %v8910_v50 = vpop.f32.mrf.mxu0 }
 0x69d   : > { %9479 = vtanh.f32 %v3732_v59  ;;  %v3743_v9 = vadd.f32 %v8910_v50, %v11534_v33 }
 0x69e   : > { %v9474_v49 = vpop.eup %9473  ;;  %v3734_v14 = vpop.f32.mrf.mxu0 }
 0x69f   : > { %v11544_v1 = vpack.c.bf16 %v9474_v49, %v9472_v48  ;;  %v3735_v53 = vadd.f32 %v11534_v33, %v3734_v14  ;;  %v9476_v11 = vpop.eup %9475 }
 0x6a0   : > { %v9478_v55 = vpop.eup %9477 }
 0x6a1   : > { %9481 = vtanh.f32 %v3735_v53  ;;  %4312 = vmatmul.mubr.bf16.vlgmr.msra.gmra.mxu1 %v11544_v1  ;;  %4505 = vmatmul.mubr.bf16.vlgmr.msra.gmra.mxu0 %v11544_v1  ;;  %v11565_v13 = vpack.c.bf16 %v9476_v11, %v9478_v55 }
 0x6a2   : > { %4666 = vmatpush1.bf16.msra.mxu1 %v9119_v63  ;;  %4321 = vmatprep.mubr.bf16.mxu1 %v10440_v27  ;;  %9483 = vtanh.f32 %v3743_v9 }
 0x6a3   : > { %4514 = vmatprep.mubr.bf16.mxu0 %v10440_v27  ;;  %4667 = vmatprep.subr.bf16.mxu1 %v9124_v3  ;;  %9485 = vtanh.f32 %v3740_v12 }
 0x6a4   : > { %8936 = vmatpush3.bf16.msra.mxu0 %v9134_v22 }
 0x6a5   : > { %8937 = vmatprep.subr.bf16.mxu0 %v9138_v6 }
 0x6a6   : > { %4668 = vmatpush1.bf16.msra.mxu1 %v9122_v60 }
 0x6a7   : > { %4669 = vmatprep.subr.bf16.mxu1 %v9127_v26 }
 0x6a8   : > { %v8913_v40 = vpop.f32.mrf.mxu0  ;;  %8938 = vmatpush3.bf16.msra.mxu0 %v9138_v6 }
 0x6a9   : > { %4322 = vmatmul.mubr.bf16.gmra.mxu1 %v11565_v13  ;;  %4515 = vmatmul.mubr.bf16.gmra.mxu0 %v11565_v13  ;;  %v3756_v16 = vadd.f32 %v8913_v40, %v11534_v33 }
 0x6aa   : > { %v3747_v61 = vpop.f32.mrf.mxu0  ;;  %4331 = vmatprep.mubr.bf16.mxu1 %v10440_v27  ;;  %4524 = vmatprep.mubr.bf16.mxu0 %v10440_v27  ;;  %v9480_v56 = vpop.eup %9479 }
 0x6ab   : > { %4670 = vmatpush1.bf16.msra.mxu1 %v9125_v15  ;;  %8939 = vmatprep.subr.bf16.mxu0 %v9142_v8  ;;  %v3748_v17 = vadd.f32 %v11534_v33, %v3747_v61 }
 0x6ac   : > { %v8914_v23 = vpop.f32.mrf.mxu0  ;;  %4671 = vmatprep.subr.bf16.mxu1 %v9130_v0  ;;  %8940 = vmatpush3.bf16.msra.mxu0 %v9142_v8 }
 0x6ad   : > { %8941 = vmatprep.subr.bf16.mxu0 %v9143_v62  ;;  %9487 = vtanh.f32 %v3748_v17  ;;  %v3759_v32 = vadd.f32 %v8914_v23, %v11534_v33 }
 0x6ae   : > { %v9482_v5 = vpop.eup %9481  ;;  %v3750_v34 = vpop.f32.mrf.mxu0 }
 0x6af   : > { %v3751_v24 = vadd.f32 %v11534_v33, %v3750_v34  ;;  %v11591_v25 = vpack.c.bf16 %v9482_v5, %v9480_v56  ;;  %4672 = vmatpush1.bf16.msra.mxu1 %v9128_v18  ;;  %v9484_v21 = vpop.eup %9483 }
 0x6b0   : > { %4673 = vmatprep.subr.bf16.mxu1 %v9133_v10  ;;  %8942 = vmatpush3.bf16.msra.mxu0 %v9143_v62  ;;  %v9486_v35 = vpop.eup %9485 }
 0x6b1   : > { %9489 = vtanh.f32 %v3751_v24  ;;  %4332 = vmatmul.mubr.bf16.gmra.mxu1 %v11591_v25  ;;  %4525 = vmatmul.mubr.bf16.gmra.mxu0 %v11591_v25  ;;  %v11617_v31 = vpack.c.bf16 %v9484_v21, %v9486_v35 }
 0x6b2   : > { %4341 = vmatprep.mubr.bf16.mxu1 %v10440_v27  ;;  %4534 = vmatprep.mubr.bf16.mxu0 %v10440_v27  ;;  %9491 = vtanh.f32 %v3759_v32 }
 0x6b3   : > { %4674 = vmatpush1.bf16.msra.mxu1 %v9131_v37  ;;  %8943 = vmatprep.subr.bf16.mxu0 %v9147_v4  ;;  %9493 = vtanh.f32 %v3756_v16 }
 0x6b4   : > { %4675 = vmatprep.subr.bf16.mxu1 %v9137_v20  ;;  %8944 = vmatpush3.bf16.msra.mxu0 %v9147_v4 }
 0x6b5   : > { %8945 = vmatprep.subr.bf16.mxu0 %v9148_v30 }
 0x6b7   : > { %4676 = vmatpush1.bf16.msra.mxu1 %v9135_v19 }
 0x6b8   : > { %v8917_v28 = vpop.f32.mrf.mxu0  ;;  %4677 = vmatprep.subr.bf16.mxu1 %v9141_v36  ;;  %8946 = vmatpush3.bf16.msra.mxu0 %v9148_v30 }
 0x6b9   : > { %4342 = vmatmul.mubr.bf16.gmra.mxu1 %v11617_v31  ;;  %4535 = vmatmul.mubr.bf16.gmra.mxu0 %v11617_v31  ;;  %v3772_v41 = vadd.f32 %v8917_v28, %v11534_v33 }
 0x6ba   : > { %v3763_v45 = vpop.f32.mrf.mxu0  ;;  %4351 = vmatprep.mubr.bf16.mxu1 %v10440_v27  ;;  %4544 = vmatprep.mubr.bf16.mxu0 %v10440_v27  ;;  %v9488_v54 = vpop.eup %9487 }
 0x6bb   : > { %4678 = vmatpush1.bf16.msra.mxu1 %v9139_v42  ;;  %8947 = vmatprep.subr.bf16.mxu0 %v9149_v38  ;;  %v3764_v46 = vadd.f32 %v11534_v33, %v3763_v45 }
 0x6bc   : > { %v8918_v22 = vpop.f32.mrf.mxu0  ;;  %4679 = vmatprep.subr.bf16.mxu1 %v9146_v43  ;;  %8948 = vmatpush3.bf16.msra.mxu0 %v9149_v38 }
 0x6bd   : > { %8949 = vmatprep.subr.bf16.mxu0 %v9150_v7  ;;  %9495 = vtanh.f32 %v3764_v46  ;;  %v3775_v52 = vadd.f32 %v8918_v22, %v11534_v33 }
 0x6be   : > { %v9490_v47 = vpop.eup %9489  ;;  %v3766_v51 = vpop.f32.mrf.mxu0 }
 0x6bf   : > { %v3767_v44 = vadd.f32 %v11534_v33, %v3766_v51  ;;  %v11640_v39 = vpack.c.bf16 %v9490_v47, %v9488_v54  ;;  %4680 = vmatpush1.bf16.msra.mxu1 %v9144_v29  ;;  %v9492_v57 = vpop.eup %9491 }
 0x6c0   : > { %8950 = vmatpush3.bf16.msra.mxu0 %v9150_v7  ;;  %v9494_v2 = vpop.eup %9493 }
 0x6c1   : > { %9497 = vtanh.f32 %v3767_v44  ;;  %4352 = vmatmul.mubr.bf16.gmra.mxu1 %v11640_v39  ;;  %4545 = vmatmul.mubr.bf16.gmra.mxu0 %v11640_v39  ;;  %v11648_v58 = vpack.c.bf16 %v9492_v57, %v9494_v2 }
 0x6c2   : > { %4361 = vmatprep.mubr.bf16.mxu1 %v10440_v27  ;;  %4554 = vmatprep.mubr.bf16.mxu0 %v10440_v27  ;;  %9499 = vtanh.f32 %v3775_v52 }
 0x6c3   : > { %9501 = vtanh.f32 %v3772_v41 }
 0x6c8   : > { %v8921_v59 = vpop.f32.mrf.mxu0 }
 0x6c9   : > { %4362 = vmatmul.mubr.bf16.gmra.mxu1 %v11648_v58  ;;  %4555 = vmatmul.mubr.bf16.gmra.mxu0 %v11648_v58  ;;  %v3788_v26 = vadd.f32 %v8921_v59, %v11534_v33 }
 0x6ca   : > { %v3779_v50 = vpop.f32.mrf.mxu0  ;;  %4371 = vmatprep.mubr.bf16.mxu1 %v10440_v27  ;;  %4564 = vmatprep.mubr.bf16.mxu0 %v10440_v27  ;;  %v9496_v14 = vpop.eup %9495 }
 0x6cb   : > { %v3780_v48 = vadd.f32 %v11534_v33, %v3779_v50 }
 0x6cc   : > { %v8922_v49 = vpop.f32.mrf.mxu0 }
 0x6cd   : > { %9503 = vtanh.f32 %v3780_v48  ;;  %v3791_v60 = vadd.f32 %v8922_v49, %v11534_v33 }
 0x6ce   : > { %v9498_v63 = vpop.eup %9497  ;;  %v3782_v53 = vpop.f32.mrf.mxu0 }
 0x6cf   : > { %v3783_v3 = vadd.f32 %v11534_v33, %v3782_v53  ;;  %v11656_v6 = vpack.c.bf16 %v9498_v63, %v9496_v14  ;;  %v9500_v9 = vpop.eup %9499 }
 0x6d0   : > { %v9502_v11 = vpop.eup %9501 }
 0x6d1   : > { %9505 = vtanh.f32 %v3783_v3  ;;  %4372 = vmatmul.mubr.bf16.gmra.mxu1 %v11656_v6  ;;  %4565 = vmatmul.mubr.bf16.gmra.mxu0 %v11656_v6  ;;  %v11664_v12 = vpack.c.bf16 %v9500_v9, %v9502_v11 }
 0x6d2   : > { %4381 = vmatprep.mubr.bf16.mxu1 %v10440_v27  ;;  %4574 = vmatprep.mubr.bf16.mxu0 %v10440_v27  ;;  %9507 = vtanh.f32 %v3791_v60 }
 0x6d3   : > { %9509 = vtanh.f32 %v3788_v26 }
 0x6d8   : > { %v8925_v55 = vpop.f32.mrf.mxu0 }
 0x6d9   : > { %4382 = vmatmul.mubr.bf16.gmra.mxu1 %v11664_v12  ;;  %4575 = vmatmul.mubr.bf16.gmra.mxu0 %v11664_v12  ;;  %v3804_v56 = vadd.f32 %v8925_v55, %v11534_v33 }
 0x6da   : > { %v3795_v15 = vpop.f32.mrf.mxu0  ;;  %4391 = vmatprep.mubr.bf16.mxu1 %v10440_v27  ;;  %4584 = vmatprep.mubr.bf16.mxu0 %v10440_v27  ;;  %v9504_v0 = vpop.eup %9503 }
 0x6db   : > { %v3796_v8 = vadd.f32 %v11534_v33, %v3795_v15 }
 0x6dc   : > { %v8926_v40 = vpop.f32.mrf.mxu0 }
 0x6dd   : > { %9511 = vtanh.f32 %v3796_v8  ;;  %v3807_v23 = vadd.f32 %v8926_v40, %v11534_v33 }
 0x6de   : > { %v9506_v62 = vpop.eup %9505  ;;  %v3798_v61 = vpop.f32.mrf.mxu0 }
 0x6df   : > { %v3799_v18 = vadd.f32 %v11534_v33, %v3798_v61  ;;  %v11672_v17 = vpack.c.bf16 %v9506_v62, %v9504_v0  ;;  %v9508_v10 = vpop.eup %9507 }
 0x6e0   : > { %v9510_v5 = vpop.eup %9509 }
 0x6e1   : > { %9513 = vtanh.f32 %v3799_v18  ;;  %4392 = vmatmul.mubr.bf16.gmra.mxu1 %v11672_v17  ;;  %4585 = vmatmul.mubr.bf16.gmra.mxu0 %v11672_v17  ;;  %v11680_v34 = vpack.c.bf16 %v9508_v10, %v9510_v5 }
 0x6e2   : > { %4401 = vmatprep.mubr.bf16.mxu1 %v10440_v27  ;;  %4594 = vmatprep.mubr.bf16.mxu0 %v10440_v27  ;;  %9515 = vtanh.f32 %v3807_v23 }
 0x6e3   : > { %9517 = vtanh.f32 %v3804_v56 }
 0x6e8   : > { %v8929_v24 = vpop.f32.mrf.mxu0 }
 0x6e9   : > { %4402 = vmatmul.mubr.bf16.gmra.mxu1 %v11680_v34  ;;  %4595 = vmatmul.mubr.bf16.gmra.mxu0 %v11680_v34  ;;  %v3820_v42 = vadd.f32 %v8929_v24, %v11534_v33 }
 0x6ea   : > { %v3811_v37 = vpop.f32.mrf.mxu0  ;;  %4411 = vmatprep.mubr.bf16.mxu1 %v10440_v27  ;;  %4604 = vmatprep.mubr.bf16.mxu0 %v10440_v27  ;;  %v9512_v30 = vpop.eup %9511 }
 0x6eb   : > { %v3812_v4 = vadd.f32 %v11534_v33, %v3811_v37 }
 0x6ec   : > { %v8930_v20 = vpop.f32.mrf.mxu0 }
 0x6ed   : > { %9519 = vtanh.f32 %v3812_v4  ;;  %v3823_v16 = vadd.f32 %v8930_v20, %v11534_v33 }
 0x6ee   : > { %v9514_v32 = vpop.eup %9513  ;;  %v3814_v19 = vpop.f32.mrf.mxu0 }
 0x6ef   : > { %v3815_v21 = vadd.f32 %v11534_v33, %v3814_v19  ;;  %v11688_v36 = vpack.c.bf16 %v9514_v32, %v9512_v30  ;;  %v9516_v35 = vpop.eup %9515 }
 0x6f0   : > { %v9518_v38 = vpop.eup %9517 }
 0x6f1   : > { %9521 = vtanh.f32 %v3815_v21  ;;  %4412 = vmatmul.mubr.bf16.gmra.mxu1 %v11688_v36  ;;  %4605 = vmatmul.mubr.bf16.gmra.mxu0 %v11688_v36  ;;  %v11696_v28 = vpack.c.bf16 %v9516_v35, %v9518_v38 }
 0x6f2   : > { %4421 = vmatprep.mubr.bf16.mxu1 %v10440_v27  ;;  %4614 = vmatprep.mubr.bf16.mxu0 %v10440_v27  ;;  %9523 = vtanh.f32 %v3823_v16 }
 0x6f3   : > { %9525 = vtanh.f32 %v3820_v42 }
 0x6f8   : > { %v8933_v43 = vpop.f32.mrf.mxu0 }
 0x6f9   : > { %4422 = vmatmul.mubr.bf16.gmra.mxu1 %v11696_v28  ;;  %4615 = vmatmul.mubr.bf16.gmra.mxu0 %v11696_v28  ;;  %v3836_v57 = vadd.f32 %v8933_v43, %v11534_v33 }
 0x6fa   : > { %v3827_v7 = vpop.f32.mrf.mxu0  ;;  %4431 = vmatprep.mubr.bf16.mxu1 %v10440_v27  ;;  %4624 = vmatprep.mubr.bf16.mxu0 %v10440_v27  ;;  %v9520_v46 = vpop.eup %9519 }
 0x6fb   : > { %v3828_v45 = vadd.f32 %v11534_v33, %v3827_v7 }
 0x6fc   : > { %v8934_v29 = vpop.f32.mrf.mxu0 }
 0x6fd   : > { %9527 = vtanh.f32 %v3828_v45  ;;  %v3839_v44 = vadd.f32 %v8934_v29, %v11534_v33 }
 0x6fe   : > { %v9522_v22 = vpop.eup %9521  ;;  %v3830_v54 = vpop.f32.mrf.mxu0 }
 0x6ff   : > { %v3831_v47 = vadd.f32 %v11534_v33, %v3830_v54  ;;  %v11704_v51 = vpack.c.bf16 %v9522_v22, %v9520_v46  ;;  %v9524_v52 = vpop.eup %9523 }
 0x700   : > { %v9526_v41 = vpop.eup %9525 }
 0x701   : > { %9529 = vtanh.f32 %v3831_v47  ;;  %4432 = vmatmul.mubr.bf16.gmra.mxu1 %v11704_v51  ;;  %4625 = vmatmul.mubr.bf16.gmra.mxu0 %v11704_v51  ;;  %v11712_v2 = vpack.c.bf16 %v9524_v52, %v9526_v41 }
 0x702   : > { %4441 = vmatprep.mubr.bf16.mxu1 %v10440_v27  ;;  %4634 = vmatprep.mubr.bf16.mxu0 %v10440_v27  ;;  %9531 = vtanh.f32 %v3839_v44 }
 0x703   : > { %9533 = vtanh.f32 %v3836_v57 }
 0x709   : > { %4442 = vmatmul.mubr.bf16.gmra.mxu1 %v11712_v2  ;;  %4635 = vmatmul.mubr.bf16.gmra.mxu0 %v11712_v2 }
 0x70a   : > { %4451 = vmatprep.mubr.bf16.mxu1 %v10440_v27  ;;  %4644 = vmatprep.mubr.bf16.mxu0 %v10440_v27  ;;  %v9528_v59 = vpop.eup %9527 }
 0x70e   : > { %v9530_v50 = vpop.eup %9529 }
 0x70f   : > { %v11718_v48 = vpack.c.bf16 %v9530_v50, %v9528_v59  ;;  %v9532_v33 = vpop.eup %9531 }
 0x710   : > { %v9534_v49 = vpop.eup %9533 }
 0x711   : > { %4452 = vmatmul.mubr.bf16.gmra.mxu1 %v11718_v48  ;;  %4645 = vmatmul.mubr.bf16.gmra.mxu0 %v11718_v48  ;;  %v11724_v14 = vpack.c.bf16 %v9532_v33, %v9534_v49 }
 0x712   : > { %4461 = vmatprep.mubr.bf16.mxu1 %v10440_v27  ;;  %4654 = vmatprep.mubr.bf16.mxu0 %v10440_v27 }
 0x719   : > { %4462 = vmatmul.mubr.bf16.gmra.mxu1 %v11724_v14  ;;  %4655 = vmatmul.mubr.bf16.gmra.mxu0 %v11724_v14 }
 0x71a   : > { %8951 = vmatprep.mubr.bf16.mxu0 %v11544_v1  ;;  %4697 = vmatprep.mubr.bf16.mxu1 %v10440_v27 }
 0x721   : > { %4698 = vmatmul.mubr.bf16.vlgmr.msra.gmra.mxu1 %v11544_v1  ;;  %8952 = vmatmul.mubr.bf16.vlgmr.msra.gmra.mxu0 %v11565_v13  ;;  %v3956_v1 = vlaneseq }
 0x722   : > { %8955 = vmatprep.mubr.bf16.mxu0 %v11591_v25  ;;  %4707 = vmatprep.mubr.bf16.mxu1 %v10440_v27 }
 0x729   : > { %4708 = vmatmul.mubr.bf16.gmra.mxu1 %v11565_v13  ;;  %8956 = vmatmul.mubr.bf16.gmra.mxu0 %v11617_v31  ;;  %v11758_v13 = vshrl.u32 %v3956_v1, 7 }
 0x72a   : > { %8959 = vmatprep.mubr.bf16.mxu0 %v11640_v39  ;;  %4717 = vmatprep.mubr.bf16.mxu1 %v10440_v27 }
 0x72b   : > { %v3970_v63 = vsub.s32 3, %v11758_v13 }
 0x731   : > { %4718 = vmatmul.mubr.bf16.gmra.mxu1 %v11591_v25  ;;  %8960 = vmatmul.mubr.bf16.gmra.mxu0 %v11648_v58  ;;  %v3958_v25 = vsub.s32 0, %v11758_v13 }
 0x732   : > { %8963 = vmatprep.mubr.bf16.mxu0 %v11656_v6  ;;  %4727 = vmatprep.mubr.bf16.mxu1 %v10440_v27 }
 0x739   : > { %4728 = vmatmul.mubr.bf16.gmra.mxu1 %v11617_v31  ;;  %8964 = vmatmul.mubr.bf16.gmra.mxu0 %v11664_v12  ;;  %v3966_v31 = vsub.s32 2, %v11758_v13 }
 0x73a   : > { %8967 = vmatprep.mubr.bf16.mxu0 %v11672_v17  ;;  %4737 = vmatprep.mubr.bf16.mxu1 %v10440_v27 }
 0x741   : > { %4738 = vmatmul.mubr.bf16.gmra.mxu1 %v11640_v39  ;;  %8968 = vmatmul.mubr.bf16.gmra.mxu0 %v11680_v34  ;;  %v3954_v39 = vld [vmem:[%s12586_s16] sm:$0x7f] }
 0x742   : > { %8971 = vmatprep.mubr.bf16.mxu0 %v11688_v36  ;;  %4747 = vmatprep.mubr.bf16.mxu1 %v10440_v27  ;;  %v11770_v53 = vrot.slane %v3954_v39, %v3958_v25  ;;  %v11772_v3 = vrot.slane %v3954_v39, %v3966_v31  ;;  %v11776_v60 = vrot.slane %v3954_v39, %v3970_v63 }
 0x749   : > { %4748 = vmatmul.mubr.bf16.gmra.mxu1 %v11648_v58  ;;  %8972 = vmatmul.mubr.bf16.gmra.mxu0 %v11696_v28  ;;  %v3962_v58 = vsub.s32 1, %v11758_v13 }
 0x74a   : > { %8975 = vmatprep.mubr.bf16.mxu0 %v11704_v51  ;;  %4757 = vmatprep.mubr.bf16.mxu1 %v10440_v27 }
 0x751   : > { %4758 = vmatmul.mubr.bf16.gmra.mxu1 %v11656_v6  ;;  %8976 = vmatmul.mubr.bf16.gmra.mxu0 %v11712_v2  ;;  %v11774_v6 = vrot.slane %v3954_v39, %v3962_v58 }
 0x752   : > { %8979 = vmatprep.mubr.bf16.mxu0 %v11718_v48  ;;  %4767 = vmatprep.mubr.bf16.mxu1 %v10440_v27 }
 0x759   : > { %4768 = vmatmul.mubr.bf16.gmra.mxu1 %v11664_v12  ;;  %8980 = vmatmul.mubr.bf16.gmra.mxu0 %v11724_v14 }
 0x75a   : > { %4777 = vmatprep.mubr.bf16.mxu1 %v10440_v27 }
 0x761   : > { %v4313_v9 = vpop.f32.mrf.mxu1  ;;  %v4506_v26 = vpop.f32.mrf.mxu0  ;;  %4778 = vmatmul.mubr.bf16.gmra.mxu1 %v11672_v17 }
 0x762   : > { %v4314_v11 = vadd.f32 %v4313_v9, %v11770_v53  ;;  %v4507_v12 = vadd.f32 %v4506_v26, %v11772_v3  ;;  %4787 = vmatprep.mubr.bf16.mxu1 %v10440_v27 }
 0x763   : > { %v4315_v55 = vpop.f32.mrf.mxu1  ;;  %v4508_v15 = vpop.f32.mrf.mxu0 }
 0x764   : > { %v7549_v8 = vmul.f32 -1.442695, %v4314_v11  ;;  %v7551_v40 = vmul.f32 -1.442695, %v4507_v12  ;;  %v4316_v0 = vadd.f32 %v4315_v55, %v11774_v6  ;;  %v4509_v62 = vadd.f32 %v4508_v15, %v11776_v60 }
 0x765   : > { %v4317_v61 = vpop.f32.mrf.mxu1  ;;  %v4510_v18 = vpop.f32.mrf.mxu0 }
 0x766   : > { %9535 = vpow2.f32 %v7549_v8  ;;  %v7550_v23 = vmul.f32 -1.442695, %v4316_v0  ;;  %v7552_v10 = vmul.f32 -1.442695, %v4509_v62  ;;  %v4318_v17 = vadd.f32 %v4317_v61, %v11770_v53 }
 0x767   : > { %9537 = vpow2.f32 %v7551_v40  ;;  %v4511_v56 = vadd.f32 %v4510_v18, %v11772_v3  ;;  %v4319_v5 = vpop.f32.mrf.mxu1  ;;  %v4512_v24 = vpop.f32.mrf.mxu0 }
 0x768   : > { %9539 = vpow2.f32 %v7550_v23  ;;  %v7556_v37 = vmul.f32 -1.442695, %v4318_v17  ;;  %v4320_v4 = vadd.f32 %v4319_v5, %v11774_v6  ;;  %v4513_v20 = vadd.f32 %v4512_v24, %v11776_v60 }
 0x769   : > { %9541 = vpow2.f32 %v7552_v10  ;;  %v7558_v30 = vmul.f32 -1.442695, %v4511_v56  ;;  %v4323_v32 = vpop.f32.mrf.mxu1  ;;  %v4516_v19 = vpop.f32.mrf.mxu0  ;;  %4788 = vmatmul.mubr.bf16.gmra.mxu1 %v11680_v34 }
 0x76a   : > { %9543 = vpow2.f32 %v7556_v37  ;;  %v7557_v21 = vmul.f32 -1.442695, %v4320_v4  ;;  %v7559_v16 = vmul.f32 -1.442695, %v4513_v20  ;;  %v4324_v35 = vadd.f32 %v4323_v32, %v11770_v53  ;;  %4797 = vmatprep.mubr.bf16.mxu1 %v10440_v27 }
 0x76b   : > { %9545 = vpow2.f32 %v7558_v30  ;;  %v4517_v42 = vadd.f32 %v4516_v19, %v11772_v3  ;;  %v4325_v38 = vpop.f32.mrf.mxu1  ;;  %v4518_v43 = vpop.f32.mrf.mxu0 }
 0x76c   : > { %9547 = vpow2.f32 %v7557_v21  ;;  %v7563_v7 = vmul.f32 -1.442695, %v4324_v35  ;;  %v4326_v45 = vadd.f32 %v4325_v38, %v11774_v6  ;;  %v4519_v29 = vadd.f32 %v4518_v43, %v11776_v60 }
 0x76d   : > { %9549 = vpow2.f32 %v7559_v16  ;;  %v7565_v34 = vmul.f32 -1.442695, %v4517_v42  ;;  %v4327_v46 = vpop.f32.mrf.mxu1  ;;  %v4520_v22 = vpop.f32.mrf.mxu0 }
 0x76e   : > { %9551 = vpow2.f32 %v7563_v7  ;;  %v7564_v54 = vmul.f32 -1.442695, %v4326_v45  ;;  %v7566_v47 = vmul.f32 -1.442695, %v4519_v29  ;;  %v4328_v44 = vadd.f32 %v4327_v46, %v11770_v53 }
 0x76f   : > { %9553 = vpow2.f32 %v7565_v34  ;;  %v4521_v52 = vadd.f32 %v4520_v22, %v11772_v3  ;;  %v4329_v57 = vpop.f32.mrf.mxu1  ;;  %v4522_v41 = vpop.f32.mrf.mxu0 }
 0x770   : > { %9555 = vpow2.f32 %v7564_v54  ;;  %v7570_v59 = vmul.f32 -1.442695, %v4328_v44  ;;  %v4330_v50 = vadd.f32 %v4329_v57, %v11774_v6  ;;  %v4523_v33 = vadd.f32 %v4522_v41, %v11776_v60 }
 0x771   : > { %9557 = vpow2.f32 %v7566_v47  ;;  %v7572_v49 = vmul.f32 -1.442695, %v4521_v52  ;;  %v4333_v1 = vpop.f32.mrf.mxu1  ;;  %v4526_v25 = vpop.f32.mrf.mxu0  ;;  %4798 = vmatmul.mubr.bf16.gmra.mxu1 %v11688_v36 }
 0x772   : > { %9559 = vpow2.f32 %v7570_v59  ;;  %v7571_v31 = vmul.f32 -1.442695, %v4330_v50  ;;  %v7573_v39 = vmul.f32 -1.442695, %v4523_v33  ;;  %4807 = vmatprep.mubr.bf16.mxu1 %v10440_v27  ;;  %v4334_v38 = vadd.f32 %v4333_v1, %v11770_v53 }
 0x773   : > { %v9536_v58 = vpop.eup %9535  ;;  %9561 = vpow2.f32 %v7572_v49  ;;  %v4335_v63 = vpop.f32.mrf.mxu1  ;;  %v4527_v29 = vadd.f32 %v4526_v25, %v11772_v3 }
 0x774   : > { %v4528_v9 = vpop.f32.mrf.mxu0  ;;  %v9538_v26 = vpop.eup %9537  ;;  %v5691_v11 = vadd.f32 1.0, %v9536_v58  ;;  %9563 = vpow2.f32 %v7571_v31  ;;  %v4336_v54 = vadd.f32 %v4335_v63, %v11774_v6  ;;  %v7577_v50 = vmul.f32 -1.442695, %v4334_v38 }
 0x775   : > { %v9540_v12 = vpop.eup %9539  ;;  %v5693_v55 = vadd.f32 1.0, %v9538_v26  ;;  %9565 = vpow2.f32 %v7573_v39  ;;  %v4337_v15 = vpop.f32.mrf.mxu1  ;;  %v4529_v52 = vadd.f32 %v4528_v9, %v11776_v60  ;;  %v7579_v31 = vmul.f32 -1.442695, %v4527_v29 }
 0x776   : > { %v9542_v8 = vpop.eup %9541  ;;  %9567 = vrcp.f32 %v5691_v11  ;;  %v5692_v40 = vadd.f32 1.0, %v9540_v12  ;;  %v4530_v36 = vpop.f32.mrf.mxu0  ;;  %v4338_v33 = vadd.f32 %v4337_v15, %v11770_v53 }
 0x777   : > { %v9544_v0 = vpop.eup %9543  ;;  %9569 = vrcp.f32 %v5693_v55  ;;  %v5694_v62 = vadd.f32 1.0, %v9542_v8  ;;  %v4339_v61 = vpop.f32.mrf.mxu1  ;;  %v4531_v39 = vadd.f32 %v4530_v36, %v11772_v3  ;;  %v7580_v11 = vmul.f32 -1.442695, %v4529_v52 }
 0x778   : > { %v9546_v18 = vpop.eup %9545  ;;  %9571 = vrcp.f32 %v5692_v40  ;;  %v5698_v23 = vadd.f32 1.0, %v9544_v0  ;;  %v4532_v37 = vpop.f32.mrf.mxu0  ;;  %v4340_v9 = vadd.f32 %v4339_v61, %v11774_v6  ;;  %v7584_v40 = vmul.f32 -1.442695, %v4338_v33 }
 0x779   : > { %v9548_v10 = vpop.eup %9547  ;;  %9573 = vrcp.f32 %v5694_v62  ;;  %v5700_v17 = vadd.f32 1.0, %v9546_v18  ;;  %v11800_v56 = vpop.f32.mrf.mxu1  ;;  %4808 = vmatmul.mubr.bf16.gmra.mxu1 %v11696_v28  ;;  %v4533_v12 = vadd.f32 %v4532_v37, %v11776_v60  ;;  %v7586_v18 = vmul.f32 -1.442695, %v4531_v39 }
 0x77a   : > { %v9550_v5 = vpop.eup %9549  ;;  %9575 = vrcp.f32 %v5698_v23  ;;  %v5699_v24 = vadd.f32 1.0, %v9548_v10  ;;  %4817 = vmatprep.mubr.bf16.mxu1 %v10440_v27  ;;  %v4536_v43 = vpop.f32.mrf.mxu0  ;;  %v4344_v36 = vadd.f32 %v11800_v56, %v11770_v53 }
 0x77b   : > { %v9552_v4 = vpop.eup %9551  ;;  %9577 = vrcp.f32 %v5700_v17  ;;  %v5701_v20 = vadd.f32 1.0, %v9550_v5  ;;  %v11804_v30 = vpop.f32.mrf.mxu1  ;;  %v4537_v23 = vadd.f32 %v4536_v43, %v11772_v3  ;;  %v7585_v5 = vmul.f32 -1.442695, %v4340_v9 }
 0x77c   : > { %v9554_v32 = vpop.eup %9553  ;;  %9579 = vrcp.f32 %v5699_v24  ;;  %v5705_v19 = vadd.f32 1.0, %v9552_v4  ;;  %v4538_v49 = vpop.f32.mrf.mxu0  ;;  %v4346_v24 = vadd.f32 %v11804_v30, %v11774_v6  ;;  %v7587_v56 = vmul.f32 -1.442695, %v4533_v12 }
 0x77d   : > { %v9556_v21 = vpop.eup %9555  ;;  %9581 = vrcp.f32 %v5701_v20  ;;  %v5707_v16 = vadd.f32 1.0, %v9554_v32  ;;  %v11806_v35 = vpop.f32.mrf.mxu1  ;;  %v4539_v4 = vadd.f32 %v4538_v49, %v11776_v60  ;;  %v7593_v38 = vmul.f32 -1.442695, %v4537_v23 }
 0x77e   : > { %v9558_v28 = vpop.eup %9557  ;;  %9583 = vrcp.f32 %v5705_v19  ;;  %v5706_v42 = vadd.f32 1.0, %v9556_v21  ;;  %v4540_v0 = vpop.f32.mrf.mxu0  ;;  %v7591_v21 = vmul.f32 -1.442695, %v4344_v36 }
 0x77f   : > { %v9560_v7 = vpop.eup %9559  ;;  %9585 = vrcp.f32 %v5707_v16  ;;  %v5708_v45 = vadd.f32 1.0, %v9558_v28  ;;  %v11810_v34 = vpop.f32.mrf.mxu1  ;;  %v4348_v16 = vadd.f32 %v11806_v35, %v11770_v53  ;;  %v4541_v43 = vadd.f32 %v4540_v0, %v11772_v3 }
 0x780   : > { %v9562_v46 = vpop.eup %9561  ;;  %9587 = vrcp.f32 %v5706_v42  ;;  %v5712_v22 = vadd.f32 1.0, %v9560_v7  ;;  %v4542_v30 = vpop.f32.mrf.mxu0  ;;  %v4350_v29 = vadd.f32 %v11810_v34, %v11774_v6  ;;  %v7594_v35 = vmul.f32 -1.442695, %v4539_v4 }
 0x781   : > { %v9564_v47 = vpop.eup %9563  ;;  %9589 = vrcp.f32 %v5708_v45  ;;  %v5714_v44 = vadd.f32 1.0, %v9562_v46  ;;  %v11815_v57 = vpop.f32.mrf.mxu1  ;;  %4818 = vmatmul.mubr.bf16.gmra.mxu1 %v11704_v51  ;;  %v7578_v51 = vmul.f32 -1.442695, %v4336_v54  ;;  %v7592_v45 = vmul.f32 -1.442695, %v4346_v24 }
 0x782   : > { %v9566_v41 = vpop.eup %9565  ;;  %9591 = vrcp.f32 %v5712_v22  ;;  %v5713_v59 = vadd.f32 1.0, %v9564_v47  ;;  %4827 = vmatprep.mubr.bf16.mxu1 %v10440_v27  ;;  %v4543_v22 = vadd.f32 %v4542_v30, %v11776_v60  ;;  %v7598_v52 = vmul.f32 -1.442695, %v4348_v16 }
 0x783   : > { %v9568_v1 = vpop.eup %9567  ;;  %9593 = vrcp.f32 %v5714_v44  ;;  %v5715_v25 = vadd.f32 1.0, %v9566_v41  ;;  %v11821_v58 = vpop.f32.mrf.mxu1  ;;  %v7600_v34 = vmul.f32 -1.442695, %v4541_v43 }
 0x784   : > { %v9570_v63 = vpop.eup %9569  ;;  %9595 = vrcp.f32 %v5713_v59  ;;  %v11858_v41 = vpop.f32.mrf.mxu0 }
 0x785   : > { %v9572_v26 = vpop.eup %9571  ;;  %9597 = vrcp.f32 %v5715_v25  ;;  %v11830_v55 = vpop.f32.mrf.mxu1 }
 0x786   : > { %v9574_v15 = vpop.eup %9573  ;;  %v7935_v8 = vpack.c.bf16 %v9572_v26, %v9568_v1  ;;  %9599 = vpow2.f32 %v7577_v50  ;;  %v7599_v1 = vmul.f32 -1.442695, %v4350_v29  ;;  %v11867_v9 = vpop.f32.mrf.mxu0  ;;  %v4354_v29 = vadd.f32 %v11815_v57, %v11770_v53 }
 0x787   : > { %v9576_v62 = vpop.eup %9575  ;;  %v7936_v61 = vpack.c.bf16 %v9574_v15, %v9570_v63  ;;  %9601 = vpow2.f32 %v7579_v31  ;;  %v11835_v10 = vpop.f32.mrf.mxu1  ;;  %v7601_v31 = vmul.f32 -1.442695, %v4543_v22  ;;  %v4549_v57 = vadd.f32 %v11867_v9, %v11776_v60 }
 0x788   : > { %v9578_v17 = vpop.eup %9577  ;;  %7067 = vst [vmem:[%s11827_s1] sm:$0xff] %v7935_v8  ;;  %9603 = vpow2.f32 %v7578_v51 }
 0x789   : > { %v9580_v37 = vpop.eup %9579  ;;  %7068 = vst [vmem:[%s11827_s1 + $0x8] sm:$0xff] %v7936_v61  ;;  %9605 = vpow2.f32 %v7580_v11  ;;  %v11842_v20 = vpop.f32.mrf.mxu1  ;;  %4828 = vmatmul.mubr.bf16.gmra.mxu1 %v11712_v2 }
 0x78a   : > { %v9582_v32 = vpop.eup %9581  ;;  %v7939_v19 = vpack.c.bf16 %v9580_v37, %v9576_v62  ;;  %9607 = vpow2.f32 %v7584_v40  ;;  %4837 = vmatprep.mubr.bf16.mxu1 %v10440_v27  ;;  %v4550_v61 = vpop.f32.mrf.mxu0 }
 0x78b   : > { %v9584_v28 = vpop.eup %9583  ;;  %v7940_v42 = vpack.c.bf16 %v9582_v32, %v9578_v17  ;;  %9609 = vpow2.f32 %v7586_v18  ;;  %v11849_v7 = vpop.f32.mrf.mxu1 }
 0x78c   : > { %v9586_v2 = vpop.eup %9585  ;;  %7072 = vst [vmem:[%s11827_s1 + $0x1c] sm:$0xff] %v7939_v19  ;;  %9611 = vpow2.f32 %v7585_v5  ;;  %v4552_v19 = vpop.f32.mrf.mxu0 }
 0x78d   : > { %v9588_v46 = vpop.eup %9587  ;;  %7073 = vst [vmem:[%s11827_s1 + $0x24] sm:$0xff] %v7940_v42  ;;  %9613 = vpow2.f32 %v7587_v56  ;;  %v11856_v54 = vpop.f32.mrf.mxu1 }
 0x78e   : > { %v9590_v47 = vpop.eup %9589  ;;  %v7943_v44 = vpack.c.bf16 %v9588_v46, %v9584_v28  ;;  %9615 = vpow2.f32 %v7591_v21  ;;  %v4556_v46 = vpop.f32.mrf.mxu0 }
 0x78f   : > { %v9592_v59 = vpop.eup %9591  ;;  %v7944_v50 = vpack.c.bf16 %v9590_v47, %v9586_v2  ;;  %9617 = vpow2.f32 %v7593_v38  ;;  %v11860_v33 = vpop.f32.mrf.mxu1  ;;  %v4547_v47 = vadd.f32 %v11858_v41, %v11772_v3  ;;  %v7605_v41 = vmul.f32 -1.442695, %v4354_v29 }
 0x790   : > { %v9594_v49 = vpop.eup %9593  ;;  %7076 = vst [vmem:[%s11827_s1 + $0x38] sm:$0xff] %v7943_v44  ;;  %9619 = vpow2.f32 %v7592_v45 }
 0x791   : > { %v9596_v25 = vpop.eup %9595  ;;  %7077 = vst [vmem:[%s11827_s1 + $0x40] sm:$0xff] %v7944_v50  ;;  %9621 = vpow2.f32 %v7594_v35  ;;  %v11864_v39 = vpop.f32.mrf.mxu1  ;;  %4838 = vmatmul.mubr.bf16.gmra.mxu1 %v11718_v48  ;;  %v4356_v50 = vadd.f32 %v11821_v58, %v11774_v6  ;;  %v7607_v58 = vmul.f32 -1.442695, %v4547_v47 }
 0x792   : > { %v9598_v63 = vpop.eup %9597  ;;  %v7947_v51 = vpack.c.bf16 %v9596_v25, %v9592_v59  ;;  %9623 = vpow2.f32 %v7598_v52  ;;  %4847 = vmatprep.mubr.bf16.mxu1 %v10440_v27 }
 0x793   : > { %v9600_v26 = vpop.eup %9599  ;;  %v7948_v11 = vpack.c.bf16 %v9598_v63, %v9594_v49  ;;  %9625 = vpow2.f32 %v7600_v34  ;;  %v11870_v12 = vpop.f32.mrf.mxu1  ;;  %v4358_v63 = vadd.f32 %v11830_v55, %v11770_v53  ;;  %v7606_v9 = vmul.f32 -1.442695, %v4356_v50 }
 0x794   : > { %v9602_v15 = vpop.eup %9601  ;;  %7080 = vst [vmem:[%s11827_s1 + $0x54] sm:$0xff] %v7947_v51  ;;  %v5719_v8 = vadd.f32 1.0, %v9600_v26  ;;  %9627 = vpow2.f32 %v7599_v1  ;;  %v4558_v51 = vpop.f32.mrf.mxu0  ;;  %v4553_v55 = vadd.f32 %v4552_v19, %v11776_v60 }
 0x795   : > { %v9604_v40 = vpop.eup %9603  ;;  %7081 = vst [vmem:[%s11827_s1 + $0x5c] sm:$0xff] %v7948_v11  ;;  %v5721_v36 = vadd.f32 1.0, %v9602_v15  ;;  %9629 = vpow2.f32 %v7601_v31  ;;  %v11874_v48 = vpop.f32.mrf.mxu1  ;;  %v4551_v15 = vadd.f32 %v4550_v61, %v11772_v3  ;;  %v7612_v61 = vmul.f32 -1.442695, %v4358_v63 }
 0x796   : > { %v9606_v0 = vpop.eup %9605  ;;  %9631 = vrcp.f32 %v5719_v8  ;;  %v5720_v62 = vadd.f32 1.0, %v9604_v40 }
 0x797   : > { %v9608_v27 = vpop.eup %9607  ;;  %9633 = vrcp.f32 %v5721_v36  ;;  %v5722_v18 = vadd.f32 1.0, %v9606_v0  ;;  %v11876_v23 = vpop.f32.mrf.mxu1  ;;  %v4360_v36 = vadd.f32 %v11835_v10, %v11774_v6  ;;  %v7614_v10 = vmul.f32 -1.442695, %v4551_v15 }
 0x798   : > { %v9610_v17 = vpop.eup %9609  ;;  %9635 = vrcp.f32 %v5720_v62  ;;  %v5726_v5 = vadd.f32 1.0, %v9608_v27  ;;  %v7608_v62 = vmul.f32 -1.442695, %v4549_v57 }
 0x799   : > { %v9612_v24 = vpop.eup %9611  ;;  %9637 = vrcp.f32 %v5722_v18  ;;  %v5728_v37 = vadd.f32 1.0, %v9610_v17  ;;  %v11878_v56 = vpop.f32.mrf.mxu1  ;;  %4848 = vmatmul.mubr.bf16.gmra.mxu1 %v11724_v14 }
 0x79a   : > { %v9614_v4 = vpop.eup %9613  ;;  %9639 = vrcp.f32 %v5726_v5  ;;  %v5727_v32 = vadd.f32 1.0, %v9612_v24  ;;  %v4364_v5 = vadd.f32 %v11842_v20, %v11770_v53  ;;  %v4560_v24 = vpop.f32.mrf.mxu0  ;;  %v7615_v20 = vmul.f32 -1.442695, %v4553_v55 }
 0x79b   : > { %v9616_v21 = vpop.eup %9615  ;;  %9641 = vrcp.f32 %v5728_v37  ;;  %v5729_v16 = vadd.f32 1.0, %v9614_v4  ;;  %v11881_v30 = vpop.f32.mrf.mxu1 }
 0x79c   : > { %v9618_v28 = vpop.eup %9617  ;;  %9643 = vrcp.f32 %v5727_v32  ;;  %v5733_v42 = vadd.f32 1.0, %v9616_v21  ;;  %v4557_v32 = vadd.f32 %v4556_v46, %v11772_v3  ;;  %v7619_v29 = vmul.f32 -1.442695, %v4364_v5 }
 0x79d   : > { %v9620_v38 = vpop.eup %9619  ;;  %9645 = vrcp.f32 %v5729_v16  ;;  %v5735_v43 = vadd.f32 1.0, %v9618_v28  ;;  %v11883_v2 = vpop.f32.mrf.mxu1  ;;  %v7613_v16 = vmul.f32 -1.442695, %v4360_v36  ;;  %v4366_v28 = vadd.f32 %v11849_v7, %v11774_v6 }
 0x79e   : > { %v9622_v45 = vpop.eup %9621  ;;  %9647 = vrcp.f32 %v5733_v42  ;;  %v5734_v14 = vadd.f32 1.0, %v9620_v38  ;;  %v4559_v38 = vadd.f32 %v4558_v51, %v11776_v60  ;;  %v4368_v46 = vadd.f32 %v11856_v54, %v11770_v53 }
 0x79f   : > { %v9624_v35 = vpop.eup %9623  ;;  %9649 = vrcp.f32 %v5735_v43  ;;  %v5736_v22 = vadd.f32 1.0, %v9622_v45  ;;  %v11889_v44 = vpop.f32.mrf.mxu1  ;;  %v7621_v47 = vmul.f32 -1.442695, %v4557_v32 }
 0x7a0   : > { %v9626_v52 = vpop.eup %9625  ;;  %9651 = vrcp.f32 %v5734_v14  ;;  %v5740_v59 = vadd.f32 1.0, %v9624_v35  ;;  %v4562_v35 = vpop.f32.mrf.mxu0  ;;  %v7622_v54 = vmul.f32 -1.442695, %v4559_v38  ;;  %v7626_v51 = vmul.f32 -1.442695, %v4368_v46 }
 0x7a1   : > { %v9628_v34 = vpop.eup %9627  ;;  %9653 = vrcp.f32 %v5736_v22  ;;  %v5742_v49 = vadd.f32 1.0, %v9626_v52  ;;  %v11895_v1 = vpop.f32.mrf.mxu1  ;;  %v4561_v52 = vadd.f32 %v4560_v24, %v11772_v3 }
 0x7a2   : > { %v9630_v25 = vpop.eup %9629  ;;  %9655 = vrcp.f32 %v5740_v59  ;;  %v5741_v31 = vadd.f32 1.0, %v9628_v34  ;;  %v7620_v34 = vmul.f32 -1.442695, %v4366_v28 }
 0x7a3   : > { %v9632_v26 = vpop.eup %9631  ;;  %9657 = vrcp.f32 %v5742_v49  ;;  %v5743_v11 = vadd.f32 1.0, %v9630_v25  ;;  %v11900_v8 = vpop.f32.mrf.mxu1  ;;  %v4370_v49 = vadd.f32 %v11860_v33, %v11774_v6  ;;  %v4563_v25 = vadd.f32 %v4562_v35, %v11776_v60 }
 0x7a4   : > { %v9634_v40 = vpop.eup %9633  ;;  %9659 = vrcp.f32 %v5741_v31  ;;  %v7628_v33 = vmul.f32 -1.442695, %v4561_v52 }
 0x7a5   : > { %v9636_v0 = vpop.eup %9635  ;;  %9661 = vrcp.f32 %v5743_v11  ;;  %v11905_v27 = vpop.f32.mrf.mxu1 }
 0x7a6   : > { %v9638_v18 = vpop.eup %9637  ;;  %v7951_v17 = vpack.c.bf16 %v9636_v0, %v9632_v26  ;;  %9663 = vpow2.f32 %v7605_v41  ;;  %v11931_v26 = vpop.f32.mrf.mxu0  ;;  %v7629_v0 = vmul.f32 -1.442695, %v4563_v25 }
 0x7a7   : > { %v9640_v37 = vpop.eup %9639  ;;  %v7952_v4 = vpack.c.bf16 %v9638_v18, %v9634_v40  ;;  %9665 = vpow2.f32 %v7607_v58  ;;  %v11910_v21 = vpop.f32.mrf.mxu1 }
 0x7a8   : > { %v9642_v19 = vpop.eup %9641  ;;  %7084 = vst [vmem:[%s11827_s1 + $0x70] sm:$0xff] %v7951_v17  ;;  %9667 = vpow2.f32 %v7606_v9  ;;  %v7627_v9 = vmul.f32 -1.442695, %v4370_v49  ;;  %v4568_v17 = vpop.f32.mrf.mxu0 }
 0x7a9   : > { %v9644_v42 = vpop.eup %9643  ;;  %7085 = vst [vmem:[%s11827_s1 + $0x78] sm:$0xff] %v7952_v4  ;;  %9669 = vpow2.f32 %v7608_v62  ;;  %v11917_v43 = vpop.f32.mrf.mxu1 }
 0x7aa   : > { %v9646_v45 = vpop.eup %9645  ;;  %v7955_v14 = vpack.c.bf16 %v9644_v42, %v9640_v37  ;;  %9671 = vpow2.f32 %v7612_v61  ;;  %v4570_v28 = vpop.f32.mrf.mxu0 }
 0x7ab   : > { %v9648_v22 = vpop.eup %9647  ;;  %v7956_v7 = vpack.c.bf16 %v9646_v45, %v9642_v19  ;;  %9673 = vpow2.f32 %v7614_v10  ;;  %v11922_v59 = vpop.f32.mrf.mxu1 }
 0x7ac   : > { %v9650_v50 = vpop.eup %9649  ;;  %7088 = vst [vmem:[%s11827_s1 + $0x8c] sm:$0xff] %v7955_v14  ;;  %9675 = vpow2.f32 %v7613_v16 }
 0x7ad   : > { %v9652_v57 = vpop.eup %9651  ;;  %7089 = vst [vmem:[%s11827_s1 + $0x94] sm:$0xff] %v7956_v7  ;;  %9677 = vpow2.f32 %v7615_v20  ;;  %v11929_v31 = vpop.f32.mrf.mxu1 }
 0x7ae   : > { %v9654_v41 = vpop.eup %9653  ;;  %v7959_v63 = vpack.c.bf16 %v9652_v57, %v9648_v22  ;;  %9679 = vpow2.f32 %v7619_v29  ;;  %v4572_v7 = vpop.f32.mrf.mxu0 }
 0x7af   : > { %v9656_v11 = vpop.eup %9655  ;;  %v7960_v58 = vpack.c.bf16 %v9654_v41, %v9650_v50  ;;  %9681 = vpow2.f32 %v7621_v47  ;;  %v11933_v15 = vpop.f32.mrf.mxu1 }
 0x7b0   : > { %v9658_v40 = vpop.eup %9657  ;;  %7092 = vst [vmem:[%s11827_s1 + $0xa8] sm:$0xff] %v7959_v63  ;;  %9683 = vpow2.f32 %v7620_v34  ;;  %v4374_v63 = vadd.f32 %v11864_v39, %v11770_v53  ;;  %v4569_v39 = vadd.f32 %v4568_v17, %v11776_v60  ;;  %v4380_v17 = vadd.f32 %v11876_v23, %v11774_v6 }
 0x7b1   : > { %v9660_v36 = vpop.eup %9659  ;;  %7093 = vst [vmem:[%s11827_s1 + $0xb0] sm:$0xff] %v7960_v58  ;;  %9685 = vpow2.f32 %v7622_v54  ;;  %v11937_v62 = vpop.f32.mrf.mxu1 }
 0x7b2   : > { %v9662_v55 = vpop.eup %9661  ;;  %v7963_v18 = vpack.c.bf16 %v9660_v36, %v9656_v11  ;;  %9687 = vpow2.f32 %v7626_v51  ;;  %v4576_v51 = vpop.f32.mrf.mxu0 }
 0x7b3   : > { %v9664_v61 = vpop.eup %9663  ;;  %v7964_v5 = vpack.c.bf16 %v9662_v55, %v9658_v40  ;;  %9689 = vpow2.f32 %v7628_v33  ;;  %v11939_v24 = vpop.f32.mrf.mxu1  ;;  %v4567_v40 = vadd.f32 %v11931_v26, %v11772_v3 }
 0x7b4   : > { %v9666_v37 = vpop.eup %9665  ;;  %7096 = vst [vmem:[%s11827_s1 + $0xc4] sm:$0xff] %v7963_v18  ;;  %v5747_v4 = vadd.f32 1.0, %v9664_v61  ;;  %9691 = vpow2.f32 %v7627_v9 }
 0x7b5   : > { %v9668_v10 = vpop.eup %9667  ;;  %7097 = vst [vmem:[%s11827_s1 + $0xcc] sm:$0xff] %v7964_v5  ;;  %v5749_v32 = vadd.f32 1.0, %v9666_v37  ;;  %9693 = vpow2.f32 %v7629_v0  ;;  %v11943_v42 = vpop.f32.mrf.mxu1  ;;  %v4376_v0 = vadd.f32 %v11870_v12, %v11774_v6  ;;  %v7633_v37 = vmul.f32 -1.442695, %v4374_v63 }
 0x7b6   : > { %v9670_v19 = vpop.eup %9669  ;;  %9695 = vrcp.f32 %v5747_v4  ;;  %v5748_v16 = vadd.f32 1.0, %v9668_v10  ;;  %v4378_v4 = vadd.f32 %v11874_v48, %v11770_v53  ;;  %v4578_v10 = vpop.f32.mrf.mxu0  ;;  %v4571_v12 = vadd.f32 %v4570_v28, %v11772_v3 }
 0x7b7   : > { %v9672_v20 = vpop.eup %9671  ;;  %9697 = vrcp.f32 %v5749_v32  ;;  %v5750_v38 = vadd.f32 1.0, %v9670_v19  ;;  %v11945_v47 = vpop.f32.mrf.mxu1  ;;  %v4573_v48 = vadd.f32 %v4572_v7, %v11776_v60  ;;  %v4384_v28 = vadd.f32 %v11878_v56, %v11770_v53 }
 0x7b8   : > { %v9674_v45 = vpop.eup %9673  ;;  %9699 = vrcp.f32 %v5748_v16  ;;  %v5754_v14 = vadd.f32 1.0, %v9672_v20  ;;  %v7635_v16 = vmul.f32 -1.442695, %v4567_v40  ;;  %v7642_v23 = vmul.f32 -1.442695, %v4571_v12 }
 0x7b9   : > { %v9676_v29 = vpop.eup %9675  ;;  %9701 = vrcp.f32 %v5750_v38  ;;  %v5756_v46 = vadd.f32 1.0, %v9674_v45  ;;  %v11949_v11 = vpop.f32.mrf.mxu1  ;;  %v7634_v38 = vmul.f32 -1.442695, %v4376_v0  ;;  %v7641_v7 = vmul.f32 -1.442695, %v4380_v17 }
 0x7ba   : > { %v9678_v35 = vpop.eup %9677  ;;  %9703 = vrcp.f32 %v5754_v14  ;;  %v5755_v22 = vadd.f32 1.0, %v9676_v29  ;;  %v7636_v14 = vmul.f32 -1.442695, %v4569_v39  ;;  %v7643_v56 = vmul.f32 -1.442695, %v4573_v48 }
 0x7bb   : > { %v9680_v52 = vpop.eup %9679  ;;  %9705 = vrcp.f32 %v5756_v46  ;;  %v5757_v50 = vadd.f32 1.0, %v9678_v35  ;;  %v11958_v26 = vpop.f32.mrf.mxu1  ;;  %v7640_v35 = vmul.f32 -1.442695, %v4378_v4 }
 0x7bc   : > { %v9682_v34 = vpop.eup %9681  ;;  %9707 = vrcp.f32 %v5755_v22  ;;  %v5761_v49 = vadd.f32 1.0, %v9680_v52  ;;  %v4580_v22 = vpop.f32.mrf.mxu0 }
 0x7bd   : > { %v9684_v57 = vpop.eup %9683  ;;  %9709 = vrcp.f32 %v5757_v50  ;;  %v5763_v54 = vadd.f32 1.0, %v9682_v34  ;;  %v11966_v52 = vpop.f32.mrf.mxu1 }
 0x7be   : > { %v9686_v25 = vpop.eup %9685  ;;  %9711 = vrcp.f32 %v5761_v49  ;;  %v5762_v41 = vadd.f32 1.0, %v9684_v57  ;;  %v4577_v49 = vadd.f32 %v4576_v51, %v11772_v3  ;;  %v4388_v51 = vadd.f32 %v11883_v2, %v11770_v53  ;;  %v4582_v40 = vpop.f32.mrf.mxu0 }
 0x7bf   : > { %v9688_v58 = vpop.eup %9687  ;;  %9713 = vrcp.f32 %v5763_v54  ;;  %v5764_v33 = vadd.f32 1.0, %v9686_v25  ;;  %v4386_v54 = vadd.f32 %v11881_v30, %v11774_v6 }
 0x7c0   : > { %v9690_v9 = vpop.eup %9689  ;;  %9715 = vrcp.f32 %v5762_v41  ;;  %v5768_v36 = vadd.f32 1.0, %v9688_v58  ;;  %v4579_v41 = vadd.f32 %v4578_v10, %v11776_v60  ;;  %v7649_v0 = vmul.f32 -1.442695, %v4577_v49 }
 0x7c1   : > { %v9692_v55 = vpop.eup %9691  ;;  %9717 = vrcp.f32 %v5764_v33  ;;  %v5770_v18 = vadd.f32 1.0, %v9690_v9  ;;  %v7647_v33 = vmul.f32 -1.442695, %v4384_v28  ;;  %v11976_v9 = vpop.f32.mrf.mxu1  ;;  %v7648_v39 = vmul.f32 -1.442695, %v4386_v54 }
 0x7c2   : > { %v9694_v61 = vpop.eup %9693  ;;  %9719 = vrcp.f32 %v5768_v36  ;;  %v5769_v5 = vadd.f32 1.0, %v9692_v55  ;;  %v4581_v55 = vadd.f32 %v4580_v22, %v11772_v3  ;;  %v7650_v2 = vmul.f32 -1.442695, %v4579_v41 }
 0x7c3   : > { %v9696_v32 = vpop.eup %9695  ;;  %9721 = vrcp.f32 %v5770_v18  ;;  %v5771_v19 = vadd.f32 1.0, %v9694_v61  ;;  %v4390_v61 = vadd.f32 %v11889_v44, %v11774_v6 }
 0x7c4   : > { %v9698_v20 = vpop.eup %9697  ;;  %9723 = vrcp.f32 %v5769_v5  ;;  %v7656_v44 = vmul.f32 -1.442695, %v4581_v55 }
 0x7c5   : > { %v9700_v45 = vpop.eup %9699  ;;  %9725 = vrcp.f32 %v5771_v19  ;;  %v11984_v19 = vpop.f32.mrf.mxu0  ;;  %v7655_v17 = vmul.f32 -1.442695, %v4390_v61 }
 0x7c6   : > { %v9702_v29 = vpop.eup %9701  ;;  %v7967_v46 = vpack.c.bf16 %v9700_v45, %v9696_v32  ;;  %9727 = vpow2.f32 %v7633_v37  ;;  %v4583_v37 = vadd.f32 %v4582_v40, %v11776_v60  ;;  %v7654_v32 = vmul.f32 -1.442695, %v4388_v51 }
 0x7c7   : > { %v9704_v50 = vpop.eup %9703  ;;  %v7968_v34 = vpack.c.bf16 %v9702_v29, %v9698_v20  ;;  %9729 = vpow2.f32 %v7635_v16  ;;  %v11986_v16 = vpop.f32.mrf.mxu1 }
 0x7c8   : > { %v9706_v57 = vpop.eup %9705  ;;  %7100 = vst [vmem:[%s11827_s1 + $0xe0] sm:$0xff] %v7967_v46  ;;  %9731 = vpow2.f32 %v7634_v38  ;;  %v4588_v46 = vpop.f32.mrf.mxu0 }
 0x7c9   : > { %v9708_v25 = vpop.eup %9707  ;;  %7101 = vst [vmem:[%s11827_s1 + $0xe8] sm:$0xff] %v7968_v34  ;;  %9733 = vpow2.f32 %v7636_v14  ;;  %v7657_v14 = vmul.f32 -1.442695, %v4583_v37 }
 0x7ca   : > { %v9710_v63 = vpop.eup %9709  ;;  %v7971_v58 = vpack.c.bf16 %v9708_v25, %v9704_v50  ;;  %9735 = vpow2.f32 %v7640_v35  ;;  %v11990_v35 = vpop.f32.mrf.mxu1 }
 0x7cb   : > { %v9712_v36 = vpop.eup %9711  ;;  %v7972_v30 = vpack.c.bf16 %v9710_v63, %v9706_v57  ;;  %9737 = vpow2.f32 %v7642_v23  ;;  %v4590_v54 = vpop.f32.mrf.mxu0 }
 0x7cc   : > { %v9714_v18 = vpop.eup %9713  ;;  %7104 = vst [vmem:[%s11827_s1 + $0xfc] sm:$0xff] %v7971_v58  ;;  %9739 = vpow2.f32 %v7641_v7  ;;  %v11994_v25 = vpop.f32.mrf.mxu1 }
 0x7cd   : > { %v9716_v5 = vpop.eup %9715  ;;  %7105 = vst [vmem:[%s11827_s1 + $0x104] sm:$0xff] %v7972_v30  ;;  %9741 = vpow2.f32 %v7643_v56  ;;  %v4592_v30 = vpop.f32.mrf.mxu0 }
 0x7ce   : > { %v9718_v4 = vpop.eup %9717  ;;  %v7975_v10 = vpack.c.bf16 %v9716_v5, %v9712_v36  ;;  %9743 = vpow2.f32 %v7647_v33 }
 0x7cf   : > { %v9720_v12 = vpop.eup %9719  ;;  %v7976_v20 = vpack.c.bf16 %v9718_v4, %v9714_v18  ;;  %9745 = vpow2.f32 %v7649_v0  ;;  %v11996_v0 = vpop.f32.mrf.mxu1 }
 0x7d0   : > { %v9722_v38 = vpop.eup %9721  ;;  %7108 = vst [vmem:[%s11827_s1 + $0x118] sm:$0xff] %v7975_v10  ;;  %9747 = vpow2.f32 %v7648_v39  ;;  %v4394_v10 = vadd.f32 %v11895_v1, %v11770_v53  ;;  %v4589_v1 = vadd.f32 %v4588_v46, %v11776_v60  ;;  %v4400_v46 = vadd.f32 %v11910_v21, %v11774_v6 }
 0x7d1   : > { %v9724_v45 = vpop.eup %9723  ;;  %7109 = vst [vmem:[%s11827_s1 + $0x120] sm:$0xff] %v7976_v20  ;;  %9749 = vpow2.f32 %v7650_v2 }
 0x7d2   : > { %v9726_v48 = vpop.eup %9725  ;;  %v7979_v29 = vpack.c.bf16 %v9724_v45, %v9720_v12  ;;  %9751 = vpow2.f32 %v7654_v32  ;;  %v4596_v32 = vpop.f32.mrf.mxu0 }
 0x7d3   : > { %v9728_v28 = vpop.eup %9727  ;;  %v7980_v22 = vpack.c.bf16 %v9726_v48, %v9722_v38  ;;  %9753 = vpow2.f32 %v7656_v44  ;;  %v12000_v12 = vpop.f32.mrf.mxu1  ;;  %v4587_v38 = vadd.f32 %v11984_v19, %v11772_v3 }
 0x7d4   : > { %v9730_v50 = vpop.eup %9729  ;;  %7112 = vst [vmem:[%s11827_s1 + $0x134] sm:$0xff] %v7979_v29  ;;  %v5775_v34 = vadd.f32 1.0, %v9728_v28  ;;  %9755 = vpow2.f32 %v7655_v17 }
 0x7d5   : > { %v9732_v23 = vpop.eup %9731  ;;  %7113 = vst [vmem:[%s11827_s1 + $0x13c] sm:$0xff] %v7980_v22  ;;  %v5777_v49 = vadd.f32 1.0, %v9730_v50  ;;  %9757 = vpow2.f32 %v7657_v14  ;;  %v4396_v14 = vadd.f32 %v11900_v8, %v11774_v6  ;;  %v7661_v50 = vmul.f32 -1.442695, %v4394_v10  ;;  %v12009_v19 = vpop.f32.mrf.mxu1 }
 0x7d6   : > { %v9734_v57 = vpop.eup %9733  ;;  %9759 = vrcp.f32 %v5775_v34  ;;  %v5776_v7 = vadd.f32 1.0, %v9732_v23  ;;  %v4398_v34 = vadd.f32 %v11905_v27, %v11770_v53  ;;  %v4598_v23 = vpop.f32.mrf.mxu0  ;;  %v4591_v8 = vadd.f32 %v4590_v54, %v11772_v3 }
 0x7d7   : > { %v9736_v56 = vpop.eup %9735  ;;  %9761 = vrcp.f32 %v5777_v49  ;;  %v5778_v41 = vadd.f32 1.0, %v9734_v57  ;;  %v4593_v27 = vadd.f32 %v4592_v30, %v11776_v60  ;;  %v4404_v54 = vadd.f32 %v11917_v43, %v11770_v53 }
 0x7d8   : > { %v9738_v63 = vpop.eup %9737  ;;  %9763 = vrcp.f32 %v5776_v7  ;;  %v5782_v58 = vadd.f32 1.0, %v9736_v56  ;;  %v7663_v7 = vmul.f32 -1.442695, %v4587_v38  ;;  %v7670_v21 = vmul.f32 -1.442695, %v4591_v8 }
 0x7d9   : > { %v9740_v33 = vpop.eup %9739  ;;  %9765 = vrcp.f32 %v5778_v41  ;;  %v5784_v51 = vadd.f32 1.0, %v9738_v63  ;;  %v7662_v41 = vmul.f32 -1.442695, %v4396_v14  ;;  %v7669_v30 = vmul.f32 -1.442695, %v4400_v46 }
 0x7da   : > { %v9742_v40 = vpop.eup %9741  ;;  %9767 = vrcp.f32 %v5782_v58  ;;  %v5783_v36 = vadd.f32 1.0, %v9740_v33  ;;  %v7664_v58 = vmul.f32 -1.442695, %v4589_v1  ;;  %v7671_v43 = vmul.f32 -1.442695, %v4593_v27 }
 0x7db   : > { %v9744_v55 = vpop.eup %9743  ;;  %9769 = vrcp.f32 %v5784_v51  ;;  %v5785_v18 = vadd.f32 1.0, %v9742_v40  ;;  %v7668_v40 = vmul.f32 -1.442695, %v4398_v34 }
 0x7dc   : > { %v9746_v39 = vpop.eup %9745  ;;  %9771 = vrcp.f32 %v5783_v36  ;;  %v5789_v61 = vadd.f32 1.0, %v9744_v55  ;;  %v4600_v36 = vpop.f32.mrf.mxu0 }
 0x7dd   : > { %v9748_v5 = vpop.eup %9747  ;;  %9773 = vrcp.f32 %v5785_v18  ;;  %v5791_v2 = vadd.f32 1.0, %v9746_v39  ;;  %v12017_v55 = vpop.f32.mrf.mxu1 }
 0x7de   : > { %v9750_v37 = vpop.eup %9749  ;;  %9775 = vrcp.f32 %v5789_v61  ;;  %v5790_v4 = vadd.f32 1.0, %v9748_v5  ;;  %v4597_v61 = vadd.f32 %v4596_v32, %v11772_v3  ;;  %v4408_v32 = vadd.f32 %v11929_v31, %v11770_v53  ;;  %v4602_v38 = vpop.f32.mrf.mxu0 }
 0x7df   : > { %v9752_v20 = vpop.eup %9751  ;;  %9777 = vrcp.f32 %v5791_v2  ;;  %v5792_v44 = vadd.f32 1.0, %v9750_v37  ;;  %v4406_v2 = vadd.f32 %v11922_v59, %v11774_v6 }
 0x7e0   : > { %v9754_v17 = vpop.eup %9753  ;;  %9779 = vrcp.f32 %v5790_v4  ;;  %v5796_v45 = vadd.f32 1.0, %v9752_v20  ;;  %v4599_v4 = vadd.f32 %v4598_v23, %v11776_v60  ;;  %v7677_v14 = vmul.f32 -1.442695, %v4597_v61 }
 0x7e1   : > { %v9756_v48 = vpop.eup %9755  ;;  %9781 = vrcp.f32 %v5792_v44  ;;  %v5798_v29 = vadd.f32 1.0, %v9754_v17  ;;  %v7675_v44 = vmul.f32 -1.442695, %v4404_v54  ;;  %v12027_v17 = vpop.f32.mrf.mxu1  ;;  %v7676_v1 = vmul.f32 -1.442695, %v4406_v2 }
 0x7e2   : > { %v9758_v28 = vpop.eup %9757  ;;  %9783 = vrcp.f32 %v5796_v45  ;;  %v5797_v22 = vadd.f32 1.0, %v9756_v48  ;;  %v4601_v48 = vadd.f32 %v4600_v36, %v11772_v3  ;;  %v7678_v31 = vmul.f32 -1.442695, %v4599_v4 }
 0x7e3   : > { %v9760_v49 = vpop.eup %9759  ;;  %9785 = vrcp.f32 %v5798_v29  ;;  %v5799_v57 = vadd.f32 1.0, %v9758_v28  ;;  %v4410_v28 = vadd.f32 %v11933_v15, %v11774_v6 }
 0x7e4   : > { %v9762_v56 = vpop.eup %9761  ;;  %9787 = vrcp.f32 %v5797_v22  ;;  %v7684_v15 = vmul.f32 -1.442695, %v4601_v48 }
 0x7e5   : > { %v9764_v63 = vpop.eup %9763  ;;  %9789 = vrcp.f32 %v5799_v57  ;;  %v12035_v57 = vpop.f32.mrf.mxu0  ;;  %v7683_v46 = vmul.f32 -1.442695, %v4410_v28 }
 0x7e6   : > { %v9766_v33 = vpop.eup %9765  ;;  %v7983_v51 = vpack.c.bf16 %v9764_v63, %v9760_v49  ;;  %9791 = vpow2.f32 %v7661_v50  ;;  %v4603_v50 = vadd.f32 %v4602_v38, %v11776_v60  ;;  %v7682_v49 = vmul.f32 -1.442695, %v4408_v32 }
 0x7e7   : > { %v9768_v18 = vpop.eup %9767  ;;  %v7984_v39 = vpack.c.bf16 %v9766_v33, %v9762_v56  ;;  %9793 = vpow2.f32 %v7663_v7  ;;  %v12037_v7 = vpop.f32.mrf.mxu1 }
 0x7e8   : > { %v9770_v5 = vpop.eup %9769  ;;  %7116 = vst [vmem:[%s11827_s1 + $0x150] sm:$0xff] %v7983_v51  ;;  %9795 = vpow2.f32 %v7662_v41  ;;  %v4608_v51 = vpop.f32.mrf.mxu0 }
 0x7e9   : > { %v9772_v37 = vpop.eup %9771  ;;  %7117 = vst [vmem:[%s11827_s1 + $0x158] sm:$0xff] %v7984_v39  ;;  %9797 = vpow2.f32 %v7664_v58  ;;  %v7685_v58 = vmul.f32 -1.442695, %v4603_v50 }
 0x7ea   : > { %v9774_v10 = vpop.eup %9773  ;;  %v7987_v20 = vpack.c.bf16 %v9772_v37, %v9768_v18  ;;  %9799 = vpow2.f32 %v7668_v40  ;;  %v12041_v40 = vpop.f32.mrf.mxu1 }
 0x7eb   : > { %v9776_v45 = vpop.eup %9775  ;;  %v7988_v59 = vpack.c.bf16 %v9774_v10, %v9770_v5  ;;  %9801 = vpow2.f32 %v7670_v21  ;;  %v4610_v2 = vpop.f32.mrf.mxu0 }
 0x7ec   : > { %v9778_v29 = vpop.eup %9777  ;;  %7120 = vst [vmem:[%s11827_s1 + $0x16c] sm:$0xff] %v7987_v20  ;;  %9803 = vpow2.f32 %v7669_v30  ;;  %v12045_v37 = vpop.f32.mrf.mxu1 }
 0x7ed   : > { %v9780_v22 = vpop.eup %9779  ;;  %7121 = vst [vmem:[%s11827_s1 + $0x174] sm:$0xff] %v7988_v59  ;;  %9805 = vpow2.f32 %v7671_v43  ;;  %v4612_v59 = vpop.f32.mrf.mxu0 }
 0x7ee   : > { %v9782_v34 = vpop.eup %9781  ;;  %v7991_v23 = vpack.c.bf16 %v9780_v22, %v9776_v45  ;;  %9807 = vpow2.f32 %v7675_v44 }
 0x7ef   : > { %v9784_v8 = vpop.eup %9783  ;;  %v7992_v56 = vpack.c.bf16 %v9782_v34, %v9778_v29  ;;  %9809 = vpow2.f32 %v7677_v14  ;;  %v12047_v14 = vpop.f32.mrf.mxu1 }
 0x7f0   : > { %v9786_v41 = vpop.eup %9785  ;;  %7124 = vst [vmem:[%s11827_s1 + $0x188] sm:$0xff] %v7991_v23  ;;  %9811 = vpow2.f32 %v7676_v1  ;;  %v4414_v23 = vadd.f32 %v11937_v62, %v11770_v53  ;;  %v4609_v62 = vadd.f32 %v4608_v51, %v11776_v60  ;;  %v4420_v51 = vadd.f32 %v11945_v47, %v11774_v6 }
 0x7f1   : > { %v9788_v63 = vpop.eup %9787  ;;  %7125 = vst [vmem:[%s11827_s1 + $0x190] sm:$0xff] %v7992_v56  ;;  %9813 = vpow2.f32 %v7678_v31 }
 0x7f2   : > { %v9790_v27 = vpop.eup %9789  ;;  %v7995_v33 = vpack.c.bf16 %v9788_v63, %v9784_v8  ;;  %9815 = vpow2.f32 %v7682_v49  ;;  %v4616_v49 = vpop.f32.mrf.mxu0 }
 0x7f3   : > { %v9792_v54 = vpop.eup %9791  ;;  %v7996_v36 = vpack.c.bf16 %v9790_v27, %v9786_v41  ;;  %9817 = vpow2.f32 %v7684_v15  ;;  %v12051_v8 = vpop.f32.mrf.mxu1  ;;  %v4607_v41 = vadd.f32 %v12035_v57, %v11772_v3 }
 0x7f4   : > { %v9794_v18 = vpop.eup %9793  ;;  %7128 = vst [vmem:[%s11827_s1 + $0x1a4] sm:$0xff] %v7995_v33  ;;  %v5803_v39 = vadd.f32 1.0, %v9792_v54  ;;  %9819 = vpow2.f32 %v7683_v46 }
 0x7f5   : > { %v9796_v21 = vpop.eup %9795  ;;  %7129 = vst [vmem:[%s11827_s1 + $0x1ac] sm:$0xff] %v7996_v36  ;;  %v5805_v61 = vadd.f32 1.0, %v9794_v18  ;;  %9821 = vpow2.f32 %v7685_v58  ;;  %v4416_v58 = vadd.f32 %v11939_v24, %v11774_v6  ;;  %v7689_v18 = vmul.f32 -1.442695, %v4414_v23  ;;  %v12060_v57 = vpop.f32.mrf.mxu1 }
 0x7f6   : > { %v9798_v5 = vpop.eup %9797  ;;  %9823 = vrcp.f32 %v5803_v39  ;;  %v5804_v30 = vadd.f32 1.0, %v9796_v21  ;;  %v4418_v39 = vadd.f32 %v11943_v42, %v11770_v53  ;;  %v4618_v21 = vpop.f32.mrf.mxu0  ;;  %v4611_v24 = vadd.f32 %v4610_v2, %v11772_v3 }
 0x7f7   : > { %v9800_v43 = vpop.eup %9799  ;;  %9825 = vrcp.f32 %v5805_v61  ;;  %v5806_v4 = vadd.f32 1.0, %v9798_v5  ;;  %v4613_v42 = vadd.f32 %v4612_v59, %v11776_v60  ;;  %v4424_v2 = vadd.f32 %v11949_v11, %v11770_v53 }
 0x7f8   : > { %v9802_v10 = vpop.eup %9801  ;;  %9827 = vrcp.f32 %v5804_v30  ;;  %v5810_v20 = vadd.f32 1.0, %v9800_v43  ;;  %v7691_v30 = vmul.f32 -1.442695, %v4607_v41  ;;  %v7698_v47 = vmul.f32 -1.442695, %v4611_v24 }
 0x7f9   : > { %v9804_v44 = vpop.eup %9803  ;;  %9829 = vrcp.f32 %v5806_v4  ;;  %v5812_v32 = vadd.f32 1.0, %v9802_v10  ;;  %v7690_v4 = vmul.f32 -1.442695, %v4416_v58  ;;  %v7697_v59 = vmul.f32 -1.442695, %v4420_v51 }
 0x7fa   : > { %v9806_v38 = vpop.eup %9805  ;;  %9831 = vrcp.f32 %v5810_v20  ;;  %v5811_v45 = vadd.f32 1.0, %v9804_v44  ;;  %v7692_v20 = vmul.f32 -1.442695, %v4609_v62  ;;  %v7699_v11 = vmul.f32 -1.442695, %v4613_v42 }
 0x7fb   : > { %v9808_v48 = vpop.eup %9807  ;;  %9833 = vrcp.f32 %v5812_v32  ;;  %v5813_v29 = vadd.f32 1.0, %v9806_v38  ;;  %v7696_v38 = vmul.f32 -1.442695, %v4418_v39 }
 0x7fc   : > { %v9810_v1 = vpop.eup %9809  ;;  %9835 = vrcp.f32 %v5811_v45  ;;  %v5817_v28 = vadd.f32 1.0, %v9808_v48  ;;  %v4620_v45 = vpop.f32.mrf.mxu0 }
 0x7fd   : > { %v9812_v22 = vpop.eup %9811  ;;  %9837 = vrcp.f32 %v5813_v29  ;;  %v5819_v31 = vadd.f32 1.0, %v9810_v1  ;;  %v12068_v48 = vpop.f32.mrf.mxu1 }
 0x7fe   : > { %v9814_v50 = vpop.eup %9813  ;;  %9839 = vrcp.f32 %v5817_v28  ;;  %v5818_v34 = vadd.f32 1.0, %v9812_v22  ;;  %v4617_v28 = vadd.f32 %v4616_v49, %v11772_v3  ;;  %v4428_v49 = vadd.f32 %v11966_v52, %v11770_v53  ;;  %v4622_v41 = vpop.f32.mrf.mxu0 }
 0x7ff   : > { %v9816_v56 = vpop.eup %9815  ;;  %9841 = vrcp.f32 %v5819_v31  ;;  %v5820_v15 = vadd.f32 1.0, %v9814_v50  ;;  %v4426_v31 = vadd.f32 %v11958_v26, %v11774_v6 }
 0x800   : > { %v9818_v46 = vpop.eup %9817  ;;  %9843 = vrcp.f32 %v5818_v34  ;;  %v5824_v63 = vadd.f32 1.0, %v9816_v56  ;;  %v4619_v34 = vadd.f32 %v4618_v21, %v11776_v60  ;;  %v7705_v58 = vmul.f32 -1.442695, %v4617_v28 }
 0x801   : > { %v9820_v27 = vpop.eup %9819  ;;  %9845 = vrcp.f32 %v5820_v15  ;;  %v5826_v33 = vadd.f32 1.0, %v9818_v46  ;;  %v7703_v15 = vmul.f32 -1.442695, %v4424_v2  ;;  %v12078_v46 = vpop.f32.mrf.mxu1  ;;  %v7704_v62 = vmul.f32 -1.442695, %v4426_v31 }
 0x802   : > { %v9822_v54 = vpop.eup %9821  ;;  %9847 = vrcp.f32 %v5824_v63  ;;  %v5825_v36 = vadd.f32 1.0, %v9820_v27  ;;  %v4621_v27 = vadd.f32 %v4620_v45, %v11772_v3  ;;  %v7706_v52 = vmul.f32 -1.442695, %v4619_v34 }
 0x803   : > { %v9824_v61 = vpop.eup %9823  ;;  %9849 = vrcp.f32 %v5826_v33  ;;  %v5827_v5 = vadd.f32 1.0, %v9822_v54  ;;  %v4430_v54 = vadd.f32 %v11976_v9, %v11774_v6 }
 0x804   : > { %v9826_v43 = vpop.eup %9825  ;;  %9851 = vrcp.f32 %v5825_v36  ;;  %v7712_v9 = vmul.f32 -1.442695, %v4621_v27 }
 0x805   : > { %v9828_v10 = vpop.eup %9827  ;;  %9853 = vrcp.f32 %v5827_v5  ;;  %v12086_v5 = vpop.f32.mrf.mxu0  ;;  %v7711_v51 = vmul.f32 -1.442695, %v4430_v54 }
 0x806   : > { %v9830_v44 = vpop.eup %9829  ;;  %v7999_v32 = vpack.c.bf16 %v9828_v10, %v9824_v61  ;;  %9855 = vpow2.f32 %v7689_v18  ;;  %v4623_v18 = vadd.f32 %v4622_v41, %v11776_v60  ;;  %v7710_v61 = vmul.f32 -1.442695, %v4428_v49 }
 0x807   : > { %v9832_v29 = vpop.eup %9831  ;;  %v8000_v1 = vpack.c.bf16 %v9830_v44, %v9826_v43  ;;  %9857 = vpow2.f32 %v7691_v30  ;;  %v12088_v30 = vpop.f32.mrf.mxu1 }
 0x808   : > { %v9834_v22 = vpop.eup %9833  ;;  %7132 = vst [vmem:[%s11827_s1 + $0x1c0] sm:$0xff] %v7999_v32  ;;  %9859 = vpow2.f32 %v7690_v4  ;;  %v4628_v32 = vpop.f32.mrf.mxu0 }
 0x809   : > { %v9836_v50 = vpop.eup %9835  ;;  %7133 = vst [vmem:[%s11827_s1 + $0x1c8] sm:$0xff] %v8000_v1  ;;  %9861 = vpow2.f32 %v7692_v20  ;;  %v7713_v20 = vmul.f32 -1.442695, %v4623_v18 }
 0x80a   : > { %v9838_v23 = vpop.eup %9837  ;;  %v8003_v56 = vpack.c.bf16 %v9836_v50, %v9832_v29  ;;  %9863 = vpow2.f32 %v7696_v38  ;;  %v12092_v38 = vpop.f32.mrf.mxu1 }
 0x80b   : > { %v9840_v63 = vpop.eup %9839  ;;  %v8004_v26 = vpack.c.bf16 %v9838_v23, %v9834_v22  ;;  %9865 = vpow2.f32 %v7698_v47  ;;  %v4630_v31 = vpop.f32.mrf.mxu0 }
 0x80c   : > { %v9842_v33 = vpop.eup %9841  ;;  %7136 = vst [vmem:[%s11827_s1 + $0x1dc] sm:$0xff] %v8003_v56  ;;  %9867 = vpow2.f32 %v7697_v59  ;;  %v12096_v50 = vpop.f32.mrf.mxu1 }
 0x80d   : > { %v9844_v36 = vpop.eup %9843  ;;  %7137 = vst [vmem:[%s11827_s1 + $0x1e4] sm:$0xff] %v8004_v26  ;;  %9869 = vpow2.f32 %v7699_v11  ;;  %v4632_v26 = vpop.f32.mrf.mxu0 }
 0x80e   : > { %v9846_v39 = vpop.eup %9845  ;;  %v8007_v21 = vpack.c.bf16 %v9844_v36, %v9840_v63  ;;  %9871 = vpow2.f32 %v7703_v15 }
 0x80f   : > { %v9848_v24 = vpop.eup %9847  ;;  %v8008_v43 = vpack.c.bf16 %v9846_v39, %v9842_v33  ;;  %9873 = vpow2.f32 %v7705_v58  ;;  %v12098_v58 = vpop.f32.mrf.mxu1 }
 0x810   : > { %v9850_v4 = vpop.eup %9849  ;;  %7140 = vst [vmem:[%s11827_s1 + $0x1f8] sm:$0xff] %v8007_v21  ;;  %9875 = vpow2.f32 %v7704_v62  ;;  %v4434_v21 = vadd.f32 %v11986_v16, %v11770_v53  ;;  %v4629_v16 = vadd.f32 %v4628_v32, %v11776_v60  ;;  %v4440_v32 = vadd.f32 %v11996_v0, %v11774_v6 }
 0x811   : > { %v9852_v10 = vpop.eup %9851  ;;  %7141 = vst [vmem:[%s11827_s1 + $0x200] sm:$0xff] %v8008_v43  ;;  %9877 = vpow2.f32 %v7706_v52 }
 0x812   : > { %v9854_v42 = vpop.eup %9853  ;;  %v8011_v44 = vpack.c.bf16 %v9852_v10, %v9848_v24  ;;  %9879 = vpow2.f32 %v7710_v61  ;;  %v4636_v61 = vpop.f32.mrf.mxu0 }
 0x813   : > { %v9856_v2 = vpop.eup %9855  ;;  %v8012_v45 = vpack.c.bf16 %v9854_v42, %v9850_v4  ;;  %9881 = vpow2.f32 %v7712_v9  ;;  %v12102_v24 = vpop.f32.mrf.mxu1  ;;  %v4627_v4 = vadd.f32 %v12086_v5, %v11772_v3 }
 0x814   : > { %v9858_v29 = vpop.eup %9857  ;;  %7144 = vst [vmem:[%s11827_s1 + $0x214] sm:$0xff] %v8011_v44  ;;  %v5831_v1 = vadd.f32 1.0, %v9856_v2  ;;  %9883 = vpow2.f32 %v7711_v51 }
 0x815   : > { %v9860_v47 = vpop.eup %9859  ;;  %7145 = vst [vmem:[%s11827_s1 + $0x21c] sm:$0xff] %v8012_v45  ;;  %v5833_v28 = vadd.f32 1.0, %v9858_v29  ;;  %9885 = vpow2.f32 %v7713_v20  ;;  %v4436_v20 = vadd.f32 %v11990_v35, %v11774_v6  ;;  %v7717_v29 = vmul.f32 -1.442695, %v4434_v21  ;;  %v12111_v5 = vpop.f32.mrf.mxu1 }
 0x816   : > { %v9862_v22 = vpop.eup %9861  ;;  %9887 = vrcp.f32 %v5831_v1  ;;  %v5832_v59 = vadd.f32 1.0, %v9860_v47  ;;  %v4438_v1 = vadd.f32 %v11994_v25, %v11770_v53  ;;  %v4638_v47 = vpop.f32.mrf.mxu0  ;;  %v4631_v35 = vadd.f32 %v4630_v31, %v11772_v3 }
 0x817   : > { %v9864_v11 = vpop.eup %9863  ;;  %9889 = vrcp.f32 %v5833_v28  ;;  %v5834_v34 = vadd.f32 1.0, %v9862_v22  ;;  %v4633_v25 = vadd.f32 %v4632_v26, %v11776_v60  ;;  %v4444_v31 = vadd.f32 %v12000_v12, %v11770_v53 }
 0x818   : > { %v9866_v23 = vpop.eup %9865  ;;  %9891 = vrcp.f32 %v5832_v59  ;;  %v5838_v56 = vadd.f32 1.0, %v9864_v11  ;;  %v7719_v59 = vmul.f32 -1.442695, %v4627_v4  ;;  %v7726_v0 = vmul.f32 -1.442695, %v4631_v35 }
 0x819   : > { %v9868_v15 = vpop.eup %9867  ;;  %9893 = vrcp.f32 %v5834_v34  ;;  %v5840_v49 = vadd.f32 1.0, %v9866_v23  ;;  %v7718_v34 = vmul.f32 -1.442695, %v4436_v20  ;;  %v7725_v26 = vmul.f32 -1.442695, %v4440_v32 }
 0x81a   : > { %v9870_v41 = vpop.eup %9869  ;;  %9895 = vrcp.f32 %v5838_v56  ;;  %v5839_v63 = vadd.f32 1.0, %v9868_v15  ;;  %v7720_v56 = vmul.f32 -1.442695, %v4629_v16  ;;  %v7727_v12 = vmul.f32 -1.442695, %v4633_v25 }
 0x81b   : > { %v9872_v27 = vpop.eup %9871  ;;  %9897 = vrcp.f32 %v5840_v49  ;;  %v5841_v33 = vadd.f32 1.0, %v9870_v41  ;;  %v7724_v41 = vmul.f32 -1.442695, %v4438_v1 }
 0x81c   : > { %v9874_v62 = vpop.eup %9873  ;;  %9899 = vrcp.f32 %v5839_v63  ;;  %v5845_v54 = vadd.f32 1.0, %v9872_v27  ;;  %v4640_v63 = vpop.f32.mrf.mxu0 }
 0x81d   : > { %v9876_v36 = vpop.eup %9875  ;;  %9901 = vrcp.f32 %v5841_v33  ;;  %v5847_v52 = vadd.f32 1.0, %v9874_v62  ;;  %v12119_v27 = vpop.f32.mrf.mxu1 }
 0x81e   : > { %v9878_v18 = vpop.eup %9877  ;;  %9903 = vrcp.f32 %v5845_v54  ;;  %v5846_v39 = vadd.f32 1.0, %v9876_v36  ;;  %v4637_v54 = vadd.f32 %v4636_v61, %v11772_v3  ;;  %v4448_v61 = vadd.f32 %v12017_v55, %v11770_v53  ;;  %v4642_v4 = vpop.f32.mrf.mxu0 }
 0x81f   : > { %v9880_v43 = vpop.eup %9879  ;;  %9905 = vrcp.f32 %v5847_v52  ;;  %v5848_v9 = vadd.f32 1.0, %v9878_v18  ;;  %v4446_v52 = vadd.f32 %v12009_v19, %v11774_v6 }
 0x820   : > { %v9882_v51 = vpop.eup %9881  ;;  %9907 = vrcp.f32 %v5846_v39  ;;  %v5852_v10 = vadd.f32 1.0, %v9880_v43  ;;  %v4639_v39 = vadd.f32 %v4638_v47, %v11776_v60  ;;  %v7733_v20 = vmul.f32 -1.442695, %v4637_v54 }
 0x821   : > { %v9884_v42 = vpop.eup %9883  ;;  %9909 = vrcp.f32 %v5848_v9  ;;  %v5854_v44 = vadd.f32 1.0, %v9882_v51  ;;  %v7731_v9 = vmul.f32 -1.442695, %v4444_v31  ;;  %v12129_v51 = vpop.f32.mrf.mxu1  ;;  %v7732_v16 = vmul.f32 -1.442695, %v4446_v52 }
 0x822   : > { %v9886_v2 = vpop.eup %9885  ;;  %9911 = vrcp.f32 %v5852_v10  ;;  %v5853_v45 = vadd.f32 1.0, %v9884_v42  ;;  %v4641_v42 = vadd.f32 %v4640_v63, %v11772_v3  ;;  %v7734_v55 = vmul.f32 -1.442695, %v4639_v39 }
 0x823   : > { %v9888_v28 = vpop.eup %9887  ;;  %9913 = vrcp.f32 %v5854_v44  ;;  %v5855_v22 = vadd.f32 1.0, %v9886_v2  ;;  %v4450_v2 = vadd.f32 %v12027_v17, %v11774_v6 }
 0x824   : > { %v9890_v11 = vpop.eup %9889  ;;  %9915 = vrcp.f32 %v5853_v45  ;;  %v7740_v17 = vmul.f32 -1.442695, %v4641_v42 }
 0x825   : > { %v9892_v23 = vpop.eup %9891  ;;  %9917 = vrcp.f32 %v5855_v22  ;;  %v12137_v22 = vpop.f32.mrf.mxu0  ;;  %v7739_v32 = vmul.f32 -1.442695, %v4450_v2 }
 0x826   : > { %v9894_v15 = vpop.eup %9893  ;;  %v8015_v49 = vpack.c.bf16 %v9892_v23, %v9888_v28  ;;  %9919 = vpow2.f32 %v7717_v29  ;;  %v4643_v29 = vadd.f32 %v4642_v4, %v11776_v60  ;;  %v7738_v28 = vmul.f32 -1.442695, %v4448_v61 }
 0x827   : > { %v9896_v33 = vpop.eup %9895  ;;  %v8016_v62 = vpack.c.bf16 %v9894_v15, %v9890_v11  ;;  %9921 = vpow2.f32 %v7719_v59  ;;  %v12139_v59 = vpop.f32.mrf.mxu1 }
 0x828   : > { %v9898_v36 = vpop.eup %9897  ;;  %7148 = vst [vmem:[%s11827_s1 + $0x230] sm:$0xff] %v8015_v49  ;;  %9923 = vpow2.f32 %v7718_v34  ;;  %v4648_v49 = vpop.f32.mrf.mxu0 }
 0x829   : > { %v9900_v18 = vpop.eup %9899  ;;  %7149 = vst [vmem:[%s11827_s1 + $0x238] sm:$0xff] %v8016_v62  ;;  %9925 = vpow2.f32 %v7720_v56  ;;  %v7741_v56 = vmul.f32 -1.442695, %v4643_v29 }
 0x82a   : > { %v9902_v21 = vpop.eup %9901  ;;  %v8019_v43 = vpack.c.bf16 %v9900_v18, %v9896_v33  ;;  %9927 = vpow2.f32 %v7724_v41  ;;  %v12143_v41 = vpop.f32.mrf.mxu1 }
 0x82b   : > { %v9904_v10 = vpop.eup %9903  ;;  %v8020_v19 = vpack.c.bf16 %v9902_v21, %v9898_v36  ;;  %9929 = vpow2.f32 %v7726_v0  ;;  %v4650_v52 = vpop.f32.mrf.mxu0 }
 0x82c   : > { %v9906_v44 = vpop.eup %9905  ;;  %7152 = vst [vmem:[%s11827_s1 + $0x24c] sm:$0xff] %v8019_v43  ;;  %9931 = vpow2.f32 %v7725_v26  ;;  %v12147_v18 = vpop.f32.mrf.mxu1 }
 0x82d   : > { %v9908_v45 = vpop.eup %9907  ;;  %7153 = vst [vmem:[%s11827_s1 + $0x254] sm:$0xff] %v8020_v19  ;;  %9933 = vpow2.f32 %v7727_v12  ;;  %v4652_v19 = vpop.f32.mrf.mxu0 }
 0x82e   : > { %v9910_v1 = vpop.eup %9909  ;;  %v8023_v47 = vpack.c.bf16 %v9908_v45, %v9904_v10  ;;  %9935 = vpow2.f32 %v7731_v9 }
 0x82f   : > { %v9912_v35 = vpop.eup %9911  ;;  %v8024_v11 = vpack.c.bf16 %v9910_v1, %v9906_v44  ;;  %9937 = vpow2.f32 %v7733_v20  ;;  %v12149_v20 = vpop.f32.mrf.mxu1 }
 0x830   : > { %v9914_v34 = vpop.eup %9913  ;;  %7156 = vst [vmem:[%s11827_s1 + $0x268] sm:$0xff] %v8023_v47  ;;  %9939 = vpow2.f32 %v7732_v16  ;;  %v4454_v47 = vadd.f32 %v12037_v7, %v11770_v53  ;;  %v4649_v7 = vadd.f32 %v4648_v49, %v11776_v60  ;;  %v4460_v49 = vadd.f32 %v12047_v14, %v11774_v6 }
 0x831   : > { %v9916_v23 = vpop.eup %9915  ;;  %7157 = vst [vmem:[%s11827_s1 + $0x270] sm:$0xff] %v8024_v11  ;;  %9941 = vpow2.f32 %v7734_v55 }
 0x832   : > { %v9918_v25 = vpop.eup %9917  ;;  %v8027_v15 = vpack.c.bf16 %v9916_v23, %v9912_v35  ;;  %9943 = vpow2.f32 %v7738_v28  ;;  %v4656_v28 = vpop.f32.mrf.mxu0 }
 0x833   : > { %v9920_v31 = vpop.eup %9919  ;;  %v8028_v63 = vpack.c.bf16 %v9918_v25, %v9914_v34  ;;  %9945 = vpow2.f32 %v7740_v17  ;;  %v12153_v35 = vpop.f32.mrf.mxu1  ;;  %v4647_v34 = vadd.f32 %v12137_v22, %v11772_v3 }
 0x834   : > { %v9922_v33 = vpop.eup %9921  ;;  %7160 = vst [vmem:[%s11827_s1 + $0x284] sm:$0xff] %v8027_v15  ;;  %v5859_v62 = vadd.f32 1.0, %v9920_v31  ;;  %9947 = vpow2.f32 %v7739_v32 }
 0x835   : > { %v9924_v0 = vpop.eup %9923  ;;  %7161 = vst [vmem:[%s11827_s1 + $0x28c] sm:$0xff] %v8028_v63  ;;  %v5861_v54 = vadd.f32 1.0, %v9922_v33  ;;  %9949 = vpow2.f32 %v7741_v56  ;;  %v4456_v56 = vadd.f32 %v12041_v40, %v11774_v6  ;;  %v7745_v33 = vmul.f32 -1.442695, %v4454_v47  ;;  %v12162_v22 = vpop.f32.mrf.mxu1 }
 0x836   : > { %v9926_v36 = vpop.eup %9925  ;;  %9951 = vrcp.f32 %v5859_v62  ;;  %v5860_v26 = vadd.f32 1.0, %v9924_v0  ;;  %v4458_v62 = vadd.f32 %v12045_v37, %v11770_v53  ;;  %v4658_v0 = vpop.f32.mrf.mxu0  ;;  %v4651_v40 = vadd.f32 %v4650_v52, %v11772_v3 }
 0x837   : > { %v9928_v12 = vpop.eup %9927  ;;  %9953 = vrcp.f32 %v5861_v54  ;;  %v5862_v39 = vadd.f32 1.0, %v9926_v36  ;;  %v4653_v37 = vadd.f32 %v4652_v19, %v11776_v60  ;;  %v4464_v52 = vadd.f32 %v12051_v8, %v11770_v53 }
 0x838   : > { %v9930_v21 = vpop.eup %9929  ;;  %9955 = vrcp.f32 %v5860_v26  ;;  %v5866_v43 = vadd.f32 1.0, %v9928_v12  ;;  %v7747_v26 = vmul.f32 -1.442695, %v4647_v34  ;;  %v7754_v14 = vmul.f32 -1.442695, %v4651_v40 }
 0x839   : > { %v9932_v9 = vpop.eup %9931  ;;  %9957 = vrcp.f32 %v5862_v39  ;;  %v5868_v61 = vadd.f32 1.0, %v9930_v21  ;;  %v7746_v39 = vmul.f32 -1.442695, %v4456_v56  ;;  %v7753_v19 = vmul.f32 -1.442695, %v4460_v49 }
 0x83a   : > { %v9934_v4 = vpop.eup %9933  ;;  %9959 = vrcp.f32 %v5866_v43  ;;  %v5867_v10 = vadd.f32 1.0, %v9932_v9  ;;  %v7748_v43 = vmul.f32 -1.442695, %v4649_v7  ;;  %v7755_v8 = vmul.f32 -1.442695, %v4653_v37 }
 0x83b   : > { %v9936_v42 = vpop.eup %9935  ;;  %9961 = vrcp.f32 %v5868_v61  ;;  %v5869_v44 = vadd.f32 1.0, %v9934_v4  ;;  %v7752_v4 = vmul.f32 -1.442695, %v4458_v62 }
 0x83c   : > { %v9938_v16 = vpop.eup %9937  ;;  %9963 = vrcp.f32 %v5867_v10  ;;  %v5873_v2 = vadd.f32 1.0, %v9936_v42  ;;  %v4660_v10 = vpop.f32.mrf.mxu0 }
 0x83d   : > { %v9940_v45 = vpop.eup %9939  ;;  %9965 = vrcp.f32 %v5869_v44  ;;  %v5875_v55 = vadd.f32 1.0, %v9938_v16  ;;  %v12170_v42 = vpop.f32.mrf.mxu1 }
 0x83e   : > { %v9942_v29 = vpop.eup %9941  ;;  %9967 = vrcp.f32 %v5873_v2  ;;  %v5874_v1 = vadd.f32 1.0, %v9940_v45  ;;  %v4657_v2 = vadd.f32 %v4656_v28, %v11772_v3  ;;  %v4468_v28 = vadd.f32 %v12068_v48, %v11770_v53  ;;  %v4662_v34 = vpop.f32.mrf.mxu0 }
 0x83f   : > { %v9944_v11 = vpop.eup %9943  ;;  %9969 = vrcp.f32 %v5875_v55  ;;  %v5876_v17 = vadd.f32 1.0, %v9942_v29  ;;  %v4466_v55 = vadd.f32 %v12060_v57, %v11774_v6  ;;  %v4663_v48 = vadd.f32 %v4662_v34, %v11776_v60 }
 0x840   : > { %v9946_v32 = vpop.eup %9945  ;;  %9971 = vrcp.f32 %v5874_v1  ;;  %v5880_v23 = vadd.f32 1.0, %v9944_v11  ;;  %v4659_v1 = vadd.f32 %v4658_v0, %v11776_v60  ;;  %v7761_v56 = vmul.f32 -1.442695, %v4657_v2 }
 0x841   : > { %v9948_v25 = vpop.eup %9947  ;;  %9973 = vrcp.f32 %v5876_v17  ;;  %v5882_v15 = vadd.f32 1.0, %v9946_v32  ;;  %v7759_v17 = vmul.f32 -1.442695, %v4464_v52  ;;  %v12180_v32 = vpop.f32.mrf.mxu1  ;;  %v7760_v7 = vmul.f32 -1.442695, %v4466_v55 }
 0x842   : > { %v9950_v31 = vpop.eup %9949  ;;  %9975 = vrcp.f32 %v5880_v23  ;;  %v5881_v63 = vadd.f32 1.0, %v9948_v25  ;;  %v4661_v25 = vadd.f32 %v4660_v10, %v11772_v3  ;;  %v7762_v53 = vmul.f32 -1.442695, %v4659_v1  ;;  %v12188_v3 = vpop.f32.mrf.mxu0 }
 0x843   : > { %v9952_v54 = vpop.eup %9951  ;;  %9977 = vrcp.f32 %v5882_v15  ;;  %v5883_v36 = vadd.f32 1.0, %v9950_v31  ;;  %v4470_v31 = vadd.f32 %v12078_v46, %v11774_v6  ;;  %v7766_v0 = vmul.f32 -1.442695, %v4468_v28 }
 0x844   : > { %v9954_v12 = vpop.eup %9953  ;;  %9979 = vrcp.f32 %v5881_v63  ;;  %v7768_v6 = vmul.f32 -1.442695, %v4661_v25  ;;  %v7769_v60 = vmul.f32 -1.442695, %v4663_v48 }
 0x845   : > { %v9956_v21 = vpop.eup %9955  ;;  %9981 = vrcp.f32 %v5883_v36  ;;  %v7767_v40 = vmul.f32 -1.442695, %v4470_v31 }
 0x846   : > { %v9958_v9 = vpop.eup %9957  ;;  %v8031_v61 = vpack.c.bf16 %v9956_v21, %v9952_v54  ;;  %9983 = vpow2.f32 %v7745_v33  ;;  %v12190_v54 = vpop.f32.mrf.mxu1 }
 0x847   : > { %v9960_v44 = vpop.eup %9959  ;;  %v8032_v16 = vpack.c.bf16 %v9958_v9, %v9954_v12  ;;  %9985 = vpow2.f32 %v7747_v26  ;;  %v12194_v21 = vpop.f32.mrf.mxu0 }
 0x848   : > { %v9962_v45 = vpop.eup %9961  ;;  %7164 = vst [vmem:[%s11827_s1 + $0x2a0] sm:$0xff] %v8031_v61  ;;  %9987 = vpow2.f32 %v7746_v39 }
 0x849   : > { %v9964_v29 = vpop.eup %9963  ;;  %7165 = vst [vmem:[%s11827_s1 + $0x2a8] sm:$0xff] %v8032_v16  ;;  %9989 = vpow2.f32 %v7748_v43  ;;  %v12196_v43 = vpop.f32.mrf.mxu1 }
 0x84a   : > { %v9966_v47 = vpop.eup %9965  ;;  %v8035_v11 = vpack.c.bf16 %v9964_v29, %v9960_v44  ;;  %9991 = vpow2.f32 %v7752_v4  ;;  %v8954_v2 = vpop.f32.mrf.mxu0  ;;  %v3982_v29 = vsub.s32 6, %v11758_v13 }
 0x84b   : > { %v9968_v23 = vpop.eup %9967  ;;  %v8036_v57 = vpack.c.bf16 %v9966_v47, %v9962_v45  ;;  %9993 = vpow2.f32 %v7754_v14  ;;  %v3974_v14 = vsub.s32 4, %v11758_v13  ;;  %v12201_v45 = vpop.f32.mrf.mxu1  ;;  %v3978_v47 = vsub.s32 5, %v11758_v13 }
 0x84c   : > { %v9970_v15 = vpop.eup %9969  ;;  %7168 = vst [vmem:[%s11827_s1 + $0x2bc] sm:$0xff] %v8035_v11  ;;  %9995 = vpow2.f32 %v7753_v19 }
 0x84d   : > { %v9972_v63 = vpop.eup %9971  ;;  %7169 = vst [vmem:[%s11827_s1 + $0x2c4] sm:$0xff] %v8036_v57  ;;  %9997 = vpow2.f32 %v7755_v8  ;;  %v12210_v25 = vpop.f32.mrf.mxu1 }
 0x84e   : > { %v9974_v33 = vpop.eup %9973  ;;  %v8039_v62 = vpack.c.bf16 %v9972_v63, %v9968_v23  ;;  %9999 = vpow2.f32 %v7759_v17  ;;  %v10431_v23 = vld [vmem:[%s12586_s16] sm:$0x7f] }
 0x84f   : > { %v9976_v36 = vpop.eup %9975  ;;  %v8040_v26 = vpack.c.bf16 %v9974_v33, %v9970_v15  ;;  %10001 = vpow2.f32 %v7761_v56  ;;  %v12208_v57 = vrot.slane %v10431_v23, %v3974_v14  ;;  %v4895_v56 = vpop.f32.mrf.mxu0  ;;  %v12212_v31 = vrot.slane %v10431_v23, %v3982_v29 }
 0x850   : > { %v9978_v46 = vpop.eup %9977  ;;  %7172 = vst [vmem:[%s11827_s1 + $0x2d8] sm:$0xff] %v8039_v62  ;;  %10003 = vpow2.f32 %v7760_v7 }
 0x851   : > { %v9980_v12 = vpop.eup %9979  ;;  %7173 = vst [vmem:[%s11827_s1 + $0x2e0] sm:$0xff] %v8040_v26  ;;  %10005 = vpow2.f32 %v7762_v53  ;;  %v12214_v53 = vrot.slane %v10431_v23, %v3978_v47  ;;  %v8957_v26 = vpop.f32.mrf.mxu0 }
 0x852   : > { %v9982_v39 = vpop.eup %9981  ;;  %v8043_v49 = vpack.c.bf16 %v9980_v12, %v9976_v36  ;;  %10007 = vpow2.f32 %v7766_v0  ;;  %v4700_v36 = vadd.f32 %v12088_v30, %v12208_v57  ;;  %v4901_v12 = vadd.f32 %v12188_v3, %v12212_v31 }
 0x853   : > { %v9984_v37 = vpop.eup %9983  ;;  %v8044_v9 = vpack.c.bf16 %v9982_v39, %v9978_v46  ;;  %10009 = vpow2.f32 %v7768_v6  ;;  %v12218_v6 = vpop.f32.mrf.mxu1  ;;  %v4893_v30 = vadd.f32 %v12194_v21, %v12212_v31  ;;  %v4706_v21 = vadd.f32 %v12098_v58, %v12214_v53 }
 0x854   : > { %v9986_v61 = vpop.eup %9985  ;;  %7176 = vst [vmem:[%s11827_s1 + $0x2f4] sm:$0xff] %v8043_v49  ;;  %v5887_v4 = vadd.f32 1.0, %v9984_v37  ;;  %10011 = vpow2.f32 %v7767_v40  ;;  %v4702_v49 = vadd.f32 %v12092_v38, %v12214_v53  ;;  %v4908_v3 = vpop.f32.mrf.mxu0  ;;  %v7569_v38 = vmul.f32 -1.442695, %v4901_v12 }
 0x855   : > { %v9988_v52 = vpop.eup %9987  ;;  %7177 = vst [vmem:[%s11827_s1 + $0x2fc] sm:$0xff] %v8044_v9  ;;  %v5889_v10 = vadd.f32 1.0, %v9986_v61  ;;  %10013 = vpow2.f32 %v7769_v60 }
 0x856   : > { %v9990_v44 = vpop.eup %9989  ;;  %10015 = vrcp.f32 %v5887_v4  ;;  %v5888_v16 = vadd.f32 1.0, %v9988_v52  ;;  %v7553_v52 = vmul.f32 -1.442695, %v4700_v36  ;;  %v7554_v29 = vmul.f32 -1.442695, %v4702_v49 }
 0x857   : > { %v9992_v19 = vpop.eup %9991  ;;  %10017 = vrcp.f32 %v5889_v10  ;;  %v5890_v55 = vadd.f32 1.0, %v9990_v44  ;;  %v4704_v10 = vadd.f32 %v12096_v50, %v12208_v57  ;;  %v12228_v44 = vpop.f32.mrf.mxu1  ;;  %v4896_v50 = vadd.f32 %v4895_v56, %v12212_v31 }
 0x858   : > { %v9994_v8 = vpop.eup %9993  ;;  %10019 = vrcp.f32 %v5888_v16  ;;  %v5894_v1 = vadd.f32 1.0, %v9992_v19  ;;  %v4904_v19 = vadd.f32 %v8954_v2, %v12212_v31  ;;  %v4710_v2 = vadd.f32 %v12102_v24, %v12208_v57 }
 0x859   : > { %v9996_v11 = vpop.eup %9995  ;;  %10021 = vrcp.f32 %v5890_v55  ;;  %v5896_v17 = vadd.f32 1.0, %v9994_v8  ;;  %v7561_v56 = vmul.f32 -1.442695, %v4706_v21  ;;  %v7562_v24 = vmul.f32 -1.442695, %v4896_v50 }
 0x85a   : > { %v9998_v28 = vpop.eup %9997  ;;  %10023 = vrcp.f32 %v5894_v1  ;;  %v5895_v34 = vadd.f32 1.0, %v9996_v11  ;;  %v7555_v1 = vmul.f32 -1.442695, %v4893_v30  ;;  %v7576_v58 = vmul.f32 -1.442695, %v4904_v19 }
 0x85b   : > { %v10000_v15 = vpop.eup %9999  ;;  %10025 = vrcp.f32 %v5896_v17  ;;  %v5897_v7 = vadd.f32 1.0, %v9998_v28  ;;  %v7560_v17 = vmul.f32 -1.442695, %v4704_v10  ;;  %v8958_v28 = vpop.f32.mrf.mxu0  ;;  %v7567_v36 = vmul.f32 -1.442695, %v4710_v2 }
 0x85c   : > { %v10002_v13 = vpop.eup %10001  ;;  %10027 = vrcp.f32 %v5895_v34  ;;  %v5901_v63 = vadd.f32 1.0, %v10000_v15  ;;  %v12236_v34 = vpop.f32.mrf.mxu1 }
 0x85d   : > { %v10004_v48 = vpop.eup %10003  ;;  %10029 = vrcp.f32 %v5897_v7  ;;  %v5903_v33 = vadd.f32 1.0, %v10002_v13  ;;  %v4917_v7 = vadd.f32 %v8957_v26, %v12212_v31  ;;  %v4714_v26 = vadd.f32 %v12119_v27, %v12208_v57 }
 0x85e   : > { %v10006_v62 = vpop.eup %10005  ;;  %10031 = vrcp.f32 %v5901_v63  ;;  %v5902_v0 = vadd.f32 1.0, %v10004_v48  ;;  %v4712_v63 = vadd.f32 %v12111_v5, %v12214_v53 }
 0x85f   : > { %v10008_v46 = vpop.eup %10007  ;;  %10033 = vrcp.f32 %v5903_v33  ;;  %v5904_v40 = vadd.f32 1.0, %v10006_v62  ;;  %v4909_v33 = vadd.f32 %v4908_v3, %v12212_v31  ;;  %v7574_v10 = vmul.f32 -1.442695, %v4714_v26 }
 0x860   : > { %v10010_v60 = vpop.eup %10009  ;;  %10035 = vrcp.f32 %v5902_v0  ;;  %v5908_v39 = vadd.f32 1.0, %v10008_v46  ;;  %v4911_v46 = vpop.f32.mrf.mxu0 }
 0x861   : > { %v10012_v37 = vpop.eup %10011  ;;  %10037 = vrcp.f32 %v5904_v40  ;;  %v5910_v9 = vadd.f32 1.0, %v10010_v60  ;;  %v12246_v40 = vpop.f32.mrf.mxu1  ;;  %v7597_v60 = vmul.f32 -1.442695, %v4917_v7  ;;  %v7583_v27 = vmul.f32 -1.442695, %v4909_v33 }
 0x862   : > { %v10014_v61 = vpop.eup %10013  ;;  %10039 = vrcp.f32 %v5908_v39  ;;  %v5909_v4 = vadd.f32 1.0, %v10012_v37  ;;  %v4920_v39 = vadd.f32 %v8958_v28, %v12212_v31  ;;  %v7568_v37 = vmul.f32 -1.442695, %v4712_v63  ;;  %v12254_v3 = vpop.f32.mrf.mxu0 }
 0x863   : > { %v10016_v16 = vpop.eup %10015  ;;  %10041 = vrcp.f32 %v5910_v9  ;;  %v5911_v14 = vadd.f32 1.0, %v10014_v61  ;;  %v4716_v9 = vadd.f32 %v12129_v51, %v12214_v53  ;;  %v4912_v61 = vadd.f32 %v4911_v46, %v12212_v31 }
 0x864   : > { %v10018_v55 = vpop.eup %10017  ;;  %10043 = vrcp.f32 %v5909_v4  ;;  %v7604_v51 = vmul.f32 -1.442695, %v4920_v39  ;;  %v4924_v50 = vpop.f32.mrf.mxu0 }
 0x865   : > { %v10020_v8 = vpop.eup %10019  ;;  %10045 = vrcp.f32 %v5911_v14  ;;  %v7590_v21 = vmul.f32 -1.442695, %v4912_v61  ;;  %v4720_v61 = vadd.f32 %v12139_v59, %v12208_v57  ;;  %v4925_v59 = vadd.f32 %v4924_v50, %v12212_v31 }
 0x866   : > { %v10022_v47 = vpop.eup %10021  ;;  %v8047_v11 = vpack.c.bf16 %v10020_v8, %v10016_v16  ;;  %10047 = vpow2.f32 %v7553_v52  ;;  %v12256_v16 = vpop.f32.mrf.mxu1 }
 0x867   : > { %v10024_v23 = vpop.eup %10023  ;;  %v8048_v15 = vpack.c.bf16 %v10022_v47, %v10018_v55  ;;  %10049 = vpow2.f32 %v7569_v38  ;;  %v7575_v55 = vmul.f32 -1.442695, %v4716_v9 }
 0x868   : > { %v10026_v13 = vpop.eup %10025  ;;  %7180 = vst [vmem:[%s11827_s1 + $0x310] sm:$0xff] %v8047_v11  ;;  %10051 = vpow2.f32 %v7554_v29  ;;  %v12260_v47 = vpop.f32.mrf.mxu1 }
 0x869   : > { %v10028_v48 = vpop.eup %10027  ;;  %7181 = vst [vmem:[%s11827_s1 + $0x318] sm:$0xff] %v8048_v15  ;;  %10053 = vpow2.f32 %v7555_v1 }
 0x86a   : > { %v10030_v62 = vpop.eup %10029  ;;  %v8051_v0 = vpack.c.bf16 %v10028_v48, %v10024_v23  ;;  %10055 = vpow2.f32 %v7560_v17 }
 0x86b   : > { %v10032_v12 = vpop.eup %10031  ;;  %v8052_v5 = vpack.c.bf16 %v10030_v62, %v10026_v13  ;;  %10057 = vpow2.f32 %v7576_v58  ;;  %v8962_v13 = vpop.f32.mrf.mxu0 }
 0x86c   : > { %v10034_v49 = vpop.eup %10033  ;;  %7184 = vst [vmem:[%s11827_s1 + $0x32c] sm:$0xff] %v8051_v0  ;;  %10059 = vpow2.f32 %v7561_v56  ;;  %v12264_v56 = vpop.f32.mrf.mxu1 }
 0x86d   : > { %v10036_v30 = vpop.eup %10035  ;;  %7185 = vst [vmem:[%s11827_s1 + $0x334] sm:$0xff] %v8052_v5  ;;  %10061 = vpow2.f32 %v7562_v24  ;;  %v4927_v46 = vpop.f32.mrf.mxu0 }
 0x86e   : > { %v10038_v4 = vpop.eup %10037  ;;  %v8055_v52 = vpack.c.bf16 %v10036_v30, %v10032_v12  ;;  %10063 = vpow2.f32 %v7567_v36  ;;  %v12266_v12 = vpop.f32.mrf.mxu1 }
 0x86f   : > { %v10040_v14 = vpop.eup %10039  ;;  %v8056_v38 = vpack.c.bf16 %v10038_v4, %v10034_v49  ;;  %10065 = vpow2.f32 %v7597_v60  ;;  %v8965_v4 = vpop.f32.mrf.mxu0 }
 0x870   : > { %v10042_v19 = vpop.eup %10041  ;;  %7188 = vst [vmem:[%s11827_s1 + $0x348] sm:$0xff] %v8055_v52  ;;  %10067 = vpow2.f32 %v7568_v37  ;;  %v12270_v52 = vpop.f32.mrf.mxu1 }
 0x871   : > { %v10044_v29 = vpop.eup %10043  ;;  %7189 = vst [vmem:[%s11827_s1 + $0x350] sm:$0xff] %v8056_v38  ;;  %10069 = vpow2.f32 %v7583_v27  ;;  %v4933_v38 = vadd.f32 %v12254_v3, %v12212_v31 }
 0x872   : > { %v10046_v8 = vpop.eup %10045  ;;  %v8059_v1 = vpack.c.bf16 %v10044_v29, %v10040_v14  ;;  %10071 = vpow2.f32 %v7574_v10  ;;  %v12279_v3 = vpop.f32.mrf.mxu1 }
 0x873   : > { %v10048_v11 = vpop.eup %10047  ;;  %v8060_v17 = vpack.c.bf16 %v10046_v8, %v10042_v19  ;;  %10073 = vpow2.f32 %v7604_v51 }
 0x874   : > { %v10050_v2 = vpop.eup %10049  ;;  %7192 = vst [vmem:[%s11827_s1 + $0x364] sm:$0xff] %v8059_v1  ;;  %v5695_v28 = vadd.f32 1.0, %v10048_v11  ;;  %10075 = vpow2.f32 %v7575_v55  ;;  %v4722_v55 = vadd.f32 %v12143_v41, %v12214_v53  ;;  %v7581_v11 = vmul.f32 -1.442695, %v4720_v61 }
 0x875   : > { %v10052_v23 = vpop.eup %10051  ;;  %7193 = vst [vmem:[%s11827_s1 + $0x36c] sm:$0xff] %v8060_v17  ;;  %v5711_v15 = vadd.f32 1.0, %v10050_v2  ;;  %10077 = vpow2.f32 %v7590_v21  ;;  %v4724_v17 = vadd.f32 %v12147_v18, %v12208_v57  ;;  %v4940_v2 = vpop.f32.mrf.mxu0  ;;  %v4936_v41 = vadd.f32 %v8962_v13, %v12212_v31 }
 0x876   : > { %v10054_v58 = vpop.eup %10053  ;;  %10079 = vrcp.f32 %v5695_v28  ;;  %v5696_v7 = vadd.f32 1.0, %v10052_v23  ;;  %v7582_v50 = vmul.f32 -1.442695, %v4722_v55  ;;  %v7611_v18 = vmul.f32 -1.442695, %v4925_v59 }
 0x877   : > { %v10056_v63 = vpop.eup %10055  ;;  %10081 = vrcp.f32 %v5711_v15  ;;  %v5697_v48 = vadd.f32 1.0, %v10054_v58  ;;  %v7625_v15 = vmul.f32 -1.442695, %v4933_v38  ;;  %v4730_v13 = vadd.f32 %v12153_v35, %v12208_v57 }
 0x878   : > { %v10058_v24 = vpop.eup %10057  ;;  %10083 = vrcp.f32 %v5696_v7  ;;  %v5702_v33 = vadd.f32 1.0, %v10056_v63  ;;  %v4726_v7 = vadd.f32 %v12149_v20, %v12214_v53 }
 0x879   : > { %v10060_v62 = vpop.eup %10059  ;;  %10085 = vrcp.f32 %v5697_v48  ;;  %v5718_v0 = vadd.f32 1.0, %v10058_v24  ;;  %v4928_v24 = vadd.f32 %v4927_v46, %v12212_v31 }
 0x87a   : > { %v10062_v36 = vpop.eup %10061  ;;  %10087 = vrcp.f32 %v5702_v33  ;;  %v5703_v26 = vadd.f32 1.0, %v10060_v62 }
 0x87b   : > { %v10064_v5 = vpop.eup %10063  ;;  %10089 = vrcp.f32 %v5718_v0  ;;  %v5704_v60 = vadd.f32 1.0, %v10062_v36  ;;  %v7588_v0 = vmul.f32 -1.442695, %v4724_v17  ;;  %v8966_v36 = vpop.f32.mrf.mxu0 }
 0x87c   : > { %v10066_v39 = vpop.eup %10065  ;;  %10091 = vrcp.f32 %v5703_v26  ;;  %v5709_v49 = vadd.f32 1.0, %v10064_v5  ;;  %v12287_v26 = vpop.f32.mrf.mxu1 }
 0x87d   : > { %v10068_v37 = vpop.eup %10067  ;;  %10093 = vrcp.f32 %v5704_v60  ;;  %v5739_v9 = vadd.f32 1.0, %v10066_v39  ;;  %v7632_v60 = vmul.f32 -1.442695, %v4936_v41  ;;  %v4949_v39 = vadd.f32 %v8965_v4, %v12212_v31  ;;  %v4943_v38 = vpop.f32.mrf.mxu0 }
 0x87e   : > { %v10070_v30 = vpop.eup %10069  ;;  %10095 = vrcp.f32 %v5709_v49  ;;  %v5710_v27 = vadd.f32 1.0, %v10068_v37  ;;  %v7589_v49 = vmul.f32 -1.442695, %v4726_v7  ;;  %v4732_v37 = vadd.f32 %v12162_v22, %v12214_v53 }
 0x87f   : > { %v10072_v10 = vpop.eup %10071  ;;  %10097 = vrcp.f32 %v5739_v9  ;;  %v5725_v14 = vadd.f32 1.0, %v10070_v30  ;;  %v7618_v30 = vmul.f32 -1.442695, %v4928_v24  ;;  %v7595_v4 = vmul.f32 -1.442695, %v4730_v13 }
 0x880   : > { %v10074_v51 = vpop.eup %10073  ;;  %10099 = vrcp.f32 %v5710_v27  ;;  %v5716_v19 = vadd.f32 1.0, %v10072_v10  ;;  %v4941_v27 = vadd.f32 %v4940_v2, %v12212_v31  ;;  %v7653_v55 = vmul.f32 -1.442695, %v4949_v39 }
 0x881   : > { %v10076_v29 = vpop.eup %10075  ;;  %10101 = vrcp.f32 %v5725_v14  ;;  %v5746_v21 = vadd.f32 1.0, %v10074_v51  ;;  %v4734_v14 = vadd.f32 %v12170_v42, %v12208_v57  ;;  %v12300_v51 = vpop.f32.mrf.mxu1  ;;  %v7596_v59 = vmul.f32 -1.442695, %v4732_v37 }
 0x882   : > { %v10078_v8 = vpop.eup %10077  ;;  %10103 = vrcp.f32 %v5716_v19  ;;  %v5717_v1 = vadd.f32 1.0, %v10076_v29  ;;  %v4952_v29 = vadd.f32 %v8966_v36, %v12212_v31  ;;  %v4944_v17 = vadd.f32 %v4943_v38, %v12212_v31 }
 0x883   : > { %v10080_v28 = vpop.eup %10079  ;;  %10105 = vrcp.f32 %v5746_v21  ;;  %v5732_v23 = vadd.f32 1.0, %v10078_v8  ;;  %v4736_v8 = vadd.f32 %v12180_v32, %v12214_v53  ;;  %v12313_v41 = vpop.f32.mrf.mxu1 }
 0x884   : > { %v10082_v58 = vpop.eup %10081  ;;  %10107 = vrcp.f32 %v5717_v1  ;;  %v7646_v24 = vmul.f32 -1.442695, %v4944_v17 }
 0x885   : > { %v10084_v63 = vpop.eup %10083  ;;  %v7946_v48 = vpack.c.bf16 %v10082_v58, %v10082_v58  ;;  %10109 = vrcp.f32 %v5732_v23  ;;  %v7602_v23 = vmul.f32 -1.442695, %v4734_v14  ;;  %v12320_v13 = vpop.f32.mrf.mxu1 }
 0x886   : > { %v10086_v33 = vpop.eup %10085  ;;  %v7937_v62 = vpack.c.bf16 %v10084_v63, %v10080_v28  ;;  %10111 = vpow2.f32 %v7581_v11  ;;  %v7639_v11 = vmul.f32 -1.442695, %v4941_v27  ;;  %v7603_v63 = vmul.f32 -1.442695, %v4736_v8 }
 0x887   : > { %v10088_v5 = vpop.eup %10087  ;;  %7079 = vst.msk [vmem:[%s11827_s1 + $0x50] sm:$0xf] %vm7070_vm4, %v7946_v48  ;;  %v7938_v20 = vpack.c.bf16 %v10086_v33, %v10086_v33  ;;  %10113 = vpow2.f32 %v7625_v15  ;;  %v12311_v15 = vpop.f32.mrf.mxu0 }
 0x888   : > { %v10090_v46 = vpop.eup %10089  ;;  %7069 = vst [vmem:[%s11827_s1 + $0x10] sm:$0xff] %v7937_v62  ;;  %10115 = vpow2.f32 %v7582_v50  ;;  %v7660_v50 = vmul.f32 -1.442695, %v4952_v29 }
 0x889   : > { %v10092_v35 = vpop.eup %10091  ;;  %7071 = vst.msk [vmem:[%s11827_s1 + $0x18] sm:$0xf] %vm7070_vm4, %v7938_v20  ;;  %v7950_v9 = vpack.c.bf16 %v10090_v46, %v10090_v46  ;;  %10117 = vpow2.f32 %v7611_v18 }
 0x88a   : > { %v10094_v61 = vpop.eup %10093  ;;  %v7941_v10 = vpack.c.bf16 %v10092_v35, %v10088_v5  ;;  %10119 = vpow2.f32 %v7588_v0  ;;  %v4956_v0 = vpop.f32.mrf.mxu0 }
 0x88b   : > { %v10096_v22 = vpop.eup %10095  ;;  %7083 = vst.msk [vmem:[%s11827_s1 + $0x6c] sm:$0xf] %vm7070_vm4, %v7950_v9  ;;  %v7942_v19 = vpack.c.bf16 %v10094_v61, %v10094_v61  ;;  %10121 = vpow2.f32 %v7632_v60  ;;  %v12327_v9 = vpop.f32.mrf.mxu1 }
 0x88c   : > { %v10098_v21 = vpop.eup %10097  ;;  %7074 = vst [vmem:[%s11827_s1 + $0x2c] sm:$0xff] %v7941_v10  ;;  %10123 = vpow2.f32 %v7589_v49  ;;  %v8970_v35 = vpop.f32.mrf.mxu0 }
 0x88d   : > { %v10100_v42 = vpop.eup %10099  ;;  %7075 = vst.msk [vmem:[%s11827_s1 + $0x34] sm:$0xf] %vm7070_vm4, %v7942_v19  ;;  %v7962_v1 = vpack.c.bf16 %v10098_v21, %v10098_v21  ;;  %10125 = vpow2.f32 %v7618_v30 }
 0x88e   : > { %v10102_v2 = vpop.eup %10101  ;;  %v7945_v28 = vpack.c.bf16 %v10100_v42, %v10096_v22  ;;  %10127 = vpow2.f32 %v7595_v4  ;;  %v4959_v19 = vpop.f32.mrf.mxu0 }
 0x88f   : > { %v10104_v58 = vpop.eup %10103  ;;  %7095 = vst.msk [vmem:[%s11827_s1 + $0xc0] sm:$0xf] %vm7070_vm4, %v7962_v1  ;;  %v7954_v32 = vpack.c.bf16 %v10102_v2, %v10102_v2  ;;  %10129 = vpow2.f32 %v7653_v55  ;;  %v12329_v55 = vpop.f32.mrf.mxu1  ;;  %v4740_v2 = vadd.f32 %v12190_v54, %v12208_v57  ;;  %v4957_v54 = vadd.f32 %v4956_v0, %v12212_v31 }
 0x890   : > { %v10106_v7 = vpop.eup %10105  ;;  %7078 = vst [vmem:[%s11827_s1 + $0x48] sm:$0xff] %v7945_v28  ;;  %10131 = vpow2.f32 %v7596_v59  ;;  %v8973_v28 = vpop.f32.mrf.mxu0 }
 0x891   : > { %v10108_v48 = vpop.eup %10107  ;;  %7087 = vst.msk [vmem:[%s11827_s1 + $0x88] sm:$0xf] %vm7070_vm4, %v7954_v32  ;;  %v7966_v18 = vpack.c.bf16 %v10106_v7, %v10106_v7  ;;  %10133 = vpow2.f32 %v7639_v11 }
 0x892   : > { %v10110_v33 = vpop.eup %10109  ;;  %v7949_v62 = vpack.c.bf16 %v10108_v48, %v10104_v58  ;;  %10135 = vpow2.f32 %v7602_v23  ;;  %v12333_v23 = vpop.f32.mrf.mxu1  ;;  %v4742_v48 = vadd.f32 %v12196_v43, %v12214_v53  ;;  %v4968_v43 = vadd.f32 %v8970_v35, %v12212_v31 }
 0x893   : > { %v10112_v36 = vpop.eup %10111  ;;  %7099 = vst.msk [vmem:[%s11827_s1 + $0xdc] sm:$0xf] %vm7070_vm4, %v7966_v18  ;;  %v7958_v5 = vpack.c.bf16 %v10110_v33, %v10110_v33  ;;  %10137 = vpow2.f32 %v7660_v50  ;;  %v4965_v50 = vadd.f32 %v12311_v15, %v12212_v31  ;;  %v4750_v35 = vadd.f32 %v12218_v6, %v12208_v57 }
 0x894   : > { %v10114_v20 = vpop.eup %10113  ;;  %7082 = vst [vmem:[%s11827_s1 + $0x64] sm:$0xff] %v7949_v62  ;;  %v5723_v60 = vadd.f32 1.0, %v10112_v36  ;;  %10139 = vpow2.f32 %v7603_v63  ;;  %v7609_v36 = vmul.f32 -1.442695, %v4740_v2  ;;  %v12342_v15 = vpop.f32.mrf.mxu1  ;;  %v7610_v0 = vmul.f32 -1.442695, %v4742_v48 }
 0x895   : > { %v10116_v39 = vpop.eup %10115  ;;  %7091 = vst.msk [vmem:[%s11827_s1 + $0xa4] sm:$0xf] %vm7070_vm4, %v7958_v5  ;;  %v5767_v46 = vadd.f32 1.0, %v10114_v20  ;;  %10141 = vpow2.f32 %v7646_v24  ;;  %v4744_v5 = vadd.f32 %v12201_v45, %v12208_v57  ;;  %v4972_v20 = vpop.f32.mrf.mxu0  ;;  %v7667_v45 = vmul.f32 -1.442695, %v4957_v54 }
 0x896   : > { %v10118_v49 = vpop.eup %10117  ;;  %10143 = vrcp.f32 %v5723_v60  ;;  %v5724_v37 = vadd.f32 1.0, %v10116_v39 }
 0x897   : > { %v10120_v30 = vpop.eup %10119  ;;  %10145 = vrcp.f32 %v5767_v46  ;;  %v5753_v27 = vadd.f32 1.0, %v10118_v49  ;;  %v7681_v46 = vmul.f32 -1.442695, %v4965_v50 }
 0x898   : > { %v10122_v61 = vpop.eup %10121  ;;  %10147 = vrcp.f32 %v5724_v37  ;;  %v5730_v10 = vadd.f32 1.0, %v10120_v30  ;;  %v4746_v37 = vadd.f32 %v12210_v25, %v12214_v53 }
 0x899   : > { %v10124_v4 = vpop.eup %10123  ;;  %10149 = vrcp.f32 %v5753_v27  ;;  %v5774_v14 = vadd.f32 1.0, %v10122_v61  ;;  %v4960_v61 = vadd.f32 %v4959_v19, %v12212_v31 }
 0x89a   : > { %v10126_v38 = vpop.eup %10125  ;;  %10151 = vrcp.f32 %v5730_v10  ;;  %v5731_v22 = vadd.f32 1.0, %v10124_v4 }
 0x89b   : > { %v10128_v29 = vpop.eup %10127  ;;  %10153 = vrcp.f32 %v5774_v14  ;;  %v5760_v21 = vadd.f32 1.0, %v10126_v38  ;;  %v7616_v14 = vmul.f32 -1.442695, %v4744_v5  ;;  %v8974_v38 = vpop.f32.mrf.mxu0 }
 0x89c   : > { %v10130_v59 = vpop.eup %10129  ;;  %10155 = vrcp.f32 %v5731_v22  ;;  %v5737_v8 = vadd.f32 1.0, %v10128_v29  ;;  %v12350_v22 = vpop.f32.mrf.mxu1 }
 0x89d   : > { %v10132_v42 = vpop.eup %10131  ;;  %10157 = vrcp.f32 %v5760_v21  ;;  %v5795_v1 = vadd.f32 1.0, %v10130_v59  ;;  %v7688_v21 = vmul.f32 -1.442695, %v4968_v43  ;;  %v4981_v59 = vadd.f32 %v8973_v28, %v12212_v31  ;;  %v4975_v50 = vpop.f32.mrf.mxu0 }
 0x89e   : > { %v10134_v11 = vpop.eup %10133  ;;  %10159 = vrcp.f32 %v5737_v8  ;;  %v5738_v17 = vadd.f32 1.0, %v10132_v42  ;;  %v7617_v8 = vmul.f32 -1.442695, %v4746_v37  ;;  %v4752_v42 = vadd.f32 %v12228_v44, %v12214_v53 }
 0x89f   : > { %v10136_v58 = vpop.eup %10135  ;;  %10161 = vrcp.f32 %v5795_v1  ;;  %v5781_v32 = vadd.f32 1.0, %v10134_v11  ;;  %v7674_v11 = vmul.f32 -1.442695, %v4960_v61  ;;  %v7623_v28 = vmul.f32 -1.442695, %v4750_v35 }
 0x8a0   : > { %v10138_v7 = vpop.eup %10137  ;;  %10163 = vrcp.f32 %v5738_v17  ;;  %v5744_v63 = vadd.f32 1.0, %v10136_v58  ;;  %v4973_v17 = vadd.f32 %v4972_v20, %v12212_v31  ;;  %v7709_v48 = vmul.f32 -1.442695, %v4981_v59 }
 0x8a1   : > { %v10140_v18 = vpop.eup %10139  ;;  %10165 = vrcp.f32 %v5781_v32  ;;  %v5802_v24 = vadd.f32 1.0, %v10138_v7  ;;  %v4754_v32 = vadd.f32 %v12236_v34, %v12208_v57  ;;  %v12363_v7 = vpop.f32.mrf.mxu1  ;;  %v7624_v54 = vmul.f32 -1.442695, %v4752_v42 }
 0x8a2   : > { %v10142_v33 = vpop.eup %10141  ;;  %10167 = vrcp.f32 %v5744_v63  ;;  %v5745_v62 = vadd.f32 1.0, %v10140_v18  ;;  %v4984_v18 = vadd.f32 %v8974_v38, %v12212_v31  ;;  %v4976_v5 = vadd.f32 %v4975_v50, %v12212_v31 }
 0x8a3   : > { %v10144_v60 = vpop.eup %10143  ;;  %10169 = vrcp.f32 %v5802_v24  ;;  %v5788_v39 = vadd.f32 1.0, %v10142_v33  ;;  %v4756_v33 = vadd.f32 %v12246_v40, %v12214_v53  ;;  %v12376_v43 = vpop.f32.mrf.mxu1 }
 0x8a4   : > { %v10146_v49 = vpop.eup %10145  ;;  %10171 = vrcp.f32 %v5745_v62  ;;  %v7702_v61 = vmul.f32 -1.442695, %v4976_v5 }
 0x8a5   : > { %v10148_v30 = vpop.eup %10147  ;;  %v7978_v27 = vpack.c.bf16 %v10146_v49, %v10146_v49  ;;  %10173 = vrcp.f32 %v5788_v39  ;;  %v7630_v39 = vmul.f32 -1.442695, %v4754_v32  ;;  %v12383_v35 = vpop.f32.mrf.mxu1 }
 0x8a6   : > { %v10150_v10 = vpop.eup %10149  ;;  %v7953_v4 = vpack.c.bf16 %v10148_v30, %v10144_v60  ;;  %10175 = vpow2.f32 %v7609_v36  ;;  %v7695_v36 = vmul.f32 -1.442695, %v4973_v17  ;;  %v7631_v30 = vmul.f32 -1.442695, %v4756_v33 }
 0x8a7   : > { %v10152_v29 = vpop.eup %10151  ;;  %7111 = vst.msk [vmem:[%s11827_s1 + $0x130] sm:$0xf] %vm7070_vm4, %v7978_v27  ;;  %v7970_v25 = vpack.c.bf16 %v10150_v10, %v10150_v10  ;;  %10177 = vpow2.f32 %v7681_v46  ;;  %v12374_v46 = vpop.f32.mrf.mxu0 }
 0x8a8   : > { %v10154_v19 = vpop.eup %10153  ;;  %7086 = vst [vmem:[%s11827_s1 + $0x80] sm:$0xff] %v7953_v4  ;;  %10179 = vpow2.f32 %v7610_v0  ;;  %v7716_v0 = vmul.f32 -1.442695, %v4984_v18 }
 0x8a9   : > { %v10156_v6 = vpop.eup %10155  ;;  %7103 = vst.msk [vmem:[%s11827_s1 + $0xf8] sm:$0xf] %vm7070_vm4, %v7970_v25  ;;  %v7982_v1 = vpack.c.bf16 %v10154_v19, %v10154_v19  ;;  %10181 = vpow2.f32 %v7667_v45 }
 0x8aa   : > { %v10158_v2 = vpop.eup %10157  ;;  %v7957_v58 = vpack.c.bf16 %v10156_v6, %v10152_v29  ;;  %10183 = vpow2.f32 %v7616_v14  ;;  %v4988_v14 = vpop.f32.mrf.mxu0 }
 0x8ab   : > { %v10160_v44 = vpop.eup %10159  ;;  %7115 = vst.msk [vmem:[%s11827_s1 + $0x14c] sm:$0xf] %vm7070_vm4, %v7982_v1  ;;  %v7974_v63 = vpack.c.bf16 %v10158_v2, %v10158_v2  ;;  %10185 = vpow2.f32 %v7688_v21  ;;  %v12390_v1 = vpop.f32.mrf.mxu1 }
 0x8ac   : > { %v10162_v24 = vpop.eup %10161  ;;  %7090 = vst [vmem:[%s11827_s1 + $0x9c] sm:$0xff] %v7957_v58  ;;  %10187 = vpow2.f32 %v7617_v8  ;;  %v8978_v6 = vpop.f32.mrf.mxu0 }
 0x8ad   : > { %v10164_v34 = vpop.eup %10163  ;;  %7107 = vst.msk [vmem:[%s11827_s1 + $0x114] sm:$0xf] %vm7070_vm4, %v7974_v63  ;;  %v7994_v62 = vpack.c.bf16 %v10162_v24, %v10162_v24  ;;  %10189 = vpow2.f32 %v7674_v11 }
 0x8ae   : > { %v10166_v20 = vpop.eup %10165  ;;  %v7961_v60 = vpack.c.bf16 %v10164_v34, %v10160_v44  ;;  %10191 = vpow2.f32 %v7623_v28  ;;  %v4991_v63 = vpop.f32.mrf.mxu0 }
 0x8af   : > { %v10168_v49 = vpop.eup %10167  ;;  %7127 = vst.msk [vmem:[%s11827_s1 + $0x1a0] sm:$0xf] %vm7070_vm4, %v7994_v62  ;;  %v7986_v40 = vpack.c.bf16 %v10166_v20, %v10166_v20  ;;  %10193 = vpow2.f32 %v7709_v48  ;;  %v12392_v48 = vpop.f32.mrf.mxu1  ;;  %v4760_v20 = vadd.f32 %v12256_v16, %v12208_v57  ;;  %v4989_v16 = vadd.f32 %v4988_v14, %v12212_v31 }
 0x8b0   : > { %v10170_v37 = vpop.eup %10169  ;;  %7094 = vst [vmem:[%s11827_s1 + $0xb8] sm:$0xff] %v7961_v60  ;;  %10195 = vpow2.f32 %v7624_v54  ;;  %v8981_v60 = vpop.f32.mrf.mxu0 }
 0x8b1   : > { %v10172_v27 = vpop.eup %10171  ;;  %7119 = vst.msk [vmem:[%s11827_s1 + $0x168] sm:$0xf] %vm7070_vm4, %v7986_v40  ;;  %v7998_v45 = vpack.c.bf16 %v10170_v37, %v10170_v37  ;;  %10197 = vpow2.f32 %v7695_v36 }
 0x8b2   : > { %v10174_v10 = vpop.eup %10173  ;;  %v7965_v4 = vpack.c.bf16 %v10172_v27, %v10168_v49  ;;  %10199 = vpow2.f32 %v7630_v39  ;;  %v12396_v39 = vpop.f32.mrf.mxu1  ;;  %v4762_v27 = vadd.f32 %v12260_v47, %v12214_v53  ;;  %v5000_v47 = vadd.f32 %v8978_v6, %v12212_v31 }
 0x8b3   : > { %v10176_v38 = vpop.eup %10175  ;;  %7131 = vst.msk [vmem:[%s11827_s1 + $0x1bc] sm:$0xf] %vm7070_vm4, %v7998_v45  ;;  %v7990_v29 = vpack.c.bf16 %v10174_v10, %v10174_v10  ;;  %10201 = vpow2.f32 %v7716_v0  ;;  %v4997_v0 = vadd.f32 %v12374_v46, %v12212_v31  ;;  %v4770_v6 = vadd.f32 %v12270_v52, %v12208_v57 }
 0x8b4   : > { %v10178_v25 = vpop.eup %10177  ;;  %7098 = vst [vmem:[%s11827_s1 + $0xd4] sm:$0xff] %v7965_v4  ;;  %v5751_v21 = vadd.f32 1.0, %v10176_v38  ;;  %10203 = vpow2.f32 %v7631_v30  ;;  %v7637_v38 = vmul.f32 -1.442695, %v4760_v20  ;;  %v12405_v46 = vpop.f32.mrf.mxu1  ;;  %v7638_v14 = vmul.f32 -1.442695, %v4762_v27 }
 0x8b5   : > { %v10180_v59 = vpop.eup %10179  ;;  %7123 = vst.msk [vmem:[%s11827_s1 + $0x184] sm:$0xf] %vm7070_vm4, %v7990_v29  ;;  %v5823_v19 = vadd.f32 1.0, %v10178_v25  ;;  %10205 = vpow2.f32 %v7702_v61  ;;  %v4764_v29 = vadd.f32 %v12264_v56, %v12208_v57  ;;  %v5004_v25 = vpop.f32.mrf.mxu0  ;;  %v7723_v56 = vmul.f32 -1.442695, %v4989_v16 }
 0x8b6   : > { %v10182_v8 = vpop.eup %10181  ;;  %10207 = vrcp.f32 %v5751_v21  ;;  %v5752_v42 = vadd.f32 1.0, %v10180_v59 }
 0x8b7   : > { %v10184_v11 = vpop.eup %10183  ;;  %10209 = vrcp.f32 %v5823_v19  ;;  %v5809_v17 = vadd.f32 1.0, %v10182_v8  ;;  %v7737_v19 = vmul.f32 -1.442695, %v4997_v0 }
 0x8b8   : > { %v10186_v2 = vpop.eup %10185  ;;  %10211 = vrcp.f32 %v5752_v42  ;;  %v5758_v58 = vadd.f32 1.0, %v10184_v11  ;;  %v4766_v42 = vadd.f32 %v12266_v12, %v12214_v53 }
 0x8b9   : > { %v10188_v28 = vpop.eup %10187  ;;  %10213 = vrcp.f32 %v5809_v17  ;;  %v5830_v32 = vadd.f32 1.0, %v10186_v2  ;;  %v4992_v2 = vadd.f32 %v4991_v63, %v12212_v31 }
 0x8ba   : > { %v10190_v50 = vpop.eup %10189  ;;  %10215 = vrcp.f32 %v5758_v58  ;;  %v5759_v44 = vadd.f32 1.0, %v10188_v28 }
 0x8bb   : > { %v10192_v18 = vpop.eup %10191  ;;  %10217 = vrcp.f32 %v5830_v32  ;;  %v5816_v24 = vadd.f32 1.0, %v10190_v50  ;;  %v7644_v32 = vmul.f32 -1.442695, %v4764_v29  ;;  %v8982_v50 = vpop.f32.mrf.mxu0 }
 0x8bc   : > { %v10194_v54 = vpop.eup %10193  ;;  %10219 = vrcp.f32 %v5759_v44  ;;  %v5765_v33 = vadd.f32 1.0, %v10192_v18  ;;  %v12413_v44 = vpop.f32.mrf.mxu1 }
 0x8bd   : > { %v10196_v34 = vpop.eup %10195  ;;  %10221 = vrcp.f32 %v5816_v24  ;;  %v5851_v62 = vadd.f32 1.0, %v10194_v54  ;;  %v7744_v24 = vmul.f32 -1.442695, %v5000_v47  ;;  %v5013_v54 = vadd.f32 %v8981_v60, %v12212_v31  ;;  %v5007_v0 = vpop.f32.mrf.mxu0 }
 0x8be   : > { %v10198_v36 = vpop.eup %10197  ;;  %10223 = vrcp.f32 %v5765_v33  ;;  %v5766_v5 = vadd.f32 1.0, %v10196_v34  ;;  %v7645_v33 = vmul.f32 -1.442695, %v4766_v42  ;;  %v4772_v34 = vadd.f32 %v12279_v3, %v12214_v53 }
 0x8bf   : > { %v10200_v49 = vpop.eup %10199  ;;  %10225 = vrcp.f32 %v5851_v62  ;;  %v5837_v40 = vadd.f32 1.0, %v10198_v36  ;;  %v7730_v36 = vmul.f32 -1.442695, %v4992_v2  ;;  %v7651_v60 = vmul.f32 -1.442695, %v4770_v6 }
 0x8c0   : > { %v10202_v37 = vpop.eup %10201  ;;  %10227 = vrcp.f32 %v5766_v5  ;;  %v5772_v30 = vadd.f32 1.0, %v10200_v49  ;;  %v5005_v5 = vadd.f32 %v5004_v25, %v12212_v31  ;;  %v7765_v27 = vmul.f32 -1.442695, %v5013_v54 }
 0x8c1   : > { %v10204_v45 = vpop.eup %10203  ;;  %10229 = vrcp.f32 %v5837_v40  ;;  %v5858_v61 = vadd.f32 1.0, %v10202_v37  ;;  %v4774_v40 = vadd.f32 %v12287_v26, %v12208_v57  ;;  %v12426_v37 = vpop.f32.mrf.mxu1  ;;  %v7652_v16 = vmul.f32 -1.442695, %v4772_v34 }
 0x8c2   : > { %v10206_v10 = vpop.eup %10205  ;;  %10231 = vrcp.f32 %v5772_v30  ;;  %v5773_v4 = vadd.f32 1.0, %v10204_v45  ;;  %v5016_v45 = vadd.f32 %v8982_v50, %v12212_v31  ;;  %v5008_v29 = vadd.f32 %v5007_v0, %v12212_v31 }
 0x8c3   : > { %v10208_v21 = vpop.eup %10207  ;;  %10233 = vrcp.f32 %v5858_v61  ;;  %v5844_v59 = vadd.f32 1.0, %v10206_v10  ;;  %v4776_v10 = vadd.f32 %v12300_v51, %v12214_v53 }
 0x8c4   : > { %v10210_v8 = vpop.eup %10209  ;;  %10235 = vrcp.f32 %v5773_v4 }
 0x8c5   : > { %v10212_v11 = vpop.eup %10211  ;;  %v8010_v17 = vpack.c.bf16 %v10210_v8, %v10210_v8  ;;  %10237 = vrcp.f32 %v5844_v59  ;;  %v7658_v59 = vmul.f32 -1.442695, %v4774_v40  ;;  %v7772_v8 = vmul.f32 -1.442695, %v5016_v45 }
 0x8c6   : > { %v10214_v58 = vpop.eup %10213  ;;  %v7969_v28 = vpack.c.bf16 %v10212_v11, %v10208_v21  ;;  %10239 = vpow2.f32 %v7637_v38  ;;  %v7751_v38 = vmul.f32 -1.442695, %v5005_v5  ;;  %v7659_v42 = vmul.f32 -1.442695, %v4776_v10 }
 0x8c7   : > { %v10216_v18 = vpop.eup %10215  ;;  %7143 = vst.msk [vmem:[%s11827_s1 + $0x210] sm:$0xf] %vm7070_vm4, %v8010_v17  ;;  %v8002_v12 = vpack.c.bf16 %v10214_v58, %v10214_v58  ;;  %10241 = vpow2.f32 %v7737_v19  ;;  %v12437_v19 = vpop.f32.mrf.mxu1  ;;  %v7758_v17 = vmul.f32 -1.442695, %v5008_v29  ;;  %v4780_v10 = vadd.f32 %v12313_v41, %v12208_v57 }
 0x8c8   : > { %v10218_v63 = vpop.eup %10217  ;;  %7102 = vst [vmem:[%s11827_s1 + $0xf0] sm:$0xff] %v7969_v28  ;;  %10243 = vpow2.f32 %v7638_v14  ;;  %v4782_v29 = vadd.f32 %v12320_v13, %v12214_v53  ;;  %v4786_v41 = vadd.f32 %v12329_v55, %v12214_v53 }
 0x8c9   : > { %v10220_v52 = vpop.eup %10219  ;;  %7135 = vst.msk [vmem:[%s11827_s1 + $0x1d8] sm:$0xf] %vm7070_vm4, %v8002_v12  ;;  %v8014_v62 = vpack.c.bf16 %v10218_v63, %v10218_v63  ;;  %10245 = vpow2.f32 %v7723_v56  ;;  %v12444_v58 = vpop.f32.mrf.mxu1 }
 0x8ca   : > { %v10222_v20 = vpop.eup %10221  ;;  %v7973_v49 = vpack.c.bf16 %v10220_v52, %v10216_v18  ;;  %10247 = vpow2.f32 %v7644_v32 }
 0x8cb   : > { %v10224_v3 = vpop.eup %10223  ;;  %7147 = vst.msk [vmem:[%s11827_s1 + $0x22c] sm:$0xf] %vm7070_vm4, %v8014_v62  ;;  %v8006_v30 = vpack.c.bf16 %v10222_v20, %v10222_v20  ;;  %10249 = vpow2.f32 %v7744_v24  ;;  %v12451_v63 = vpop.f32.mrf.mxu1 }
 0x8cc   : > { %v10226_v61 = vpop.eup %10225  ;;  %7106 = vst [vmem:[%s11827_s1 + $0x10c] sm:$0xff] %v7973_v49  ;;  %10251 = vpow2.f32 %v7645_v33 }
 0x8cd   : > { %v10228_v26 = vpop.eup %10227  ;;  %7139 = vst.msk [vmem:[%s11827_s1 + $0x1f4] sm:$0xf] %vm7070_vm4, %v8006_v30  ;;  %v8026_v4 = vpack.c.bf16 %v10226_v61, %v10226_v61  ;;  %10253 = vpow2.f32 %v7730_v36 }
 0x8ce   : > { %v10230_v25 = vpop.eup %10229  ;;  %v7977_v21 = vpack.c.bf16 %v10228_v26, %v10224_v3  ;;  %10255 = vpow2.f32 %v7651_v60  ;;  %v12453_v60 = vpop.f32.mrf.mxu1 }
 0x8cf   : > { %v10232_v47 = vpop.eup %10231  ;;  %7159 = vst.msk [vmem:[%s11827_s1 + $0x280] sm:$0xf] %vm7070_vm4, %v8026_v4  ;;  %v8018_v51 = vpack.c.bf16 %v10230_v25, %v10230_v25  ;;  %10257 = vpow2.f32 %v7765_v27 }
 0x8d0   : > { %v10234_v14 = vpop.eup %10233  ;;  %7110 = vst [vmem:[%s11827_s1 + $0x128] sm:$0xff] %v7977_v21  ;;  %10259 = vpow2.f32 %v7652_v16  ;;  %v12457_v26 = vpop.f32.mrf.mxu1 }
 0x8d1   : > { %v10236_v31 = vpop.eup %10235  ;;  %7151 = vst.msk [vmem:[%s11827_s1 + $0x248] sm:$0xf] %vm7070_vm4, %v8018_v51  ;;  %v8030_v11 = vpack.c.bf16 %v10234_v14, %v10234_v14  ;;  %10261 = vpow2.f32 %v7751_v38 }
 0x8d2   : > { %v10238_v56 = vpop.eup %10237  ;;  %v7981_v2 = vpack.c.bf16 %v10236_v31, %v10232_v47  ;;  %10263 = vpow2.f32 %v7658_v59  ;;  %v4784_v59 = vadd.f32 %v12327_v9, %v12208_v57  ;;  %v4790_v31 = vadd.f32 %v12333_v23, %v12208_v57  ;;  %v12467_v13 = vpop.f32.mrf.mxu1 }
 0x8d3   : > { %v10240_v28 = vpop.eup %10239  ;;  %7163 = vst.msk [vmem:[%s11827_s1 + $0x29c] sm:$0xf] %vm7070_vm4, %v8030_v11  ;;  %v8022_v32 = vpack.c.bf16 %v10238_v56, %v10238_v56  ;;  %10265 = vpow2.f32 %v7772_v8  ;;  %v7666_v56 = vmul.f32 -1.442695, %v4782_v29  ;;  %v4792_v9 = vadd.f32 %v12342_v15, %v12214_v53 }
 0x8d4   : > { %v10242_v6 = vpop.eup %10241  ;;  %7114 = vst [vmem:[%s11827_s1 + $0x144] sm:$0xff] %v7981_v2  ;;  %v5779_v50 = vadd.f32 1.0, %v10240_v28  ;;  %10267 = vpow2.f32 %v7659_v42  ;;  %v7665_v42 = vmul.f32 -1.442695, %v4780_v10  ;;  %v7672_v55 = vmul.f32 -1.442695, %v4784_v59 }
 0x8d5   : > { %v10244_v18 = vpop.eup %10243  ;;  %7155 = vst.msk [vmem:[%s11827_s1 + $0x264] sm:$0xf] %vm7070_vm4, %v8022_v32  ;;  %v5879_v12 = vadd.f32 1.0, %v10242_v6  ;;  %10269 = vpow2.f32 %v7758_v17  ;;  %v4794_v28 = vadd.f32 %v12350_v22, %v12208_v57  ;;  %v7673_v23 = vmul.f32 -1.442695, %v4786_v41 }
 0x8d6   : > { %v10246_v24 = vpop.eup %10245  ;;  %10271 = vrcp.f32 %v5779_v50  ;;  %v5780_v54 = vadd.f32 1.0, %v10244_v18  ;;  %v4796_v50 = vadd.f32 %v12363_v7, %v12214_v53  ;;  %v7679_v15 = vmul.f32 -1.442695, %v4790_v31 }
 0x8d7   : > { %v10248_v33 = vpop.eup %10247  ;;  %10273 = vrcp.f32 %v5879_v12  ;;  %v5865_v34 = vadd.f32 1.0, %v10246_v24  ;;  %v4800_v24 = vadd.f32 %v12376_v43, %v12208_v57  ;;  %v4814_v10 = vadd.f32 %v12413_v44, %v12208_v57 }
 0x8d8   : > { %v10250_v52 = vpop.eup %10249  ;;  %10275 = vrcp.f32 %v5780_v54  ;;  %v5786_v62 = vadd.f32 1.0, %v10248_v33  ;;  %v12477_v54 = vpop.f32.mrf.mxu1  ;;  %v4816_v29 = vadd.f32 %v12426_v37, %v12214_v53 }
 0x8d9   : > { %v10252_v36 = vpop.eup %10251  ;;  %10277 = vrcp.f32 %v5865_v34  ;;  %v5886_v5 = vadd.f32 1.0, %v10250_v52  ;;  %v7680_v34 = vmul.f32 -1.442695, %v4792_v9  ;;  %v4802_v52 = vadd.f32 %v12383_v35, %v12214_v53 }
 0x8da   : > { %v10254_v20 = vpop.eup %10253  ;;  %10279 = vrcp.f32 %v5786_v62  ;;  %v5787_v49 = vadd.f32 1.0, %v10252_v36  ;;  %v7686_v62 = vmul.f32 -1.442695, %v4794_v28  ;;  %v4804_v36 = vadd.f32 %v12390_v1, %v12208_v57 }
 0x8db   : > { %v10256_v40 = vpop.eup %10255  ;;  %10281 = vrcp.f32 %v5886_v5  ;;  %v5872_v0 = vadd.f32 1.0, %v10254_v20  ;;  %v7687_v20 = vmul.f32 -1.442695, %v4796_v50 }
 0x8dc   : > { %v10258_v3 = vpop.eup %10257  ;;  %10283 = vrcp.f32 %v5787_v49  ;;  %v5793_v30 = vadd.f32 1.0, %v10256_v40  ;;  %v4806_v49 = vadd.f32 %v12392_v48, %v12214_v53 }
 0x8dd   : > { %v10260_v27 = vpop.eup %10259  ;;  %10285 = vrcp.f32 %v5872_v0  ;;  %v5907_v45 = vadd.f32 1.0, %v10258_v3  ;;  %v7693_v0 = vmul.f32 -1.442695, %v4800_v24  ;;  %v4810_v3 = vadd.f32 %v12396_v39, %v12208_v57 }
 0x8de   : > { %v10262_v61 = vpop.eup %10261  ;;  %10287 = vrcp.f32 %v5793_v30  ;;  %v5794_v16 = vadd.f32 1.0, %v10260_v27  ;;  %v12492_v30 = vpop.f32.mrf.mxu1 }
 0x8df   : > { %v10264_v4 = vpop.eup %10263  ;;  %10289 = vrcp.f32 %v5907_v45  ;;  %v5893_v38 = vadd.f32 1.0, %v10262_v61  ;;  %v7694_v45 = vmul.f32 -1.442695, %v4802_v52  ;;  %v4812_v61 = vadd.f32 %v12405_v46, %v12214_v53 }
 0x8e0   : > { %v10266_v25 = vpop.eup %10265  ;;  %10291 = vrcp.f32 %v5794_v16  ;;  %v5800_v21 = vadd.f32 1.0, %v10264_v4  ;;  %v7700_v16 = vmul.f32 -1.442695, %v4804_v36  ;;  %v12505_v59 = vpop.f32.mrf.mxu1 }
 0x8e1   : > { %v10268_v47 = vpop.eup %10267  ;;  %10293 = vrcp.f32 %v5893_v38  ;;  %v5914_v51 = vadd.f32 1.0, %v10266_v25  ;;  %v7701_v38 = vmul.f32 -1.442695, %v4806_v49 }
 0x8e2   : > { %v10270_v8 = vpop.eup %10269  ;;  %10295 = vrcp.f32 %v5800_v21  ;;  %v5801_v14 = vadd.f32 1.0, %v10268_v47  ;;  %v7707_v21 = vmul.f32 -1.442695, %v4810_v3 }
 0x8e3   : > { %v10272_v11 = vpop.eup %10271  ;;  %10297 = vrcp.f32 %v5914_v51  ;;  %v5900_v17 = vadd.f32 1.0, %v10270_v8  ;;  %v7708_v51 = vmul.f32 -1.442695, %v4812_v61  ;;  %v7714_v8 = vmul.f32 -1.442695, %v4814_v10 }
 0x8e4   : > { %v10274_v2 = vpop.eup %10273  ;;  %10299 = vrcp.f32 %v5801_v14 }
 0x8e5   : > { %v10276_v32 = vpop.eup %10275  ;;  %v8042_v6 = vpack.c.bf16 %v10274_v2, %v10274_v2  ;;  %10301 = vrcp.f32 %v5900_v17  ;;  %v12512_v17 = vpop.f32.mrf.mxu1 }
 0x8e6   : > { %v10278_v18 = vpop.eup %10277  ;;  %v7985_v12 = vpack.c.bf16 %v10276_v32, %v10272_v11  ;;  %10303 = vpow2.f32 %v7665_v42  ;;  %v7715_v42 = vmul.f32 -1.442695, %v4816_v29 }
 0x8e7   : > { %v10280_v33 = vpop.eup %10279  ;;  %7175 = vst.msk [vmem:[%s11827_s1 + $0x2f0] sm:$0xf] %vm7070_vm4, %v8042_v6  ;;  %v8034_v22 = vpack.c.bf16 %v10278_v18, %v10278_v18  ;;  %10305 = vpow2.f32 %v7666_v56  ;;  %v12519_v50 = vpop.f32.mrf.mxu1 }
 0x8e8   : > { %v10282_v7 = vpop.eup %10281  ;;  %7118 = vst [vmem:[%s11827_s1 + $0x160] sm:$0xff] %v7985_v12  ;;  %10307 = vpow2.f32 %v7672_v55 }
 0x8e9   : > { %v10284_v43 = vpop.eup %10283  ;;  %7167 = vst.msk [vmem:[%s11827_s1 + $0x2b8] sm:$0xf] %vm7070_vm4, %v8034_v22  ;;  %v8046_v5 = vpack.c.bf16 %v10282_v7, %v10282_v7  ;;  %10309 = vpow2.f32 %v7673_v23  ;;  %v12521_v7 = vpop.f32.mrf.mxu1 }
 0x8ea   : > { %v10286_v40 = vpop.eup %10285  ;;  %v7989_v35 = vpack.c.bf16 %v10284_v43, %v10280_v33  ;;  %10311 = vpow2.f32 %v7679_v15 }
 0x8eb   : > { %v10288_v1 = vpop.eup %10287  ;;  %7179 = vst.msk [vmem:[%s11827_s1 + $0x30c] sm:$0xf] %vm7070_vm4, %v8046_v5  ;;  %v8038_v27 = vpack.c.bf16 %v10286_v40, %v10286_v40  ;;  %10313 = vpow2.f32 %v7680_v34  ;;  %v4849_v3 = vpop.f32.mrf.mxu1 }
 0x8ec   : > { %v10290_v48 = vpop.eup %10289  ;;  %7122 = vst [vmem:[%s11827_s1 + $0x17c] sm:$0xff] %v7989_v35  ;;  %10315 = vpow2.f32 %v7686_v62 }
 0x8ed   : > { %v10292_v39 = vpop.eup %10291  ;;  %7171 = vst.msk [vmem:[%s11827_s1 + $0x2d4] sm:$0xf] %vm7070_vm4, %v8038_v27  ;;  %v8058_v4 = vpack.c.bf16 %v10290_v48, %v10290_v48  ;;  %10317 = vpow2.f32 %v7687_v20 }
 0x8ee   : > { %v10294_v46 = vpop.eup %10293  ;;  %v7993_v25 = vpack.c.bf16 %v10292_v39, %v10288_v1  ;;  %10319 = vpow2.f32 %v7693_v0  ;;  %v4820_v0 = vadd.f32 %v12437_v19, %v12208_v57 }
 0x8ef   : > { %v10296_v47 = vpop.eup %10295  ;;  %7191 = vst.msk [vmem:[%s11827_s1 + $0x360] sm:$0xf] %vm7070_vm4, %v8058_v4  ;;  %v8050_v44 = vpack.c.bf16 %v10294_v46, %v10294_v46  ;;  %10321 = vpow2.f32 %v7694_v45  ;;  %v4822_v45 = vadd.f32 %v12444_v58, %v12214_v53  ;;  %v4826_v4 = vadd.f32 %v12453_v60, %v12214_v53  ;;  %v4851_v58 = vpop.f32.mrf.mxu1 }
 0x8f0   : > { %v10298_v41 = vpop.eup %10297  ;;  %7126 = vst [vmem:[%s11827_s1 + $0x198] sm:$0xff] %v7993_v25  ;;  %10323 = vpow2.f32 %v7700_v16  ;;  %v4824_v16 = vadd.f32 %v12451_v63, %v12208_v57  ;;  %v7721_v29 = vmul.f32 -1.442695, %v4820_v0  ;;  %v4830_v46 = vadd.f32 %v12457_v26, %v12208_v57 }
 0x8f1   : > { %v10300_v37 = vpop.eup %10299  ;;  %7183 = vst.msk [vmem:[%s11827_s1 + $0x328] sm:$0xf] %vm7070_vm4, %v8050_v44  ;;  %v8062_v14 = vpack.c.bf16 %v10298_v41, %v10298_v41  ;;  %10325 = vpow2.f32 %v7701_v38  ;;  %v4832_v63 = vadd.f32 %v12467_v13, %v12214_v53  ;;  %v4834_v60 = vadd.f32 %v12477_v54, %v12208_v57 }
 0x8f2   : > { %v10302_v31 = vpop.eup %10301  ;;  %v7997_v11 = vpack.c.bf16 %v10300_v37, %v10296_v47  ;;  %10327 = vpow2.f32 %v7707_v21  ;;  %v7722_v47 = vmul.f32 -1.442695, %v4822_v45  ;;  %v7729_v37 = vmul.f32 -1.442695, %v4826_v4 }
 0x8f3   : > { %v10304_v56 = vpop.eup %10303  ;;  %7195 = vst.msk [vmem:[%s11827_s1 + $0x37c] sm:$0xf] %vm7070_vm4, %v8062_v14  ;;  %v8054_v9 = vpack.c.bf16 %v10302_v31, %v10302_v31  ;;  %10329 = vpow2.f32 %v7708_v51  ;;  %v7728_v51 = vmul.f32 -1.442695, %v4824_v16  ;;  %v4836_v26 = vadd.f32 %v12492_v30, %v12214_v53  ;;  %v4853_v31 = vpop.f32.mrf.mxu1 }
 0x8f4   : > { %v10306_v2 = vpop.eup %10305  ;;  %7130 = vst [vmem:[%s11827_s1 + $0x1b4] sm:$0xff] %v7997_v11  ;;  %v5807_v55 = vadd.f32 1.0, %v10304_v56  ;;  %10331 = vpow2.f32 %v7714_v8  ;;  %v4840_v13 = vadd.f32 %v12505_v59, %v12208_v57  ;;  %v7736_v54 = vmul.f32 -1.442695, %v4832_v63 }
 0x8f5   : > { %v10308_v28 = vpop.eup %10307  ;;  %7187 = vst.msk [vmem:[%s11827_s1 + $0x344] sm:$0xf] %vm7070_vm4, %v8054_v9  ;;  %v5808_v32 = vadd.f32 1.0, %v10306_v2  ;;  %10333 = vpow2.f32 %v7715_v42  ;;  %v7735_v42 = vmul.f32 -1.442695, %v4830_v46  ;;  %v4842_v9 = vadd.f32 %v12512_v17, %v12214_v53 }
 0x8f6   : > { %v10310_v6 = vpop.eup %10309  ;;  %10335 = vrcp.f32 %v5807_v55  ;;  %v5814_v23 = vadd.f32 1.0, %v10308_v28  ;;  %v7742_v30 = vmul.f32 -1.442695, %v4834_v60  ;;  %v4844_v55 = vadd.f32 %v12519_v50, %v12208_v57 }
 0x8f7   : > { %v10312_v18 = vpop.eup %10311  ;;  %10337 = vrcp.f32 %v5808_v32  ;;  %v5815_v12 = vadd.f32 1.0, %v10310_v6  ;;  %v7743_v59 = vmul.f32 -1.442695, %v4836_v26  ;;  %v4846_v6 = vadd.f32 %v12521_v7, %v12214_v53 }
 0x8f8   : > { %v10314_v15 = vpop.eup %10313  ;;  %10339 = vrcp.f32 %v5814_v23  ;;  %v5821_v24 = vadd.f32 1.0, %v10312_v18  ;;  %v7749_v18 = vmul.f32 -1.442695, %v4840_v13  ;;  %v4850_v17 = vadd.f32 %v4849_v3, %v12208_v57 }
 0x8f9   : > { %v10316_v33 = vpop.eup %10315  ;;  %10341 = vrcp.f32 %v5815_v12  ;;  %v5822_v22 = vadd.f32 1.0, %v10314_v15  ;;  %v4855_v12 = vpop.f32.mrf.mxu1  ;;  %v7750_v50 = vmul.f32 -1.442695, %v4842_v9 }
 0x8fa   : > { %v10318_v34 = vpop.eup %10317  ;;  %10343 = vrcp.f32 %v5821_v24  ;;  %v5828_v52 = vadd.f32 1.0, %v10316_v33  ;;  %v4852_v33 = vadd.f32 %v4851_v58, %v12214_v53 }
 0x8fb   : > { %v10320_v62 = vpop.eup %10319  ;;  %10345 = vrcp.f32 %v5822_v22  ;;  %v5829_v36 = vadd.f32 1.0, %v10318_v34  ;;  %v7756_v34 = vmul.f32 -1.442695, %v4844_v55 }
 0x8fc   : > { %v10322_v43 = vpop.eup %10321  ;;  %10347 = vrcp.f32 %v5828_v52  ;;  %v5835_v5 = vadd.f32 1.0, %v10320_v62  ;;  %v4854_v52 = vadd.f32 %v4853_v31, %v12208_v57 }
 0x8fd   : > { %v10324_v20 = vpop.eup %10323  ;;  %10349 = vrcp.f32 %v5829_v36  ;;  %v5836_v49 = vadd.f32 1.0, %v10322_v43  ;;  %v7757_v36 = vmul.f32 -1.442695, %v4846_v6  ;;  %v4856_v43 = vadd.f32 %v4855_v12, %v12214_v53 }
 0x8fe   : > { %v10326_v40 = vpop.eup %10325  ;;  %10351 = vrcp.f32 %v5835_v5  ;;  %v5842_v35 = vadd.f32 1.0, %v10324_v20  ;;  %v7763_v20 = vmul.f32 -1.442695, %v4850_v17  ;;  %v7770_v57 = vmul.f32 -1.442695, %v4854_v52 }
 0x8ff   : > { %v10328_v1 = vpop.eup %10327  ;;  %10353 = vrcp.f32 %v5836_v49  ;;  %v5843_v27 = vadd.f32 1.0, %v10326_v40 }
 0x900   : > { %v10330_v61 = vpop.eup %10329  ;;  %10355 = vrcp.f32 %v5842_v35  ;;  %v5849_v48 = vadd.f32 1.0, %v10328_v1  ;;  %v7764_v35 = vmul.f32 -1.442695, %v4852_v33 }
 0x901   : > { %v10332_v10 = vpop.eup %10331  ;;  %10357 = vrcp.f32 %v5843_v27  ;;  %v5850_v39 = vadd.f32 1.0, %v10330_v61  ;;  %v7771_v27 = vmul.f32 -1.442695, %v4856_v43 }
 0x902   : > { %v10334_v19 = vpop.eup %10333  ;;  %10359 = vrcp.f32 %v5849_v48  ;;  %v5856_v38 = vadd.f32 1.0, %v10332_v10 }
 0x903   : > { %v10336_v25 = vpop.eup %10335  ;;  %10361 = vrcp.f32 %v5850_v39  ;;  %v5857_v21 = vadd.f32 1.0, %v10334_v19 }
 0x904   : > { %v10338_v44 = vpop.eup %10337  ;;  %10363 = vrcp.f32 %v5856_v38 }
 0x905   : > { %v10340_v41 = vpop.eup %10339  ;;  %v8001_v8 = vpack.c.bf16 %v10338_v44, %v10336_v25  ;;  %10365 = vrcp.f32 %v5857_v21 }
 0x906   : > { %v10342_v14 = vpop.eup %10341  ;;  %10367 = vpow2.f32 %v7721_v29 }
 0x907   : > { %v10344_v11 = vpop.eup %10343  ;;  %7134 = vst [vmem:[%s11827_s1 + $0x1d0] sm:$0xff] %v8001_v8  ;;  %v8005_v56 = vpack.c.bf16 %v10342_v14, %v10340_v41  ;;  %10369 = vpow2.f32 %v7722_v47 }
 0x908   : > { %v10346_v2 = vpop.eup %10345  ;;  %10371 = vpow2.f32 %v7728_v51 }
 0x909   : > { %v10348_v28 = vpop.eup %10347  ;;  %7138 = vst [vmem:[%s11827_s1 + $0x1ec] sm:$0xff] %v8005_v56  ;;  %v8009_v32 = vpack.c.bf16 %v10346_v2, %v10344_v11  ;;  %10373 = vpow2.f32 %v7729_v37 }
 0x90a   : > { %v10350_v23 = vpop.eup %10349  ;;  %10375 = vpow2.f32 %v7735_v42 }
 0x90b   : > { %v10352_v15 = vpop.eup %10351  ;;  %7142 = vst [vmem:[%s11827_s1 + $0x208] sm:$0xff] %v8009_v32  ;;  %v8013_v24 = vpack.c.bf16 %v10350_v23, %v10348_v28  ;;  %10377 = vpow2.f32 %v7736_v54 }
 0x90c   : > { %v10354_v22 = vpop.eup %10353  ;;  %10379 = vpow2.f32 %v7742_v30 }
 0x90d   : > { %v10356_v7 = vpop.eup %10355  ;;  %7146 = vst [vmem:[%s11827_s1 + $0x224] sm:$0xff] %v8013_v24  ;;  %v8017_v62 = vpack.c.bf16 %v10354_v22, %v10352_v15  ;;  %10381 = vpow2.f32 %v7743_v59 }
 0x90e   : > { %v10358_v5 = vpop.eup %10357  ;;  %10383 = vpow2.f32 %v7749_v18 }
 0x90f   : > { %v10360_v49 = vpop.eup %10359  ;;  %7150 = vst [vmem:[%s11827_s1 + $0x240] sm:$0xff] %v8017_v62  ;;  %v8021_v40 = vpack.c.bf16 %v10358_v5, %v10356_v7  ;;  %10385 = vpow2.f32 %v7750_v50 }
 0x910   : > { %v10362_v0 = vpop.eup %10361  ;;  %10387 = vpow2.f32 %v7756_v34 }
 0x911   : > { %v10364_v3 = vpop.eup %10363  ;;  %7154 = vst [vmem:[%s11827_s1 + $0x25c] sm:$0xff] %v8021_v40  ;;  %v8025_v1 = vpack.c.bf16 %v10362_v0, %v10360_v49  ;;  %10389 = vpow2.f32 %v7757_v36 }
 0x912   : > { %v10366_v45 = vpop.eup %10365  ;;  %10391 = vpow2.f32 %v7763_v20 }
 0x913   : > { %v10368_v53 = vpop.eup %10367  ;;  %7158 = vst [vmem:[%s11827_s1 + $0x278] sm:$0xff] %v8025_v1  ;;  %v8029_v61 = vpack.c.bf16 %v10366_v45, %v10364_v3  ;;  %10393 = vpow2.f32 %v7764_v35 }
 0x914   : > { %v10370_v48 = vpop.eup %10369  ;;  %v5863_v16 = vadd.f32 1.0, %v10368_v53  ;;  %10395 = vpow2.f32 %v7770_v57 }
 0x915   : > { %v10372_v10 = vpop.eup %10371  ;;  %7162 = vst [vmem:[%s11827_s1 + $0x294] sm:$0xff] %v8029_v61  ;;  %v5864_v39 = vadd.f32 1.0, %v10370_v48  ;;  %10397 = vpow2.f32 %v7771_v27 }
 0x916   : > { %v10374_v4 = vpop.eup %10373  ;;  %10399 = vrcp.f32 %v5863_v16  ;;  %v5870_v19 = vadd.f32 1.0, %v10372_v10 }
 0x917   : > { %v10376_v38 = vpop.eup %10375  ;;  %10401 = vrcp.f32 %v5864_v39  ;;  %v5871_v29 = vadd.f32 1.0, %v10374_v4 }
 0x918   : > { %v10378_v46 = vpop.eup %10377  ;;  %10403 = vrcp.f32 %v5870_v19  ;;  %v5877_v58 = vadd.f32 1.0, %v10376_v38 }
 0x919   : > { %v10380_v25 = vpop.eup %10379  ;;  %10405 = vrcp.f32 %v5871_v29  ;;  %v5878_v21 = vadd.f32 1.0, %v10378_v46 }
 0x91a   : > { %v10382_v47 = vpop.eup %10381  ;;  %10407 = vrcp.f32 %v5877_v58  ;;  %v5884_v63 = vadd.f32 1.0, %v10380_v25 }
 0x91b   : > { %v10384_v44 = vpop.eup %10383  ;;  %10409 = vrcp.f32 %v5878_v21  ;;  %v5885_v51 = vadd.f32 1.0, %v10382_v47 }
 0x91c   : > { %v10386_v60 = vpop.eup %10385  ;;  %10411 = vrcp.f32 %v5884_v63  ;;  %v5891_v41 = vadd.f32 1.0, %v10384_v44 }
 0x91d   : > { %v10388_v8 = vpop.eup %10387  ;;  %10413 = vrcp.f32 %v5885_v51  ;;  %v5892_v37 = vadd.f32 1.0, %v10386_v60 }
 0x91e   : > { %v10390_v26 = vpop.eup %10389  ;;  %10415 = vrcp.f32 %v5891_v41  ;;  %v5898_v14 = vadd.f32 1.0, %v10388_v8 }
 0x91f   : > { %v10392_v42 = vpop.eup %10391  ;;  %10417 = vrcp.f32 %v5892_v37  ;;  %v5899_v13 = vadd.f32 1.0, %v10390_v26 }
 0x920   : > { %v10394_v31 = vpop.eup %10393  ;;  %10419 = vrcp.f32 %v5898_v14  ;;  %v5905_v11 = vadd.f32 1.0, %v10392_v42 }
 0x921   : > { %v10396_v56 = vpop.eup %10395  ;;  %10421 = vrcp.f32 %v5899_v13  ;;  %v5906_v54 = vadd.f32 1.0, %v10394_v31 }
 0x922   : > { %v10398_v9 = vpop.eup %10397  ;;  %10423 = vrcp.f32 %v5905_v11  ;;  %v5912_v2 = vadd.f32 1.0, %v10396_v56 }
 0x923   : > { %v10400_v30 = vpop.eup %10399  ;;  %10425 = vrcp.f32 %v5906_v54  ;;  %v5913_v55 = vadd.f32 1.0, %v10398_v9 }
 0x924   : > { %v10402_v28 = vpop.eup %10401  ;;  %10427 = vrcp.f32 %v5912_v2 }
 0x925   : > { %v10404_v32 = vpop.eup %10403  ;;  %v8033_v59 = vpack.c.bf16 %v10402_v28, %v10400_v30  ;;  %10429 = vrcp.f32 %v5913_v55 }
 0x926   : > { %v10406_v6 = vpop.eup %10405 }
 0x927   : > { %v10408_v23 = vpop.eup %10407  ;;  %7166 = vst [vmem:[%s11827_s1 + $0x2b0] sm:$0xff] %v8033_v59  ;;  %v8037_v18 = vpack.c.bf16 %v10406_v6, %v10404_v32 }
 0x928   : > { %v10410_v17 = vpop.eup %10409 }
 0x929   : > { %v10412_v12 = vpop.eup %10411  ;;  %7170 = vst [vmem:[%s11827_s1 + $0x2cc] sm:$0xff] %v8037_v18  ;;  %v8041_v15 = vpack.c.bf16 %v10410_v17, %v10408_v23 }
 0x92a   : > { %v10414_v24 = vpop.eup %10413 }
 0x92b   : > { %v10416_v50 = vpop.eup %10415  ;;  %7174 = vst [vmem:[%s11827_s1 + $0x2e8] sm:$0xff] %v8041_v15  ;;  %v8045_v33 = vpack.c.bf16 %v10414_v24, %v10412_v12 }
 0x92c   : > { %v10418_v22 = vpop.eup %10417 }
 0x92d   : > { %v10420_v34 = vpop.eup %10419  ;;  %7178 = vst [vmem:[%s11827_s1 + $0x304] sm:$0xff] %v8045_v33  ;;  %v8049_v52 = vpack.c.bf16 %v10418_v22, %v10416_v50 }
 0x92e   : > { %v10422_v7 = vpop.eup %10421 }
 0x92f   : > { %v10424_v62 = vpop.eup %10423  ;;  %7182 = vst [vmem:[%s11827_s1 + $0x320] sm:$0xff] %v8049_v52  ;;  %v8053_v36 = vpack.c.bf16 %v10422_v7, %v10420_v34 }
 0x930   : > { %v10426_v43 = vpop.eup %10425 }
 0x931   : > { %v10428_v5 = vpop.eup %10427  ;;  %7186 = vst [vmem:[%s11827_s1 + $0x33c] sm:$0xff] %v8053_v36  ;;  %v8057_v20 = vpack.c.bf16 %v10426_v43, %v10424_v62 }
 0x932   : > { %v10430_v49 = vpop.eup %10429 }
 0x933   : > { %7190 = vst [vmem:[%s11827_s1 + $0x358] sm:$0xff] %v8057_v20  ;;  %v8061_v40 = vpack.c.bf16 %v10430_v49, %v10428_v5 }
 0x935   : > { %7194 = vst [vmem:[%s11827_s1 + $0x374] sm:$0xff] %v8061_v40 }
 0x936 PF: > { %s29_s27 = sadd.s32 1, %s10438_s27  }
 0x937   : > { %p26_p4 = scmp.ge.s32.totalorder %s29_s27, 4  }
 0x939   :  { %28 = sbr.rel (!%p26_p4) target bundleno = 4 (0x4), region = 130 }

</bundles_post_ra>
